<compile_context>
chip_gen: v7x
topology: tpu7x:2x2x1
jax: 0.10.0
libtpu: 0.0.40
codegen_flags: <defaults>
</compile_context>

<pallas_src>
import math

import jax
import jax.numpy as jnp
from jax.experimental import pallas as pl
from jax.experimental.pallas import tpu as pltpu

IMAGE_SIZE = 784
H_DIM = 400
Z_DIM = 20

# lane-padded (multiple-of-128) dims used inside the kernel
IMG_PAD = 896   # 7 * 128
H_PAD = 512     # 4 * 128
Z_PAD = 128     # 1 * 128

# every zero-padded image column contributes exactly log(2) to the BCE sum
_PAD_BCE = float((IMG_PAD - IMAGE_SIZE) * math.log(2.0))


def _vae_kernel(x_ref, eps_ref,
                w1_ref, b1_ref, w2_ref, b2_ref,
                w3_ref, b3_ref, w4_ref, b4_ref,
                recon_ref, mu_ref, logvar_ref, loss_ref):
    x_bf = x_ref[...]                                        # (TILE_B, IMG_PAD) bf16

    # ---------------- encoder ----------------
    h = jnp.dot(x_bf, w1_ref[...], preferred_element_type=jnp.float32) + b1_ref[...]
    h = jnp.where(h >= 0.0, h, 0.2 * h)                      # LeakyReLU(0.2), f32 VPU
    enc = jnp.dot(h.astype(jnp.bfloat16), w2_ref[...],
                  preferred_element_type=jnp.float32) + b2_ref[...]
    mu = enc[:, :Z_PAD]                                      # 128-aligned static split
    logvar = enc[:, Z_PAD:]

    # ---------------- reparameterize ----------------
    std = jnp.exp(0.5 * logvar)
    z = mu + std * eps_ref[...]

    # ---------------- decoder ----------------
    d = jnp.dot(z.astype(jnp.bfloat16), w3_ref[...],
                preferred_element_type=jnp.float32) + b3_ref[...]
    d = jnp.maximum(d, 0.0)                                  # ReLU
    logits = jnp.dot(d.astype(jnp.bfloat16), w4_ref[...],
                     preferred_element_type=jnp.float32) + b4_ref[...]

    # shared transcendental: t feeds both sigmoid(logits) and the BCE log term
    t = jnp.exp(-jnp.abs(logits))
    inv = pl.reciprocal(1.0 + t, approx=True)                # EUP, ~free
    recon = jnp.where(logits >= 0.0, inv, t * inv)           # sigmoid(logits)

    recon_ref[...] = recon[:, :IMAGE_SIZE].astype(recon_ref.dtype)  # masked tail store
    mu_ref[...] = mu
    logvar_ref[...] = logvar

    # ---------------- loss: BCE(sum) + KLD ----------------
    # BCE from logits: max(l,0) - l*x + log1p(exp(-|l|)).
    x_f32 = x_bf.astype(jnp.float32)
    bce_elem = jnp.maximum(logits, 0.0) - logits * x_f32 + jnp.log1p(t)
    # padded image columns carry logits = x = 0 -> exactly log(2) each; subtract
    # the constant instead of masking.
    bce_row = jnp.sum(bce_elem, axis=1, keepdims=True) - _PAD_BCE

    var = std * std                                          # exp(logvar) w/o 2nd exp
    kld_row = -0.5 * jnp.sum(1.0 + logvar - mu * mu - var, axis=1, keepdims=True)
    loss_ref[...] = bce_row + kld_row                        # (TILE_B, 1)


def _pad2d(a, rows, cols, dtype=None):
    dtype = a.dtype if dtype is None else dtype
    out = jnp.zeros((rows, cols), dtype)
    return out.at[:a.shape[0], :a.shape[1]].set(a.astype(dtype))


def init_params(key, image_size=IMAGE_SIZE, h_dim=H_DIM, z_dim=Z_DIM):
    """PyTorch-style uniform(-1/sqrt(fan_in), 1/sqrt(fan_in)) init; weights stored
    as (in_features, out_features) so the kernel computes y = x @ W + b."""
    def linear(k, fan_in, fan_out):
        kw, kb = jax.random.split(k)
        bound = 1.0 / jnp.sqrt(fan_in)
        w = jax.random.uniform(kw, (fan_in, fan_out), jnp.float32, -bound, bound)
        b = jax.random.uniform(kb, (1, fan_out), jnp.float32, -bound, bound)
        return w, b

    k1, k2, k3, k4 = jax.random.split(key, 4)
    w1, b1 = linear(k1, image_size, h_dim)       # encoder Linear(784, 400)
    w2, b2 = linear(k2, h_dim, 2 * z_dim)        # encoder Linear(400, 40)
    w3, b3 = linear(k3, z_dim, h_dim)            # decoder Linear(20, 400)
    w4, b4 = linear(k4, h_dim, image_size)       # decoder Linear(400, 784)
    return (w1, b1, w2, b2, w3, b3, w4, b4)


def prepare_params(params):
    """One-time layout prep: lane-pad, fuse the mu/logvar heads into one matmul,
    cast weights to bf16. Call once and reuse the result across forward calls."""
    w1, b1, w2, b2, w3, b3, w4, b4 = params

    w1p = _pad2d(w1, IMG_PAD, H_PAD, jnp.bfloat16)
    b1p = _pad2d(b1, 1, H_PAD)

    # fused head: mu -> cols [0, Z_DIM), logvar -> cols [Z_PAD, Z_PAD + Z_DIM)
    w2p = jnp.zeros((H_PAD, 2 * Z_PAD), jnp.float32)
    w2p = w2p.at[:H_DIM, :Z_DIM].set(w2[:, :Z_DIM])
    w2p = w2p.at[:H_DIM, Z_PAD:Z_PAD + Z_DIM].set(w2[:, Z_DIM:])
    w2p = w2p.astype(jnp.bfloat16)
    b2p = jnp.zeros((1, 2 * Z_PAD), jnp.float32)
    b2p = b2p.at[:, :Z_DIM].set(b2[:, :Z_DIM])
    b2p = b2p.at[:, Z_PAD:Z_PAD + Z_DIM].set(b2[:, Z_DIM:])

    w3p = _pad2d(w3, Z_PAD, H_PAD, jnp.bfloat16)
    b3p = _pad2d(b3, 1, H_PAD)
    w4p = _pad2d(w4, H_PAD, IMG_PAD, jnp.bfloat16)
    b4p = _pad2d(b4, 1, IMG_PAD)
    return (w1p, b1p, w2p, b2p, w3p, b3p, w4p, b4p)


def _round8(v):
    return max(8, -(-v // 8) * 8)


def _tiling(batch):
    """Generation-aware tile size + VMEM limit."""
    try:
        vmem_cap = int(pltpu.get_tpu_info().vmem_capacity_bytes)
    except Exception:
        vmem_cap = 64 << 20
    if vmem_cap >= (96 << 20):          # v5e / v6e: 128 MiB physical VMEM
        tile_cap, vmem_limit = 512, 64 << 20
    else:                               # v7x: 64 MiB physical VMEM
        tile_cap, vmem_limit = 256, 40 << 20

    rounded = _round8(batch)
    if rounded <= 16:
        tile_b = rounded
    else:
        # prefer >= 2 grid steps so megacore / dual-TC chips can split the batch
        tile_b = min(tile_cap, _round8(-(-batch // 2)), rounded)
    num_tiles = -(-batch // tile_b)
    return tile_b, num_tiles, vmem_limit


def vae_forward(x, eps, prepared_params):
    """Returns (recon_x, loss, mu, logvar). Matches VAE.forward semantics; eps is
    the torch.randn reparameterization noise, passed in explicitly.
    `prepared_params` comes from prepare_params() (done once, not per call)."""
    B = x.shape[0]
    w1p, b1p, w2p, b2p, w3p, b3p, w4p, b4p = prepared_params

    tile_b, num_tiles, vmem_limit = _tiling(B)
    b_pad = num_tiles * tile_b

    x_p = _pad2d(x, b_pad, IMG_PAD, jnp.bfloat16)     # stream x as bf16
    eps_p = _pad2d(eps, b_pad, Z_PAD)                 # noise stays f32 (tiny)

    def batch_spec(cols):
        return pl.BlockSpec((tile_b, cols), lambda i: (i, 0))

    def const_spec(shape):
        idx = lambda i: (0, 0)
        try:   # constant block index -> single-buffer the weights (saves VMEM)
            return pl.BlockSpec(shape, idx, pipeline_mode=pl.Buffered(1))
        except TypeError:
            return pl.BlockSpec(shape, idx)

    in_specs = [
        batch_spec(IMG_PAD),                                         # x (bf16)
        batch_spec(Z_PAD),                                           # eps
        const_spec((IMG_PAD, H_PAD)), const_spec((1, H_PAD)),        # w1, b1
        const_spec((H_PAD, 2 * Z_PAD)), const_spec((1, 2 * Z_PAD)),  # w2 fused, b2
        const_spec((Z_PAD, H_PAD)), const_spec((1, H_PAD)),          # w3, b3
        const_spec((H_PAD, IMG_PAD)), const_spec((1, IMG_PAD)),      # w4, b4
    ]
    out_specs = (
        pl.BlockSpec((tile_b, IMAGE_SIZE), lambda i: (i, 0)),        # recon (bf16, 784)
        batch_spec(Z_PAD),                                           # mu
        batch_spec(Z_PAD),                                           # logvar
        pl.BlockSpec((tile_b, 1), lambda i: (i, 0)),                 # per-row loss
    )

    flops = 2 * B * (IMAGE_SIZE * H_DIM + H_DIM * 2 * Z_DIM
                     + Z_DIM * H_DIM + H_DIM * IMAGE_SIZE)
    transcendentals = B * (3 * IMAGE_SIZE + Z_DIM)
    weight_bytes = 2 * (IMG_PAD * H_PAD + H_PAD * 2 * Z_PAD
                        + Z_PAD * H_PAD + H_PAD * IMG_PAD)
    bytes_accessed = (weight_bytes
                      + 2 * b_pad * (IMG_PAD + IMAGE_SIZE)           # bf16 x + recon
                      + 4 * b_pad * (3 * Z_PAD + 1))                 # eps, mu, logvar, loss

    recon_p, mu_p, logvar_p, loss_rows = pl.pallas_call(
        _vae_kernel,
        out_shape=(
            jax.ShapeDtypeStruct((b_pad, IMAGE_SIZE), jnp.bfloat16),
            jax.ShapeDtypeStruct((b_pad, Z_PAD), jnp.float32),
            jax.ShapeDtypeStruct((b_pad, Z_PAD), jnp.float32),
            jax.ShapeDtypeStruct((b_pad, 1), jnp.float32),
        ),
        grid=(num_tiles,),
        in_specs=in_specs,
        out_specs=out_specs,
        compiler_params=pltpu.CompilerParams(
            dimension_semantics=("parallel",),
            vmem_limit_bytes=vmem_limit),
        cost_estimate=pl.CostEstimate(
            flops=flops,
            transcendentals=transcendentals,
            bytes_accessed=bytes_accessed),
    )(x_p, eps_p, w1p, b1p, w2p, b2p, w3p, b3p, w4p, b4p)

    # recon is already 784 wide; only slice the batch axis if it was padded.
    recon = recon_p if b_pad == B else recon_p[:B]
    mu = mu_p[:B, :Z_DIM]
    logvar = logvar_p[:B, :Z_DIM]
    loss = jnp.sum(loss_rows if b_pad == B else loss_rows[:B])
    return recon, loss, mu, logvar


if __name__ == "__main__":
    key = jax.random.PRNGKey(0)
    k_params, k_x, k_eps = jax.random.split(key, 3)

    B = 8
    params = init_params(k_params)
    prepared = prepare_params(params)      # one-time weight layout prep (hoisted)

    # Inputs in [0, 1] (BCE target requirement), like normalized MNIST pixels.
    x = jax.random.uniform(k_x, (B, IMAGE_SIZE), jnp.float32)
    # torch.randn equivalent for the reparameterization noise (explicit -> deterministic).
    eps = jax.random.normal(k_eps, (B, Z_DIM), jnp.float32)

    fwd = jax.jit(vae_forward)
    recon_x, loss, mu, logvar = jax.block_until_ready(fwd(x, eps, prepared))

    assert recon_x.shape == (B, IMAGE_SIZE)
    assert mu.shape == (B, Z_DIM) and logvar.shape == (B, Z_DIM)
    assert loss.shape == ()
    assert bool(jnp.isfinite(loss))

    print("KERNEL_OK")
</pallas_src>

<mosaic_0001>
module attributes {stable_mosaic.version = 11 : i64} {
  func.func @_vae_kernel(%arg0: i32, %arg1: memref<8x896xbf16, #tpu.memory_space<vmem>>, %arg2: memref<8x128xf32, #tpu.memory_space<vmem>>, %arg3: memref<896x512xbf16, #tpu.memory_space<vmem>>, %arg4: memref<1x512xf32, #tpu.memory_space<vmem>>, %arg5: memref<512x256xbf16, #tpu.memory_space<vmem>>, %arg6: memref<1x256xf32, #tpu.memory_space<vmem>>, %arg7: memref<128x512xbf16, #tpu.memory_space<vmem>>, %arg8: memref<1x512xf32, #tpu.memory_space<vmem>>, %arg9: memref<512x896xbf16, #tpu.memory_space<vmem>>, %arg10: memref<1x896xf32, #tpu.memory_space<vmem>>, %arg11: memref<8x784xbf16, #tpu.memory_space<vmem>>, %arg12: memref<8x128xf32, #tpu.memory_space<vmem>>, %arg13: memref<8x128xf32, #tpu.memory_space<vmem>>, %arg14: memref<8x1xf32, #tpu.memory_space<vmem>>) attributes {dimension_semantics = [#tpu.dimension_semantics<parallel>], iteration_bounds = array<i64: 1>, scalar_prefetch = 0 : i64, scratch_operands = 0 : i64, tpu.core_type = #tpu.core_type<tc>, window_params = [{transform_indices = @transform_0, window_bounds = array<i64: 8, 896>}, {transform_indices = @transform_1, window_bounds = array<i64: 8, 128>}, {pipeline_mode = #tpu.pipeline_mode<synchronous>, transform_indices = @transform_2, window_bounds = array<i64: 896, 512>}, {pipeline_mode = #tpu.pipeline_mode<synchronous>, transform_indices = @transform_3, window_bounds = array<i64: 1, 512>}, {pipeline_mode = #tpu.pipeline_mode<synchronous>, transform_indices = @transform_4, window_bounds = array<i64: 512, 256>}, {pipeline_mode = #tpu.pipeline_mode<synchronous>, transform_indices = @transform_5, window_bounds = array<i64: 1, 256>}, {pipeline_mode = #tpu.pipeline_mode<synchronous>, transform_indices = @transform_6, window_bounds = array<i64: 128, 512>}, {pipeline_mode = #tpu.pipeline_mode<synchronous>, transform_indices = @transform_7, window_bounds = array<i64: 1, 512>}, {pipeline_mode = #tpu.pipeline_mode<synchronous>, transform_indices = @transform_8, window_bounds = array<i64: 512, 896>}, {pipeline_mode = #tpu.pipeline_mode<synchronous>, transform_indices = @transform_9, window_bounds = array<i64: 1, 896>}, {transform_indices = @transform_10, window_bounds = array<i64: 8, 784>}, {transform_indices = @transform_11, window_bounds = array<i64: 8, 128>}, {transform_indices = @transform_12, window_bounds = array<i64: 8, 128>}, {transform_indices = @transform_13, window_bounds = array<i64: 8, 1>}]} {
    %c0 = arith.constant 0 : index
    %c0_0 = arith.constant 0 : index
    %0 = vector.load %arg1[%c0, %c0_0] : memref<8x896xbf16, #tpu.memory_space<vmem>>, vector<8x896xbf16>
    %c0_1 = arith.constant 0 : index
    %c0_2 = arith.constant 0 : index
    %1 = vector.load %arg3[%c0_1, %c0_2] : memref<896x512xbf16, #tpu.memory_space<vmem>>, vector<896x512xbf16>
    %cst = arith.constant dense<0.000000e+00> : vector<8x512xf32>
    %2 = tpu.matmul %0, %1, %cst {dimension_numbers = #tpu.dot_dimension_numbers<[1], [0], [0], [1], [0, 0, 1, 1], [], []>} : vector<8x896xbf16>, vector<896x512xbf16>, vector<8x512xf32> -> vector<8x512xf32>
    %c0_3 = arith.constant 0 : index
    %c0_4 = arith.constant 0 : index
    %3 = vector.load %arg4[%c0_3, %c0_4] : memref<1x512xf32, #tpu.memory_space<vmem>>, vector<1x512xf32>
    %4 = vector.broadcast %3 : vector<1x512xf32> to vector<8x512xf32>
    %5 = arith.addf %2, %4 : vector<8x512xf32>
    %cst_5 = arith.constant 0.000000e+00 : f32
    %6 = vector.broadcast %cst_5 : f32 to vector<8x512xf32>
    %7 = arith.cmpf oge, %5, %6 : vector<8x512xf32>
    %cst_6 = arith.constant 2.000000e-01 : f32
    %8 = vector.broadcast %cst_6 : f32 to vector<8x512xf32>
    %9 = arith.mulf %8, %5 : vector<8x512xf32>
    %10 = arith.select %7, %5, %9 : vector<8x512xi1>, vector<8x512xf32>
    %11 = arith.truncf %10 : vector<8x512xf32> to vector<8x512xbf16>
    %c0_7 = arith.constant 0 : index
    %c0_8 = arith.constant 0 : index
    %12 = vector.load %arg5[%c0_7, %c0_8] : memref<512x256xbf16, #tpu.memory_space<vmem>>, vector<512x256xbf16>
    %cst_9 = arith.constant dense<0.000000e+00> : vector<8x256xf32>
    %13 = tpu.matmul %11, %12, %cst_9 {dimension_numbers = #tpu.dot_dimension_numbers<[1], [0], [0], [1], [0, 0, 1, 1], [], []>} : vector<8x512xbf16>, vector<512x256xbf16>, vector<8x256xf32> -> vector<8x256xf32>
    %c0_10 = arith.constant 0 : index
    %c0_11 = arith.constant 0 : index
    %14 = vector.load %arg6[%c0_10, %c0_11] : memref<1x256xf32, #tpu.memory_space<vmem>>, vector<1x256xf32>
    %15 = vector.broadcast %14 : vector<1x256xf32> to vector<8x256xf32>
    %16 = arith.addf %13, %15 : vector<8x256xf32>
    %17 = vector.extract_strided_slice %16 {offsets = [0, 0], sizes = [8, 128], strides = [1, 1]} : vector<8x256xf32> to vector<8x128xf32>
    %18 = vector.extract_strided_slice %16 {offsets = [0, 128], sizes = [8, 128], strides = [1, 1]} : vector<8x256xf32> to vector<8x128xf32>
    %cst_12 = arith.constant 5.000000e-01 : f32
    %19 = vector.broadcast %cst_12 : f32 to vector<8x128xf32>
    %20 = arith.mulf %19, %18 : vector<8x128xf32>
    %21 = math.exp %20 : vector<8x128xf32>
    %c0_13 = arith.constant 0 : index
    %c0_14 = arith.constant 0 : index
    %22 = vector.load %arg2[%c0_13, %c0_14] : memref<8x128xf32, #tpu.memory_space<vmem>>, vector<8x128xf32>
    %23 = arith.mulf %21, %22 : vector<8x128xf32>
    %24 = arith.addf %17, %23 : vector<8x128xf32>
    %25 = arith.truncf %24 : vector<8x128xf32> to vector<8x128xbf16>
    %c0_15 = arith.constant 0 : index
    %c0_16 = arith.constant 0 : index
    %26 = vector.load %arg7[%c0_15, %c0_16] : memref<128x512xbf16, #tpu.memory_space<vmem>>, vector<128x512xbf16>
    %cst_17 = arith.constant dense<0.000000e+00> : vector<8x512xf32>
    %27 = tpu.matmul %25, %26, %cst_17 {dimension_numbers = #tpu.dot_dimension_numbers<[1], [0], [0], [1], [0, 0, 1, 1], [], []>} : vector<8x128xbf16>, vector<128x512xbf16>, vector<8x512xf32> -> vector<8x512xf32>
    %c0_18 = arith.constant 0 : index
    %c0_19 = arith.constant 0 : index
    %28 = vector.load %arg8[%c0_18, %c0_19] : memref<1x512xf32, #tpu.memory_space<vmem>>, vector<1x512xf32>
    %29 = vector.broadcast %28 : vector<1x512xf32> to vector<8x512xf32>
    %30 = arith.addf %27, %29 : vector<8x512xf32>
    %cst_20 = arith.constant 0.000000e+00 : f32
    %31 = vector.broadcast %cst_20 : f32 to vector<8x512xf32>
    %32 = arith.maximumf %30, %31 : vector<8x512xf32>
    %33 = arith.truncf %32 : vector<8x512xf32> to vector<8x512xbf16>
    %c0_21 = arith.constant 0 : index
    %c0_22 = arith.constant 0 : index
    %34 = vector.load %arg9[%c0_21, %c0_22] : memref<512x896xbf16, #tpu.memory_space<vmem>>, vector<512x896xbf16>
    %cst_23 = arith.constant dense<0.000000e+00> : vector<8x896xf32>
    %35 = tpu.matmul %33, %34, %cst_23 {dimension_numbers = #tpu.dot_dimension_numbers<[1], [0], [0], [1], [0, 0, 1, 1], [], []>} : vector<8x512xbf16>, vector<512x896xbf16>, vector<8x896xf32> -> vector<8x896xf32>
    %c0_24 = arith.constant 0 : index
    %c0_25 = arith.constant 0 : index
    %36 = vector.load %arg10[%c0_24, %c0_25] : memref<1x896xf32, #tpu.memory_space<vmem>>, vector<1x896xf32>
    %37 = vector.broadcast %36 : vector<1x896xf32> to vector<8x896xf32>
    %38 = arith.addf %35, %37 : vector<8x896xf32>
    %39 = math.absf %38 : vector<8x896xf32>
    %cst_26 = arith.constant 0.000000e+00 : f32
    %40 = vector.broadcast %cst_26 : f32 to vector<8x896xf32>
    %41 = arith.subf %40, %39 : vector<8x896xf32>
    %42 = math.exp %41 : vector<8x896xf32>
    %cst_27 = arith.constant 1.000000e+00 : f32
    %43 = vector.broadcast %cst_27 : f32 to vector<8x896xf32>
    %44 = arith.addf %43, %42 : vector<8x896xf32>
    %45 = tpu.reciprocal %44 {approx = true} : vector<8x896xf32> -> vector<8x896xf32>
    %cst_28 = arith.constant 0.000000e+00 : f32
    %46 = vector.broadcast %cst_28 : f32 to vector<8x896xf32>
    %47 = arith.cmpf oge, %38, %46 : vector<8x896xf32>
    %48 = arith.mulf %42, %45 : vector<8x896xf32>
    %49 = arith.select %47, %45, %48 : vector<8x896xi1>, vector<8x896xf32>
    %50 = vector.extract_strided_slice %49 {offsets = [0, 0], sizes = [8, 784], strides = [1, 1]} : vector<8x896xf32> to vector<8x784xf32>
    %51 = arith.truncf %50 : vector<8x784xf32> to vector<8x784xbf16>
    %c0_29 = arith.constant 0 : index
    %c0_30 = arith.constant 0 : index
    %52 = vector.load %arg11[%c0_29, %c0_30] : memref<8x784xbf16, #tpu.memory_space<vmem>>, vector<8x784xbf16>
    tpu.vector_store %arg11[%c0_29, %c0_30], %51 {strides = array<i32>} : memref<8x784xbf16, #tpu.memory_space<vmem>>, vector<8x784xbf16>,
    %c0_31 = arith.constant 0 : index
    %c0_32 = arith.constant 0 : index
    %53 = vector.load %arg12[%c0_31, %c0_32] : memref<8x128xf32, #tpu.memory_space<vmem>>, vector<8x128xf32>
    tpu.vector_store %arg12[%c0_31, %c0_32], %17 {strides = array<i32>} : memref<8x128xf32, #tpu.memory_space<vmem>>, vector<8x128xf32>,
    %c0_33 = arith.constant 0 : index
    %c0_34 = arith.constant 0 : index
    %54 = vector.load %arg13[%c0_33, %c0_34] : memref<8x128xf32, #tpu.memory_space<vmem>>, vector<8x128xf32>
    tpu.vector_store %arg13[%c0_33, %c0_34], %18 {strides = array<i32>} : memref<8x128xf32, #tpu.memory_space<vmem>>, vector<8x128xf32>,
    %55 = arith.extf %0 : vector<8x896xbf16> to vector<8x896xf32>
    %cst_35 = arith.constant 0.000000e+00 : f32
    %56 = vector.broadcast %cst_35 : f32 to vector<8x896xf32>
    %57 = arith.maximumf %38, %56 : vector<8x896xf32>
    %58 = arith.mulf %38, %55 : vector<8x896xf32>
    %59 = arith.subf %57, %58 : vector<8x896xf32>
    %60 = math.log1p %42 : vector<8x896xf32>
    %61 = arith.addf %59, %60 : vector<8x896xf32>
    %cst_36 = arith.constant dense<0.000000e+00> : vector<8xf32>
    %62 = vector.multi_reduction <add>, %61, %cst_36 [1] : vector<8x896xf32> to vector<8xf32>
    %63 = vector.shape_cast %62 : vector<8xf32> to vector<8x1xf32>
    %cst_37 = arith.constant 77.6324844 : f32
    %64 = vector.broadcast %cst_37 : f32 to vector<8x1xf32>
    %65 = arith.subf %63, %64 : vector<8x1xf32>
    %66 = arith.mulf %21, %21 : vector<8x128xf32>
    %cst_38 = arith.constant 1.000000e+00 : f32
    %67 = vector.broadcast %cst_38 : f32 to vector<8x128xf32>
    %68 = arith.addf %67, %18 : vector<8x128xf32>
    %69 = arith.mulf %17, %17 : vector<8x128xf32>
    %70 = arith.subf %68, %69 : vector<8x128xf32>
    %71 = arith.subf %70, %66 : vector<8x128xf32>
    %cst_39 = arith.constant dense<0.000000e+00> : vector<8xf32>
    %72 = vector.multi_reduction <add>, %71, %cst_39 [1] : vector<8x128xf32> to vector<8xf32>
    %73 = vector.shape_cast %72 : vector<8xf32> to vector<8x1xf32>
    %cst_40 = arith.constant -5.000000e-01 : f32
    %74 = vector.broadcast %cst_40 : f32 to vector<8x1xf32>
    %75 = arith.mulf %74, %73 : vector<8x1xf32>
    %76 = arith.addf %65, %75 : vector<8x1xf32>
    %c0_41 = arith.constant 0 : index
    %c0_42 = arith.constant 0 : index
    %77 = vector.load %arg14[%c0_41, %c0_42] : memref<8x1xf32, #tpu.memory_space<vmem>>, vector<8x1xf32>
    tpu.vector_store %arg14[%c0_41, %c0_42], %76 {strides = array<i32>} : memref<8x1xf32, #tpu.memory_space<vmem>>, vector<8x1xf32>,
    return
  }
  func.func @transform_0(%arg0: i32) -> (i32, i32) {
    %c0_i32 = arith.constant 0 : i32
    %c0_i32_0 = arith.constant 0 : i32
    return %arg0, %c0_i32 : i32, i32
  }
  func.func @transform_1(%arg0: i32) -> (i32, i32) {
    %c0_i32 = arith.constant 0 : i32
    %c0_i32_0 = arith.constant 0 : i32
    return %arg0, %c0_i32 : i32, i32
  }
  func.func @transform_2(%arg0: i32) -> (i32, i32) {
    %c0_i32 = arith.constant 0 : i32
    %c0_i32_0 = arith.constant 0 : i32
    %c0_i32_1 = arith.constant 0 : i32
    return %c0_i32, %c0_i32_0 : i32, i32
  }
  func.func @transform_3(%arg0: i32) -> (i32, i32) {
    %c0_i32 = arith.constant 0 : i32
    %c0_i32_0 = arith.constant 0 : i32
    %c0_i32_1 = arith.constant 0 : i32
    return %c0_i32, %c0_i32_0 : i32, i32
  }
  func.func @transform_4(%arg0: i32) -> (i32, i32) {
    %c0_i32 = arith.constant 0 : i32
    %c0_i32_0 = arith.constant 0 : i32
    %c0_i32_1 = arith.constant 0 : i32
    return %c0_i32, %c0_i32_0 : i32, i32
  }
  func.func @transform_5(%arg0: i32) -> (i32, i32) {
    %c0_i32 = arith.constant 0 : i32
    %c0_i32_0 = arith.constant 0 : i32
    %c0_i32_1 = arith.constant 0 : i32
    return %c0_i32, %c0_i32_0 : i32, i32
  }
  func.func @transform_6(%arg0: i32) -> (i32, i32) {
    %c0_i32 = arith.constant 0 : i32
    %c0_i32_0 = arith.constant 0 : i32
    %c0_i32_1 = arith.constant 0 : i32
    return %c0_i32, %c0_i32_0 : i32, i32
  }
  func.func @transform_7(%arg0: i32) -> (i32, i32) {
    %c0_i32 = arith.constant 0 : i32
    %c0_i32_0 = arith.constant 0 : i32
    %c0_i32_1 = arith.constant 0 : i32
    return %c0_i32, %c0_i32_0 : i32, i32
  }
  func.func @transform_8(%arg0: i32) -> (i32, i32) {
    %c0_i32 = arith.constant 0 : i32
    %c0_i32_0 = arith.constant 0 : i32
    %c0_i32_1 = arith.constant 0 : i32
    return %c0_i32, %c0_i32_0 : i32, i32
  }
  func.func @transform_9(%arg0: i32) -> (i32, i32) {
    %c0_i32 = arith.constant 0 : i32
    %c0_i32_0 = arith.constant 0 : i32
    %c0_i32_1 = arith.constant 0 : i32
    return %c0_i32, %c0_i32_0 : i32, i32
  }
  func.func @transform_10(%arg0: i32) -> (i32, i32) {
    %c0_i32 = arith.constant 0 : i32
    %c0_i32_0 = arith.constant 0 : i32
    return %arg0, %c0_i32 : i32, i32
  }
  func.func @transform_11(%arg0: i32) -> (i32, i32) {
    %c0_i32 = arith.constant 0 : i32
    %c0_i32_0 = arith.constant 0 : i32
    return %arg0, %c0_i32 : i32, i32
  }
  func.func @transform_12(%arg0: i32) -> (i32, i32) {
    %c0_i32 = arith.constant 0 : i32
    %c0_i32_0 = arith.constant 0 : i32
    return %arg0, %c0_i32 : i32, i32
  }
  func.func @transform_13(%arg0: i32) -> (i32, i32) {
    %c0_i32 = arith.constant 0 : i32
    %c0_i32_0 = arith.constant 0 : i32
    return %arg0, %c0_i32 : i32, i32
  }
}

</mosaic_0001>

<bundles_post_ra>
// kernel: vae_forward.1
= control target key start
LH: loop header
LB: loop body
LE: loop exit
PB: predicated region body
PF: predicated region fallthrough
CT: control target
= control target key end

     0   :  { %19 = vsyncpa [#allocation3], 0  ;;  %s6751_s0 = inlined_call_operand.vmem [shape: bf16[8,896], index: 0, kind: input, shape index: {}]   ;;  %s6752_s1 = inlined_call_operand.vmem [shape: f32[8,128], index: 1, kind: input, shape index: {}]   ;;  %s6753_s2 = inlined_call_operand.hbm [shape: bf16[896,512], index: 2, kind: input, shape index: {}]   ;;  %s6754_s3 = inlined_call_operand.vmem [shape: f32[1,512], index: 3, kind: input, shape index: {}]   ;;  %s6755_s4 = inlined_call_operand.hbm [shape: bf16[512,256], index: 4, kind: input, shape index: {}]   ;;  %s6756_s5 = inlined_call_operand.vmem [shape: f32[1,256], index: 5, kind: input, shape index: {}]   ;;  %s6757_s6 = inlined_call_operand.hbm [shape: bf16[128,512], index: 6, kind: input, shape index: {}]   ;;  %s6758_s7 = inlined_call_operand.vmem [shape: f32[1,512], index: 7, kind: input, shape index: {}]   ;;  %s6759_s8 = inlined_call_operand.hbm [shape: bf16[512,896], index: 8, kind: input, shape index: {}]   ;;  %s6760_s9 = inlined_call_operand.vmem [shape: f32[1,896], index: 9, kind: input, shape index: {}]   ;;  %s6761_s10 = inlined_call_operand.hbm [shape: bf16[8,784], index: 10, kind: output, shape index: {0}]   ;;  %s6762_s11 = inlined_call_operand.hbm [shape: f32[8,128], index: 11, kind: output, shape index: {1}]   ;;  %s6763_s12 = inlined_call_operand.hbm [shape: f32[8,128], index: 12, kind: output, shape index: {2}]   ;;  %s6764_s13 = inlined_call_operand.vmem [shape: f32[8,1], index: 13, kind: output, shape index: {3}]  }
   0x1   :  { %20 = vsyncpa [#allocation6], 0 }
   0x2   :  { %21 = vsyncpa [#allocation9], 0 }
   0x3   :  { %22 = vsyncpa [#allocation4], 0 }
   0x4   :  { %23 = vsyncpa [#allocation12], 0  ;;  %s6350_s25 = smov [#allocation5]   ;;  %s6186_s29 = scalar_lea.hbm %s6755_s4, 8192 }
   0x5   :  { %s47_s26 = sshll.u32 %s6350_s25, 4  ;;  %p6187_p0 = scmp.ne.s32.totalorder %s6755_s4, %s6186_s29  ;;  %s48_s26 = int_to_ptr.vmem [resolvable:$true] %s47_s26 }
   0x6   :  { %p6190_p1 = scmp.lt.u32.totalorder %s6186_s29, %s6755_s4 }
   0x8   :  { %p6192_p2 = pnand %p6190_p1, %p6187_p0 }
   0xa   :  { %6195 = shalt.err (!%p6192_p2)
}
   0xb   :  { %s6196_s17 = scalar_lea.vmem %s48_s26, 8192  ;;  %p6201_p4 = scmp.lt.s32.totalorder %s48_s26, %s48_s26 }
   0xc   :  { %p6197_p3 = scmp.ne.s32.totalorder %s48_s26, %s6196_s17  ;;  %p6202_p5 = scmp.lt.s32.totalorder %s6196_s17, %s6196_s17 }
   0xe   :  { %p6203_p6 = por %p6202_p5, %p6201_p4 }
  0x10   :  { %p6204_p7 = pnand %p6203_p6, %p6197_p3 }
  0x12   :  { %6207 = shalt.err (!%p6204_p7)
}
  0x13   :  { %s6351_s18 = smov 128   ;;  %s6352_s19 = smov 8  }
  0x14   :  { %53 = dma.hbm_to_vmem [thread:$0]  %s6755_s4, 8192, %s48_s26, [#allocation6], %s6351_s18, %s6351_s18, %s6352_s19  }
  0x15   :  { %s6353_s22 = smov [#allocation2]   ;;  %s6208_s27 = scalar_lea.hbm %s6753_s2, 28672 }
  0x16   :  { %s33_s23 = sshll.u32 %s6353_s22, 4  ;;  %p6209_p8 = scmp.ne.s32.totalorder %s6753_s2, %s6208_s27  ;;  %s34_s23 = int_to_ptr.vmem [resolvable:$true] %s33_s23 }
  0x17   :  { %p6212_p9 = scmp.lt.u32.totalorder %s6208_s27, %s6753_s2 }
  0x19   :  { %p6214_p10 = pnand %p6212_p9, %p6209_p8 }
  0x1b   :  { %6217 = shalt.err (!%p6214_p10)
}
  0x1c   :  { %s6218_s15 = scalar_lea.vmem %s34_s23, 28672  ;;  %p6223_p12 = scmp.lt.s32.totalorder %s34_s23, %s34_s23 }
  0x1d   :  { %p6219_p11 = scmp.ne.s32.totalorder %s34_s23, %s6218_s15  ;;  %p6224_p13 = scmp.lt.s32.totalorder %s6218_s15, %s6218_s15 }
  0x1f   :  { %p6225_p0 = por %p6224_p13, %p6223_p12 }
  0x21   :  { %p6226_p1 = pnand %p6225_p0, %p6219_p11 }
  0x23   :  { %6229 = shalt.err (!%p6226_p1)
}
  0x24   :  { %s6354_s4 = smov 256   ;;  %s6355_s26 = smov 16  }
  0x25   :  { %39 = dma.hbm_to_vmem [thread:$0]  %s6753_s2, 28672, %s34_s23, [#allocation3], %s6354_s4, %s6354_s4, %s6355_s26  }
  0x26   :  { %s6356_s18 = smov [#allocation7]   ;;  %s6357_s20 = smov [#allocation8]  }
  0x27   :  { %s61_s19 = sshll.u32 %s6356_s18, 4  ;;  %s75_s21 = sshll.u32 %s6357_s20, 4  ;;  %s62_s19 = int_to_ptr.vmem [resolvable:$true] %s61_s19  ;;  %s6458_s21 = int_to_ptr.vmem [resolvable:$true] %s75_s21 }
  0x28   :  { %s6230_s25 = scalar_lea.hbm %s6757_s6, 4096 }
  0x29   :  { %p6231_p2 = scmp.ne.s32.totalorder %s6757_s6, %s6230_s25  ;;  %p6234_p3 = scmp.lt.u32.totalorder %s6230_s25, %s6757_s6 }
  0x2b   :  { %p6236_p4 = pnand %p6234_p3, %p6231_p2 }
  0x2d   :  { %6239 = shalt.err (!%p6236_p4)
}
  0x2e   :  { %s6240_s2 = scalar_lea.vmem %s62_s19, 4096  ;;  %p6245_p6 = scmp.lt.s32.totalorder %s62_s19, %s62_s19 }
  0x2f   :  { %p6241_p5 = scmp.ne.s32.totalorder %s62_s19, %s6240_s2  ;;  %p6246_p7 = scmp.lt.s32.totalorder %s6240_s2, %s6240_s2 }
  0x31   :  { %p6247_p8 = por %p6246_p7, %p6245_p6 }
  0x33   :  { %p6248_p9 = pnand %p6247_p8, %p6241_p5 }
  0x35   :  { %6251 = shalt.err (!%p6248_p9)
}
  0x36   :  { %67 = dma.hbm_to_vmem [thread:$0]  %s6757_s6, 4096, %s62_s19, [#allocation6], %s6354_s4, %s6354_s4, %s6355_s26  }
  0x37   :  { %s6252_s17 = scalar_lea.hbm %s6759_s8, 28672 }
  0x38   :  { %p6253_p10 = scmp.ne.s32.totalorder %s6759_s8, %s6252_s17  ;;  %p6256_p11 = scmp.lt.u32.totalorder %s6252_s17, %s6759_s8 }
  0x3a   :  { %p6258_p12 = pnand %p6256_p11, %p6253_p10 }
  0x3c   :  { %6261 = shalt.err (!%p6258_p12)
}
  0x3d   :  { %s6262_s25 = scalar_lea.vmem %s6458_s21, 28672  ;;  %p6267_p0 = scmp.lt.s32.totalorder %s6458_s21, %s6458_s21 }
  0x3e   :  { %p6263_p13 = scmp.ne.s32.totalorder %s6458_s21, %s6262_s25  ;;  %p6268_p1 = scmp.lt.s32.totalorder %s6262_s25, %s6262_s25 }
  0x40   :  { %p6269_p2 = por %p6268_p1, %p6267_p0 }
  0x42   :  { %p6270_p3 = pnand %p6269_p2, %p6263_p13 }
  0x44   :  { %6273 = shalt.err (!%p6270_p3)
}
  0x45   :  { %s6358_s6 = smov 448   ;;  %s6359_s4 = smov 28  }
  0x46   :  { %81 = dma.hbm_to_vmem [thread:$0]  %s6759_s8, 28672, %s6458_s21, [#allocation9], %s6358_s6, %s6358_s6, %s6359_s4  }
  0x47   :  { %6340 = dma.done.wait [#allocation3], 28672  }
  0x48   :  { %6341 = vsyncadd [#allocation3], 4294938624 }
  0x49   :  { %6342 = dma.done.wait [#allocation6], 12288  }
  0x4a   :  { %6343 = vsyncadd [#allocation6], 4294955008 }
  0x4b   :  { %6344 = dma.done.wait [#allocation9], 28672  }
  0x4c   :  { %6345 = vsyncadd [#allocation9], 4294938624  ;;  %v5331_v0 = vld [vmem:[#allocation2 + $0x4] ss:$16 sps:$4 sm:$0xff]   ;;  %v5333_v1 = vld [vmem:[#allocation2 + $0xc] ss:$16 sps:$4 sm:$0xff]  }
  0x4d   :  { %1492 = vmatprep.subr.bf16.mxu0 %v5331_v0  ;;  %v5335_v2 = vld [vmem:[#allocation2] ss:$16 sps:$4 sm:$0xff]   ;;  %v5336_v3 = vld [vmem:[#allocation2 + $0x8] ss:$16 sps:$4 sm:$0xff]   ;;  %1656 = vmatprep.subr.bf16.mxu1 %v5333_v1  ;;  %v5337_v4 = vld [vmem:[#allocation2 + $0x24] ss:$16 sps:$4 sm:$0xff]  }
  0x4e   :  { %1493 = vmatpush1.bf16.msra.mxu0 %v5335_v2  ;;  %1657 = vmatpush1.bf16.msra.mxu1 %v5336_v3  ;;  %v5339_v5 = vld [vmem:[#allocation2 + $0x2c] ss:$16 sps:$4 sm:$0xff]   ;;  %v5341_v6 = vld [vmem:[#allocation2 + $0x20] ss:$16 sps:$4 sm:$0xff]   ;;  %v5342_v7 = vld [vmem:[#allocation2 + $0x28] ss:$16 sps:$4 sm:$0xff]  }
  0x4f   :  { %1494 = vmatprep.subr.bf16.mxu0 %v5337_v4  ;;  %1658 = vmatprep.subr.bf16.mxu1 %v5339_v5  ;;  %v5343_v8 = vld [vmem:[#allocation2 + $0x44] ss:$16 sps:$4 sm:$0xff]   ;;  %v5345_v9 = vld [vmem:[#allocation2 + $0x4c] ss:$16 sps:$4 sm:$0xff]   ;;  %v5347_v10 = vld [vmem:[#allocation2 + $0x40] ss:$16 sps:$4 sm:$0xff]  }
  0x50   :  { %v5348_v11 = vld [vmem:[#allocation2 + $0x48] ss:$16 sps:$4 sm:$0xff]   ;;  %v5349_v12 = vld [vmem:[#allocation2 + $0x64] ss:$16 sps:$4 sm:$0xff]   ;;  %v5351_v13 = vld [vmem:[#allocation2 + $0x6c] ss:$16 sps:$4 sm:$0xff]  }
  0x51   :  { %v5353_v14 = vld [vmem:[#allocation2 + $0x60] ss:$16 sps:$4 sm:$0xff]   ;;  %v5354_v15 = vld [vmem:[#allocation2 + $0x68] ss:$16 sps:$4 sm:$0xff]   ;;  %v5355_v16 = vld [vmem:[#allocation2 + $0x84] ss:$16 sps:$4 sm:$0xff]  }
  0x52   :  { %1495 = vmatpush1.bf16.msra.mxu0 %v5341_v6  ;;  %1659 = vmatpush1.bf16.msra.mxu1 %v5342_v7  ;;  %v5357_v17 = vld [vmem:[#allocation2 + $0x8c] ss:$16 sps:$4 sm:$0xff]   ;;  %v5359_v18 = vld [vmem:[#allocation2 + $0x80] ss:$16 sps:$4 sm:$0xff]   ;;  %v5360_v19 = vld [vmem:[#allocation2 + $0x88] ss:$16 sps:$4 sm:$0xff]  }
  0x53   :  { %1496 = vmatprep.subr.bf16.mxu0 %v5343_v8  ;;  %1660 = vmatprep.subr.bf16.mxu1 %v5345_v9  ;;  %v5361_v20 = vld [vmem:[#allocation2 + $0xa4] ss:$16 sps:$4 sm:$0xff]   ;;  %v5363_v21 = vld [vmem:[#allocation2 + $0xac] ss:$16 sps:$4 sm:$0xff]   ;;  %v5365_v22 = vld [vmem:[#allocation2 + $0xa0] ss:$16 sps:$4 sm:$0xff]  }
  0x54   :  { %v5366_v23 = vld [vmem:[#allocation2 + $0xa8] ss:$16 sps:$4 sm:$0xff]   ;;  %v5367_v24 = vld [vmem:[#allocation2 + $0xc4] ss:$16 sps:$4 sm:$0xff]   ;;  %v5369_v25 = vld [vmem:[#allocation2 + $0xcc] ss:$16 sps:$4 sm:$0xff]  }
  0x55   :  { %v5371_v26 = vld [vmem:[#allocation2 + $0xc0] ss:$16 sps:$4 sm:$0xff]   ;;  %v5372_v27 = vld [vmem:[#allocation2 + $0xc8] ss:$16 sps:$4 sm:$0xff]   ;;  %v5373_v28 = vld [vmem:[#allocation2 + $0xe4] ss:$16 sps:$4 sm:$0xff]  }
  0x56   :  { %1497 = vmatpush1.bf16.msra.mxu0 %v5347_v10  ;;  %1661 = vmatpush1.bf16.msra.mxu1 %v5348_v11  ;;  %v5375_v29 = vld [vmem:[#allocation2 + $0xec] ss:$16 sps:$4 sm:$0xff]   ;;  %v5377_v30 = vld [vmem:[#allocation2 + $0xe0] ss:$16 sps:$4 sm:$0xff]   ;;  %v5378_v31 = vld [vmem:[#allocation2 + $0xe8] ss:$16 sps:$4 sm:$0xff]  }
  0x57   :  { %1498 = vmatprep.subr.bf16.mxu0 %v5349_v12  ;;  %1662 = vmatprep.subr.bf16.mxu1 %v5351_v13  ;;  %v5379_v32 = vld [vmem:[#allocation2 + $0x104] ss:$16 sps:$4 sm:$0xff]   ;;  %v5381_v33 = vld [vmem:[#allocation2 + $0x10c] ss:$16 sps:$4 sm:$0xff]   ;;  %v5383_v34 = vld [vmem:[#allocation2 + $0x100] ss:$16 sps:$4 sm:$0xff]  }
  0x58   :  { %v5384_v35 = vld [vmem:[#allocation2 + $0x108] ss:$16 sps:$4 sm:$0xff]   ;;  %v5385_v36 = vld [vmem:[#allocation2 + $0x124] ss:$16 sps:$4 sm:$0xff]   ;;  %v5387_v37 = vld [vmem:[#allocation2 + $0x12c] ss:$16 sps:$4 sm:$0xff]  }
  0x59   :  { %v5389_v38 = vld [vmem:[#allocation2 + $0x120] ss:$16 sps:$4 sm:$0xff]   ;;  %v5390_v39 = vld [vmem:[#allocation2 + $0x128] ss:$16 sps:$4 sm:$0xff]   ;;  %v5391_v40 = vld [vmem:[#allocation2 + $0x144] ss:$16 sps:$4 sm:$0xff]  }
  0x5a   :  { %1499 = vmatpush1.bf16.msra.mxu0 %v5353_v14  ;;  %1663 = vmatpush1.bf16.msra.mxu1 %v5354_v15  ;;  %v5393_v41 = vld [vmem:[#allocation2 + $0x14c] ss:$16 sps:$4 sm:$0xff]   ;;  %v5395_v42 = vld [vmem:[#allocation2 + $0x140] ss:$16 sps:$4 sm:$0xff]   ;;  %v5396_v43 = vld [vmem:[#allocation2 + $0x148] ss:$16 sps:$4 sm:$0xff]  }
  0x5b   :  { %1500 = vmatprep.subr.bf16.mxu0 %v5355_v16  ;;  %1664 = vmatprep.subr.bf16.mxu1 %v5357_v17  ;;  %v5397_v44 = vld [vmem:[#allocation2 + $0x164] ss:$16 sps:$4 sm:$0xff]   ;;  %v5399_v45 = vld [vmem:[#allocation2 + $0x16c] ss:$16 sps:$4 sm:$0xff]   ;;  %v5401_v47 = vld [vmem:[#allocation2 + $0x160] ss:$16 sps:$4 sm:$0xff]  }
  0x5c   :  { %v97_v46 = vld [vmem:[%s6751_s0] sm:$0xff]  ;;  %v5402_v49 = vld [vmem:[#allocation2 + $0x168] ss:$16 sps:$4 sm:$0xff]   ;;  %v5405_v51 = vld [vmem:[#allocation2 + $0x18c] ss:$16 sps:$4 sm:$0xff]   ;;  %vm4491_vm14 = vcmask 125952  }
  0x5d   :  { %v4662_v48 = vcombine.high %v97_v46, %v97_v46  ;;  %v5403_v50 = vld [vmem:[#allocation2 + $0x184] ss:$16 sps:$4 sm:$0xff]   ;;  %v5407_v52 = vld [vmem:[#allocation2 + $0x180] ss:$16 sps:$4 sm:$0xff]   ;;  %v5408_v53 = vld [vmem:[#allocation2 + $0x188] ss:$16 sps:$4 sm:$0xff]   ;;  %v4661_v5 = vcombine.low %v97_v46, %v97_v46 }
  0x5e   :  { %1501 = vmatpush1.bf16.msra.mxu0 %v5359_v18  ;;  %1665 = vmatpush1.bf16.msra.mxu1 %v5360_v19  ;;  %v5409_v54 = vld [vmem:[#allocation2 + $0x1a4] ss:$16 sps:$4 sm:$0xff]   ;;  %v5411_v55 = vld [vmem:[#allocation2 + $0x1ac] ss:$16 sps:$4 sm:$0xff]   ;;  %v5413_v56 = vld [vmem:[#allocation2 + $0x1a0] ss:$16 sps:$4 sm:$0xff]  }
  0x5f   :  { %1502 = vmatprep.subr.bf16.mxu0 %v5361_v20  ;;  %1666 = vmatprep.subr.bf16.mxu1 %v5363_v21  ;;  %v5414_v57 = vld [vmem:[#allocation2 + $0x1a8] ss:$16 sps:$4 sm:$0xff]   ;;  %v5415_v58 = vld [vmem:[#allocation2 + $0x1c4] ss:$16 sps:$4 sm:$0xff]   ;;  %v5417_v59 = vld [vmem:[#allocation2 + $0x1cc] ss:$16 sps:$4 sm:$0xff]  }
  0x60   :  { %1524 = vmatprep.mubr.bf16.mxu0 %v4662_v48  ;;  %1688 = vmatprep.mubr.bf16.mxu1 %v4662_v48  ;;  %v5419_v60 = vld [vmem:[#allocation2 + $0x1c0] ss:$16 sps:$4 sm:$0xff]   ;;  %v5420_v61 = vld [vmem:[#allocation2 + $0x1c8] ss:$16 sps:$4 sm:$0xff]   ;;  %v5421_v62 = vld [vmem:[#allocation2 + $0x1e4] ss:$16 sps:$4 sm:$0xff]  }
  0x61   :  { %v5423_v63 = vld [vmem:[#allocation2 + $0x1ec] ss:$16 sps:$4 sm:$0xff]   ;;  %v5425_v0 = vld [vmem:[#allocation2 + $0x1e0] ss:$16 sps:$4 sm:$0xff]   ;;  %v5426_v1 = vld [vmem:[#allocation2 + $0x1e8] ss:$16 sps:$4 sm:$0xff]  }
  0x62   :  { %1503 = vmatpush1.bf16.msra.mxu0 %v5365_v22  ;;  %1667 = vmatpush1.bf16.msra.mxu1 %v5366_v23  ;;  %v5430_v2 = vld [vmem:[#allocation2 + $0x204] ss:$16 sps:$4 sm:$0xff]   ;;  %v5433_v3 = vld [vmem:[#allocation2 + $0x20c] ss:$16 sps:$4 sm:$0xff]   ;;  %v5428_v4 = vld [vmem:[#allocation2 + $0x200] ss:$16 sps:$4 sm:$0xff]  }
  0x63   :  { %1504 = vmatprep.subr.bf16.mxu0 %v5367_v24  ;;  %1668 = vmatprep.subr.bf16.mxu1 %v5369_v25  ;;  %v5431_v6 = vld [vmem:[#allocation2 + $0x208] ss:$16 sps:$4 sm:$0xff]   ;;  %v5437_v7 = vld [vmem:[#allocation2 + $0x224] ss:$16 sps:$4 sm:$0xff]   ;;  %v5440_v8 = vld [vmem:[#allocation2 + $0x22c] ss:$16 sps:$4 sm:$0xff]  }
  0x64   :  { %v5435_v9 = vld [vmem:[#allocation2 + $0x220] ss:$16 sps:$4 sm:$0xff]   ;;  %v5438_v10 = vld [vmem:[#allocation2 + $0x228] ss:$16 sps:$4 sm:$0xff]   ;;  %v5443_v11 = vld [vmem:[#allocation2 + $0x244] ss:$16 sps:$4 sm:$0xff]  }
  0x65   :  { %v5446_v12 = vld [vmem:[#allocation2 + $0x24c] ss:$16 sps:$4 sm:$0xff]   ;;  %v5441_v13 = vld [vmem:[#allocation2 + $0x240] ss:$16 sps:$4 sm:$0xff]   ;;  %v5444_v14 = vld [vmem:[#allocation2 + $0x248] ss:$16 sps:$4 sm:$0xff]  }
  0x66   :  { %1505 = vmatpush1.bf16.msra.mxu0 %v5371_v26  ;;  %1669 = vmatpush1.bf16.msra.mxu1 %v5372_v27  ;;  %v5449_v15 = vld [vmem:[#allocation2 + $0x264] ss:$16 sps:$4 sm:$0xff]   ;;  %v5452_v16 = vld [vmem:[#allocation2 + $0x26c] ss:$16 sps:$4 sm:$0xff]   ;;  %v5447_v17 = vld [vmem:[#allocation2 + $0x260] ss:$16 sps:$4 sm:$0xff]  }
  0x67   :  { %1506 = vmatprep.subr.bf16.mxu0 %v5373_v28  ;;  %1670 = vmatprep.subr.bf16.mxu1 %v5375_v29  ;;  %v5450_v18 = vld [vmem:[#allocation2 + $0x268] ss:$16 sps:$4 sm:$0xff]   ;;  %v5455_v19 = vld [vmem:[#allocation2 + $0x284] ss:$16 sps:$4 sm:$0xff]   ;;  %v5458_v20 = vld [vmem:[#allocation2 + $0x28c] ss:$16 sps:$4 sm:$0xff]  }
  0x68   :  { %v5453_v21 = vld [vmem:[#allocation2 + $0x280] ss:$16 sps:$4 sm:$0xff]   ;;  %v5456_v22 = vld [vmem:[#allocation2 + $0x288] ss:$16 sps:$4 sm:$0xff]   ;;  %v5461_v23 = vld [vmem:[#allocation2 + $0x2a4] ss:$16 sps:$4 sm:$0xff]  }
  0x69   :  { %v5464_v24 = vld [vmem:[#allocation2 + $0x2ac] ss:$16 sps:$4 sm:$0xff]   ;;  %v5459_v25 = vld [vmem:[#allocation2 + $0x2a0] ss:$16 sps:$4 sm:$0xff]   ;;  %v5462_v26 = vld [vmem:[#allocation2 + $0x2a8] ss:$16 sps:$4 sm:$0xff]  }
  0x6a   :  { %1507 = vmatpush1.bf16.msra.mxu0 %v5377_v30  ;;  %1671 = vmatpush1.bf16.msra.mxu1 %v5378_v31  ;;  %v5467_v27 = vld [vmem:[#allocation2 + $0x2c4] ss:$16 sps:$4 sm:$0xff]   ;;  %v5470_v28 = vld [vmem:[#allocation2 + $0x2cc] ss:$16 sps:$4 sm:$0xff]   ;;  %v5465_v31 = vld [vmem:[#allocation2 + $0x2c0] ss:$16 sps:$4 sm:$0xff]  }
  0x6b   :  { %1508 = vmatprep.subr.bf16.mxu0 %v5379_v32  ;;  %1672 = vmatprep.subr.bf16.mxu1 %v5381_v33  ;;  %v6495_v29 = vld [vmem:[%s6751_s0 + $0x8] sm:$0xff]  ;;  %v5473_v33 = vld [vmem:[#allocation2 + $0x2e4] ss:$16 sps:$4 sm:$0xff]   ;;  %s6362_s21 = smov [#allocation10]  }
  0x6c   :  { %v4664_v30 = vcombine.high %v6495_v29, %v6495_v29  ;;  %v5468_v32 = vld [vmem:[#allocation2 + $0x2c8] ss:$16 sps:$4 sm:$0xff]   ;;  %v5494_v46 = vld [vmem:[#allocation2 + $0x34c] ss:$16 sps:$4 sm:$0xff]   ;;  %s4619_s27 = sshll.u32 %s6362_s21, 4  ;;  %s4620_s27 = int_to_ptr.vmem [resolvable:$true] %s4619_s27 }
  0x6d   :  { %v5492_v48 = vld [vmem:[#allocation2 + $0x348] ss:$16 sps:$4 sm:$0xff]  }
  0x6e   :  { %1509 = vmatpush1.bf16.msra.mxu0 %v5383_v34  ;;  %1673 = vmatpush1.bf16.msra.mxu1 %v5384_v35  ;;  %v5476_v34 = vld [vmem:[#allocation2 + $0x2ec] ss:$16 sps:$4 sm:$0xff]   ;;  %v5471_v35 = vld [vmem:[#allocation2 + $0x2e0] ss:$16 sps:$4 sm:$0xff]  }
  0x6f   :  { %1510 = vmatprep.subr.bf16.mxu0 %v5385_v36  ;;  %1674 = vmatprep.subr.bf16.mxu1 %v5387_v37  ;;  %v5474_v36 = vld [vmem:[#allocation2 + $0x2e8] ss:$16 sps:$4 sm:$0xff]   ;;  %v5479_v37 = vld [vmem:[#allocation2 + $0x304] ss:$16 sps:$4 sm:$0xff]  }
  0x72   :  { %1511 = vmatpush1.bf16.msra.mxu0 %v5389_v38  ;;  %1675 = vmatpush1.bf16.msra.mxu1 %v5390_v39  ;;  %v5482_v38 = vld [vmem:[#allocation2 + $0x30c] ss:$16 sps:$4 sm:$0xff]   ;;  %v5477_v39 = vld [vmem:[#allocation2 + $0x300] ss:$16 sps:$4 sm:$0xff]  }
  0x73   :  { %1512 = vmatprep.subr.bf16.mxu0 %v5391_v40  ;;  %1676 = vmatprep.subr.bf16.mxu1 %v5393_v41  ;;  %v5480_v40 = vld [vmem:[#allocation2 + $0x308] ss:$16 sps:$4 sm:$0xff]   ;;  %v5485_v41 = vld [vmem:[#allocation2 + $0x324] ss:$16 sps:$4 sm:$0xff]  }
  0x76   :  { %1513 = vmatpush1.bf16.msra.mxu0 %v5395_v42  ;;  %1677 = vmatpush1.bf16.msra.mxu1 %v5396_v43  ;;  %v5488_v42 = vld [vmem:[#allocation2 + $0x32c] ss:$16 sps:$4 sm:$0xff]   ;;  %v5483_v43 = vld [vmem:[#allocation2 + $0x320] ss:$16 sps:$4 sm:$0xff]  }
  0x77   :  { %1514 = vmatprep.subr.bf16.mxu0 %v5397_v44  ;;  %1678 = vmatprep.subr.bf16.mxu1 %v5399_v45  ;;  %v5486_v44 = vld [vmem:[#allocation2 + $0x328] ss:$16 sps:$4 sm:$0xff]   ;;  %v5491_v45 = vld [vmem:[#allocation2 + $0x344] ss:$16 sps:$4 sm:$0xff]  }
  0x7a   :  { %1515 = vmatpush1.bf16.msra.mxu0 %v5401_v47  ;;  %1679 = vmatpush1.bf16.msra.mxu1 %v5402_v49  ;;  %v5489_v47 = vld [vmem:[#allocation2 + $0x340] ss:$16 sps:$4 sm:$0xff]   ;;  %v5497_v49 = vld [vmem:[#allocation2 + $0x364] ss:$16 sps:$4 sm:$0xff]  }
  0x7b   :  { %1516 = vmatprep.subr.bf16.mxu0 %v5403_v50  ;;  %1680 = vmatprep.subr.bf16.mxu1 %v5405_v51  ;;  %v5500_v50 = vld [vmem:[#allocation2 + $0x36c] ss:$16 sps:$4 sm:$0xff]   ;;  %v5495_v51 = vld [vmem:[#allocation2 + $0x360] ss:$16 sps:$4 sm:$0xff]  }
  0x7e   :  { %1517 = vmatpush1.bf16.msra.mxu0 %v5407_v52  ;;  %1681 = vmatpush1.bf16.msra.mxu1 %v5408_v53  ;;  %v5498_v52 = vld [vmem:[#allocation2 + $0x368] ss:$16 sps:$4 sm:$0xff]   ;;  %v5503_v53 = vld [vmem:[#allocation2 + $0x384] ss:$16 sps:$4 sm:$0xff]  }
  0x7f   :  { %1518 = vmatprep.subr.bf16.mxu0 %v5409_v54  ;;  %1682 = vmatprep.subr.bf16.mxu1 %v5411_v55  ;;  %v5506_v54 = vld [vmem:[#allocation2 + $0x38c] ss:$16 sps:$4 sm:$0xff]   ;;  %v5501_v55 = vld [vmem:[#allocation2 + $0x380] ss:$16 sps:$4 sm:$0xff]  }
  0x82   :  { %1519 = vmatpush1.bf16.msra.mxu0 %v5413_v56  ;;  %1683 = vmatpush1.bf16.msra.mxu1 %v5414_v57  ;;  %v5504_v56 = vld [vmem:[#allocation2 + $0x388] ss:$16 sps:$4 sm:$0xff]   ;;  %v5509_v57 = vld [vmem:[#allocation2 + $0x3a4] ss:$16 sps:$4 sm:$0xff]  }
  0x83   :  { %1520 = vmatprep.subr.bf16.mxu0 %v5415_v58  ;;  %1684 = vmatprep.subr.bf16.mxu1 %v5417_v59  ;;  %v5512_v58 = vld [vmem:[#allocation2 + $0x3ac] ss:$16 sps:$4 sm:$0xff]   ;;  %v5507_v59 = vld [vmem:[#allocation2 + $0x3a0] ss:$16 sps:$4 sm:$0xff]  }
  0x86   :  { %1521 = vmatpush1.bf16.msra.mxu0 %v5419_v60  ;;  %1685 = vmatpush1.bf16.msra.mxu1 %v5420_v61  ;;  %v5510_v60 = vld [vmem:[#allocation2 + $0x3a8] ss:$16 sps:$4 sm:$0xff]   ;;  %v5515_v61 = vld [vmem:[#allocation2 + $0x3c4] ss:$16 sps:$4 sm:$0xff]  }
  0x87   :  { %1522 = vmatprep.subr.bf16.mxu0 %v5421_v62  ;;  %1686 = vmatprep.subr.bf16.mxu1 %v5423_v63  ;;  %v5518_v62 = vld [vmem:[#allocation2 + $0x3cc] ss:$16 sps:$4 sm:$0xff]   ;;  %v5513_v63 = vld [vmem:[#allocation2 + $0x3c0] ss:$16 sps:$4 sm:$0xff]  }
  0x8a   :  { %1523 = vmatpush1.bf16.msra.mxu0 %v5425_v0  ;;  %1687 = vmatpush1.bf16.msra.mxu1 %v5426_v1  ;;  %v5516_v0 = vld [vmem:[#allocation2 + $0x3c8] ss:$16 sps:$4 sm:$0xff]   ;;  %v5521_v1 = vld [vmem:[#allocation2 + $0x3e4] ss:$16 sps:$4 sm:$0xff]  }
  0x8b   :  { %1533 = vmatprep.subr.bf16.mxu0 %v5430_v2  ;;  %1697 = vmatprep.subr.bf16.mxu1 %v5433_v3  ;;  %v5524_v2 = vld [vmem:[#allocation2 + $0x3ec] ss:$16 sps:$4 sm:$0xff]   ;;  %v5519_v3 = vld [vmem:[#allocation2 + $0x3e0] ss:$16 sps:$4 sm:$0xff]  }
  0x8d   :  { %1525 = vmatmul.mubr.bf16.vlgmr.msra.gmra.mrb[0].mxu0 %v4661_v5  ;;  %1689 = vmatmul.mubr.bf16.vlgmr.msra.gmra.mrb[0].mxu1 %v4661_v5  ;;  %v5528_v5 = vld [vmem:[#allocation2 + $0x404] ss:$16 sps:$4 sm:$0xff]  }
  0x8e   :  { %1534 = vmatpush1.bf16.msra.mxu0 %v5428_v4  ;;  %1698 = vmatpush1.bf16.msra.mxu1 %v5431_v6  ;;  %v5522_v4 = vld [vmem:[#allocation2 + $0x3e8] ss:$16 sps:$4 sm:$0xff]   ;;  %v5531_v6 = vld [vmem:[#allocation2 + $0x40c] ss:$16 sps:$4 sm:$0xff]  }
  0x8f   :  { %1535 = vmatprep.subr.bf16.mxu0 %v5437_v7  ;;  %1699 = vmatprep.subr.bf16.mxu1 %v5440_v8  ;;  %v5526_v7 = vld [vmem:[#allocation2 + $0x400] ss:$16 sps:$4 sm:$0xff]   ;;  %v4663_v8 = vcombine.low %v6495_v29, %v6495_v29  ;;  %v5562_v29 = vld [vmem:[#allocation2 + $0x4ac] ss:$16 sps:$4 sm:$0xff]  }
  0x90   :  { %1565 = vmatprep.mubr.bf16.mxu0 %v4664_v30  ;;  %1729 = vmatprep.mubr.bf16.mxu1 %v4664_v30  ;;  %v5557_v30 = vld [vmem:[#allocation2 + $0x4a0] ss:$16 sps:$4 sm:$0xff]  }
  0x92   :  { %1536 = vmatpush1.bf16.msra.mxu0 %v5435_v9  ;;  %1700 = vmatpush1.bf16.msra.mxu1 %v5438_v10  ;;  %v5529_v9 = vld [vmem:[#allocation2 + $0x408] ss:$16 sps:$4 sm:$0xff]   ;;  %v5535_v10 = vld [vmem:[#allocation2 + $0x424] ss:$16 sps:$4 sm:$0xff]  }
  0x93   :  { %1537 = vmatprep.subr.bf16.mxu0 %v5443_v11  ;;  %1701 = vmatprep.subr.bf16.mxu1 %v5446_v12  ;;  %v6504_v11 = vld [vmem:[%s6751_s0 + $0x10] sm:$0xff]  ;;  %v5538_v12 = vld [vmem:[#allocation2 + $0x42c] ss:$16 sps:$4 sm:$0xff]  }
  0x96   :  { %1538 = vmatpush1.bf16.msra.mxu0 %v5441_v13  ;;  %1702 = vmatpush1.bf16.msra.mxu1 %v5444_v14  ;;  %v4666_v13 = vcombine.high %v6504_v11, %v6504_v11  ;;  %v5533_v14 = vld [vmem:[#allocation2 + $0x420] ss:$16 sps:$4 sm:$0xff]  }
  0x97   :  { %1539 = vmatprep.subr.bf16.mxu0 %v5449_v15  ;;  %1703 = vmatprep.subr.bf16.mxu1 %v5452_v16  ;;  %v5536_v15 = vld [vmem:[#allocation2 + $0x428] ss:$16 sps:$4 sm:$0xff]   ;;  %v5541_v16 = vld [vmem:[#allocation2 + $0x444] ss:$16 sps:$4 sm:$0xff]  }
  0x9a   :  { %1540 = vmatpush1.bf16.msra.mxu0 %v5447_v17  ;;  %1704 = vmatpush1.bf16.msra.mxu1 %v5450_v18  ;;  %v5544_v17 = vld [vmem:[#allocation2 + $0x44c] ss:$16 sps:$4 sm:$0xff]   ;;  %v5539_v18 = vld [vmem:[#allocation2 + $0x440] ss:$16 sps:$4 sm:$0xff]  }
  0x9b   :  { %1541 = vmatprep.subr.bf16.mxu0 %v5455_v19  ;;  %1705 = vmatprep.subr.bf16.mxu1 %v5458_v20  ;;  %v5542_v19 = vld [vmem:[#allocation2 + $0x448] ss:$16 sps:$4 sm:$0xff]   ;;  %v5547_v20 = vld [vmem:[#allocation2 + $0x464] ss:$16 sps:$4 sm:$0xff]  }
  0x9e   :  { %1542 = vmatpush1.bf16.msra.mxu0 %v5453_v21  ;;  %1706 = vmatpush1.bf16.msra.mxu1 %v5456_v22  ;;  %v5550_v21 = vld [vmem:[#allocation2 + $0x46c] ss:$16 sps:$4 sm:$0xff]   ;;  %v5545_v22 = vld [vmem:[#allocation2 + $0x460] ss:$16 sps:$4 sm:$0xff]  }
  0x9f   :  { %1543 = vmatprep.subr.bf16.mxu0 %v5461_v23  ;;  %1707 = vmatprep.subr.bf16.mxu1 %v5464_v24  ;;  %v5548_v23 = vld [vmem:[#allocation2 + $0x468] ss:$16 sps:$4 sm:$0xff]   ;;  %v5553_v24 = vld [vmem:[#allocation2 + $0x484] ss:$16 sps:$4 sm:$0xff]  }
  0xa2   :  { %1544 = vmatpush1.bf16.msra.mxu0 %v5459_v25  ;;  %1708 = vmatpush1.bf16.msra.mxu1 %v5462_v26  ;;  %v5556_v25 = vld [vmem:[#allocation2 + $0x48c] ss:$16 sps:$4 sm:$0xff]   ;;  %v5551_v26 = vld [vmem:[#allocation2 + $0x480] ss:$16 sps:$4 sm:$0xff]  }
  0xa3   :  { %1545 = vmatprep.subr.bf16.mxu0 %v5467_v27  ;;  %1709 = vmatprep.subr.bf16.mxu1 %v5470_v28  ;;  %v5554_v27 = vld [vmem:[#allocation2 + $0x488] ss:$16 sps:$4 sm:$0xff]   ;;  %v5559_v28 = vld [vmem:[#allocation2 + $0x4a4] ss:$16 sps:$4 sm:$0xff]  }
  0xa6   :  { %1546 = vmatpush1.bf16.msra.mxu0 %v5465_v31  ;;  %1710 = vmatpush1.bf16.msra.mxu1 %v5468_v32  ;;  %v5560_v31 = vld [vmem:[#allocation2 + $0x4a8] ss:$16 sps:$4 sm:$0xff]   ;;  %v5565_v32 = vld [vmem:[#allocation2 + $0x4c4] ss:$16 sps:$4 sm:$0xff]  }
  0xa7   :  { %1547 = vmatprep.subr.bf16.mxu0 %v5473_v33  ;;  %1711 = vmatprep.subr.bf16.mxu1 %v5476_v34  ;;  %v5568_v33 = vld [vmem:[#allocation2 + $0x4cc] ss:$16 sps:$4 sm:$0xff]   ;;  %v5563_v34 = vld [vmem:[#allocation2 + $0x4c0] ss:$16 sps:$4 sm:$0xff]  }
  0xaa   :  { %1548 = vmatpush1.bf16.msra.mxu0 %v5471_v35  ;;  %1712 = vmatpush1.bf16.msra.mxu1 %v5474_v36  ;;  %v5566_v35 = vld [vmem:[#allocation2 + $0x4c8] ss:$16 sps:$4 sm:$0xff]   ;;  %v5571_v36 = vld [vmem:[#allocation2 + $0x4e4] ss:$16 sps:$4 sm:$0xff]  }
  0xab   :  { %1549 = vmatprep.subr.bf16.mxu0 %v5479_v37  ;;  %1713 = vmatprep.subr.bf16.mxu1 %v5482_v38  ;;  %v5574_v37 = vld [vmem:[#allocation2 + $0x4ec] ss:$16 sps:$4 sm:$0xff]   ;;  %v5569_v38 = vld [vmem:[#allocation2 + $0x4e0] ss:$16 sps:$4 sm:$0xff]  }
  0xae   :  { %1550 = vmatpush1.bf16.msra.mxu0 %v5477_v39  ;;  %1714 = vmatpush1.bf16.msra.mxu1 %v5480_v40  ;;  %v5572_v39 = vld [vmem:[#allocation2 + $0x4e8] ss:$16 sps:$4 sm:$0xff]   ;;  %v5577_v40 = vld [vmem:[#allocation2 + $0x504] ss:$16 sps:$4 sm:$0xff]  }
  0xaf   :  { %1551 = vmatprep.subr.bf16.mxu0 %v5485_v41  ;;  %1715 = vmatprep.subr.bf16.mxu1 %v5488_v42  ;;  %v5580_v41 = vld [vmem:[#allocation2 + $0x50c] ss:$16 sps:$4 sm:$0xff]   ;;  %v5575_v42 = vld [vmem:[#allocation2 + $0x500] ss:$16 sps:$4 sm:$0xff]  }
  0xb2   :  { %1552 = vmatpush1.bf16.msra.mxu0 %v5483_v43  ;;  %1716 = vmatpush1.bf16.msra.mxu1 %v5486_v44  ;;  %v5578_v43 = vld [vmem:[#allocation2 + $0x508] ss:$16 sps:$4 sm:$0xff]   ;;  %v5583_v44 = vld [vmem:[#allocation2 + $0x524] ss:$16 sps:$4 sm:$0xff]  }
  0xb3   :  { %1553 = vmatprep.subr.bf16.mxu0 %v5491_v45  ;;  %1717 = vmatprep.subr.bf16.mxu1 %v5494_v46  ;;  %v5586_v45 = vld [vmem:[#allocation2 + $0x52c] ss:$16 sps:$4 sm:$0xff]   ;;  %v5581_v46 = vld [vmem:[#allocation2 + $0x520] ss:$16 sps:$4 sm:$0xff]  }
  0xb6   :  { %1554 = vmatpush1.bf16.msra.mxu0 %v5489_v47  ;;  %1718 = vmatpush1.bf16.msra.mxu1 %v5492_v48  ;;  %v5584_v47 = vld [vmem:[#allocation2 + $0x528] ss:$16 sps:$4 sm:$0xff]   ;;  %v5589_v48 = vld [vmem:[#allocation2 + $0x544] ss:$16 sps:$4 sm:$0xff]  }
  0xb7   :  { %1555 = vmatprep.subr.bf16.mxu0 %v5497_v49  ;;  %1719 = vmatprep.subr.bf16.mxu1 %v5500_v50  ;;  %v5592_v49 = vld [vmem:[#allocation2 + $0x54c] ss:$16 sps:$4 sm:$0xff]   ;;  %v5587_v50 = vld [vmem:[#allocation2 + $0x540] ss:$16 sps:$4 sm:$0xff]  }
  0xba   :  { %1556 = vmatpush1.bf16.msra.mxu0 %v5495_v51  ;;  %1720 = vmatpush1.bf16.msra.mxu1 %v5498_v52  ;;  %v5590_v51 = vld [vmem:[#allocation2 + $0x548] ss:$16 sps:$4 sm:$0xff]   ;;  %v5595_v52 = vld [vmem:[#allocation2 + $0x564] ss:$16 sps:$4 sm:$0xff]  }
  0xbb   :  { %1557 = vmatprep.subr.bf16.mxu0 %v5503_v53  ;;  %1721 = vmatprep.subr.bf16.mxu1 %v5506_v54  ;;  %v5598_v53 = vld [vmem:[#allocation2 + $0x56c] ss:$16 sps:$4 sm:$0xff]   ;;  %v5593_v54 = vld [vmem:[#allocation2 + $0x560] ss:$16 sps:$4 sm:$0xff]  }
  0xbe   :  { %1558 = vmatpush1.bf16.msra.mxu0 %v5501_v55  ;;  %1722 = vmatpush1.bf16.msra.mxu1 %v5504_v56  ;;  %v5596_v55 = vld [vmem:[#allocation2 + $0x568] ss:$16 sps:$4 sm:$0xff]   ;;  %v5601_v56 = vld [vmem:[#allocation2 + $0x584] ss:$16 sps:$4 sm:$0xff]  }
  0xbf   :  { %1559 = vmatprep.subr.bf16.mxu0 %v5509_v57  ;;  %1723 = vmatprep.subr.bf16.mxu1 %v5512_v58  ;;  %v5604_v57 = vld [vmem:[#allocation2 + $0x58c] ss:$16 sps:$4 sm:$0xff]   ;;  %v5599_v58 = vld [vmem:[#allocation2 + $0x580] ss:$16 sps:$4 sm:$0xff]  }
  0xc2   :  { %1560 = vmatpush1.bf16.msra.mxu0 %v5507_v59  ;;  %1724 = vmatpush1.bf16.msra.mxu1 %v5510_v60  ;;  %v5602_v59 = vld [vmem:[#allocation2 + $0x588] ss:$16 sps:$4 sm:$0xff]   ;;  %v5607_v60 = vld [vmem:[#allocation2 + $0x5a4] ss:$16 sps:$4 sm:$0xff]  }
  0xc3   :  { %1561 = vmatprep.subr.bf16.mxu0 %v5515_v61  ;;  %1725 = vmatprep.subr.bf16.mxu1 %v5518_v62  ;;  %v5610_v61 = vld [vmem:[#allocation2 + $0x5ac] ss:$16 sps:$4 sm:$0xff]   ;;  %v5605_v62 = vld [vmem:[#allocation2 + $0x5a0] ss:$16 sps:$4 sm:$0xff]  }
  0xc6   :  { %1562 = vmatpush1.bf16.msra.mxu0 %v5513_v63  ;;  %1726 = vmatpush1.bf16.msra.mxu1 %v5516_v0  ;;  %v5608_v63 = vld [vmem:[#allocation2 + $0x5a8] ss:$16 sps:$4 sm:$0xff]   ;;  %v5613_v0 = vld [vmem:[#allocation2 + $0x5c4] ss:$16 sps:$4 sm:$0xff]  }
  0xc7   :  { %1563 = vmatprep.subr.bf16.mxu0 %v5521_v1  ;;  %1727 = vmatprep.subr.bf16.mxu1 %v5524_v2  ;;  %v5616_v1 = vld [vmem:[#allocation2 + $0x5cc] ss:$16 sps:$4 sm:$0xff]   ;;  %v5611_v2 = vld [vmem:[#allocation2 + $0x5c0] ss:$16 sps:$4 sm:$0xff]  }
  0xca   :  { %1564 = vmatpush1.bf16.msra.mxu0 %v5519_v3  ;;  %1728 = vmatpush1.bf16.msra.mxu1 %v5522_v4  ;;  %v5614_v3 = vld [vmem:[#allocation2 + $0x5c8] ss:$16 sps:$4 sm:$0xff]   ;;  %v5619_v4 = vld [vmem:[#allocation2 + $0x5e4] ss:$16 sps:$4 sm:$0xff]  }
  0xcb   :  { %1574 = vmatprep.subr.bf16.mxu0 %v5528_v5  ;;  %1738 = vmatprep.subr.bf16.mxu1 %v5531_v6  ;;  %v5622_v5 = vld [vmem:[#allocation2 + $0x5ec] ss:$16 sps:$4 sm:$0xff]   ;;  %v5617_v6 = vld [vmem:[#allocation2 + $0x5e0] ss:$16 sps:$4 sm:$0xff]  }
  0xcd   :  { %1566 = vmatmul.mubr.bf16.vlgmr.msra.gmra.mrb[0].mxu0 %v4663_v8  ;;  %1730 = vmatmul.mubr.bf16.vlgmr.msra.gmra.mrb[0].mxu1 %v4663_v8  ;;  %v5626_v8 = vld [vmem:[#allocation2 + $0x604] ss:$16 sps:$4 sm:$0xff]  }
  0xce   :  { %1575 = vmatpush1.bf16.msra.mxu0 %v5526_v7  ;;  %1739 = vmatpush1.bf16.msra.mxu1 %v5529_v9  ;;  %v5620_v7 = vld [vmem:[#allocation2 + $0x5e8] ss:$16 sps:$4 sm:$0xff]   ;;  %v5629_v9 = vld [vmem:[#allocation2 + $0x60c] ss:$16 sps:$4 sm:$0xff]  }
  0xcf   :  { %1576 = vmatprep.subr.bf16.mxu0 %v5535_v10  ;;  %1740 = vmatprep.subr.bf16.mxu1 %v5538_v12  ;;  %v5624_v10 = vld [vmem:[#allocation2 + $0x600] ss:$16 sps:$4 sm:$0xff]   ;;  %v5627_v12 = vld [vmem:[#allocation2 + $0x608] ss:$16 sps:$4 sm:$0xff]  }
  0xd0   :  { %1606 = vmatprep.mubr.bf16.mxu0 %v4666_v13  ;;  %1770 = vmatprep.mubr.bf16.mxu1 %v4666_v13  ;;  %v4665_v13 = vcombine.low %v6504_v11, %v6504_v11  ;;  %v5645_v11 = vld [vmem:[#allocation2 + $0x664] ss:$16 sps:$4 sm:$0xff]  }
  0xd2   :  { %1577 = vmatpush1.bf16.msra.mxu0 %v5533_v14  ;;  %1741 = vmatpush1.bf16.msra.mxu1 %v5536_v15  ;;  %v5633_v14 = vld [vmem:[#allocation2 + $0x624] ss:$16 sps:$4 sm:$0xff]   ;;  %v5636_v15 = vld [vmem:[#allocation2 + $0x62c] ss:$16 sps:$4 sm:$0xff]  }
  0xd3   :  { %1578 = vmatprep.subr.bf16.mxu0 %v5541_v16  ;;  %1742 = vmatprep.subr.bf16.mxu1 %v5544_v17  ;;  %v5631_v16 = vld [vmem:[#allocation2 + $0x620] ss:$16 sps:$4 sm:$0xff]   ;;  %v5634_v17 = vld [vmem:[#allocation2 + $0x628] ss:$16 sps:$4 sm:$0xff]  }
  0xd6   :  { %1579 = vmatpush1.bf16.msra.mxu0 %v5539_v18  ;;  %1743 = vmatpush1.bf16.msra.mxu1 %v5542_v19  ;;  %v5639_v18 = vld [vmem:[#allocation2 + $0x644] ss:$16 sps:$4 sm:$0xff]   ;;  %v5642_v19 = vld [vmem:[#allocation2 + $0x64c] ss:$16 sps:$4 sm:$0xff]  }
  0xd7   :  { %1580 = vmatprep.subr.bf16.mxu0 %v5547_v20  ;;  %1744 = vmatprep.subr.bf16.mxu1 %v5550_v21  ;;  %v5637_v20 = vld [vmem:[#allocation2 + $0x640] ss:$16 sps:$4 sm:$0xff]   ;;  %v5640_v21 = vld [vmem:[#allocation2 + $0x648] ss:$16 sps:$4 sm:$0xff]  }
  0xda   :  { %1581 = vmatpush1.bf16.msra.mxu0 %v5545_v22  ;;  %1745 = vmatpush1.bf16.msra.mxu1 %v5548_v23  ;;  %v6360_v22 = vmov 0   ;;  %v5648_v23 = vld [vmem:[#allocation2 + $0x66c] ss:$16 sps:$4 sm:$0xff]  }
  0xdb   :  { %1582 = vmatprep.subr.bf16.mxu0 %v5553_v24  ;;  %1746 = vmatprep.subr.bf16.mxu1 %v5556_v25  ;;  %v5643_v24 = vld [vmem:[#allocation2 + $0x660] ss:$16 sps:$4 sm:$0xff]   ;;  %v5646_v25 = vld [vmem:[#allocation2 + $0x668] ss:$16 sps:$4 sm:$0xff]  }
  0xde   :  { %1583 = vmatpush1.bf16.msra.mxu0 %v5551_v26  ;;  %1747 = vmatpush1.bf16.msra.mxu1 %v5554_v27  ;;  %v5651_v26 = vld [vmem:[#allocation2 + $0x684] ss:$16 sps:$4 sm:$0xff]   ;;  %v5654_v27 = vld [vmem:[#allocation2 + $0x68c] ss:$16 sps:$4 sm:$0xff]  }
  0xdf   :  { %1584 = vmatprep.subr.bf16.mxu0 %v5559_v28  ;;  %1748 = vmatprep.subr.bf16.mxu1 %v5562_v29  ;;  %v5649_v28 = vld [vmem:[#allocation2 + $0x680] ss:$16 sps:$4 sm:$0xff]   ;;  %v5652_v29 = vld [vmem:[#allocation2 + $0x688] ss:$16 sps:$4 sm:$0xff]  }
  0xe2   :  { %1585 = vmatpush1.bf16.msra.mxu0 %v5557_v30  ;;  %1749 = vmatpush1.bf16.msra.mxu1 %v5560_v31  ;;  %v5657_v30 = vld [vmem:[#allocation2 + $0x6a4] ss:$16 sps:$4 sm:$0xff]   ;;  %v5660_v31 = vld [vmem:[#allocation2 + $0x6ac] ss:$16 sps:$4 sm:$0xff]  }
  0xe3   :  { %1586 = vmatprep.subr.bf16.mxu0 %v5565_v32  ;;  %1750 = vmatprep.subr.bf16.mxu1 %v5568_v33  ;;  %v5655_v32 = vld [vmem:[#allocation2 + $0x6a0] ss:$16 sps:$4 sm:$0xff]   ;;  %v5658_v33 = vld [vmem:[#allocation2 + $0x6a8] ss:$16 sps:$4 sm:$0xff]  }
  0xe6   :  { %1587 = vmatpush1.bf16.msra.mxu0 %v5563_v34  ;;  %1751 = vmatpush1.bf16.msra.mxu1 %v5566_v35  ;;  %v5663_v34 = vld [vmem:[#allocation2 + $0x6c4] ss:$16 sps:$4 sm:$0xff]   ;;  %v5666_v35 = vld [vmem:[#allocation2 + $0x6cc] ss:$16 sps:$4 sm:$0xff]  }
  0xe7   :  { %1588 = vmatprep.subr.bf16.mxu0 %v5571_v36  ;;  %1752 = vmatprep.subr.bf16.mxu1 %v5574_v37  ;;  %v5661_v36 = vld [vmem:[#allocation2 + $0x6c0] ss:$16 sps:$4 sm:$0xff]   ;;  %v5664_v37 = vld [vmem:[#allocation2 + $0x6c8] ss:$16 sps:$4 sm:$0xff]  }
  0xea   :  { %1589 = vmatpush1.bf16.msra.mxu0 %v5569_v38  ;;  %1753 = vmatpush1.bf16.msra.mxu1 %v5572_v39  ;;  %v5669_v38 = vld [vmem:[#allocation2 + $0x6e4] ss:$16 sps:$4 sm:$0xff]   ;;  %v5672_v39 = vld [vmem:[#allocation2 + $0x6ec] ss:$16 sps:$4 sm:$0xff]  }
  0xeb   :  { %1590 = vmatprep.subr.bf16.mxu0 %v5577_v40  ;;  %1754 = vmatprep.subr.bf16.mxu1 %v5580_v41  ;;  %v5667_v40 = vld [vmem:[#allocation2 + $0x6e0] ss:$16 sps:$4 sm:$0xff]   ;;  %v5670_v41 = vld [vmem:[#allocation2 + $0x6e8] ss:$16 sps:$4 sm:$0xff]  }
  0xee   :  { %1591 = vmatpush1.bf16.msra.mxu0 %v5575_v42  ;;  %1755 = vmatpush1.bf16.msra.mxu1 %v5578_v43  ;;  %v100_v42 = vld [vmem:[%s6751_s0 + $0x18] sm:$0xf]  ;;  %v5676_v43 = vld [vmem:[#allocation5 + $0x4] ss:$8 sps:$4 sm:$0xff]  }
  0xef   :  { %1592 = vmatprep.subr.bf16.mxu0 %v5583_v44  ;;  %1756 = vmatprep.subr.bf16.mxu1 %v5586_v45  ;;  %v5674_v44 = vld [vmem:[#allocation5] ss:$8 sps:$4 sm:$0xff]   ;;  %v4667_v45 = vcombine.low %v100_v42, %v100_v42 }
  0xf2   :  { %1593 = vmatpush1.bf16.msra.mxu0 %v5581_v46  ;;  %1757 = vmatpush1.bf16.msra.mxu1 %v5584_v47  ;;  %v5679_v46 = vld [vmem:[#allocation5 + $0x14] ss:$8 sps:$4 sm:$0xff]   ;;  %v5677_v47 = vld [vmem:[#allocation5 + $0x10] ss:$8 sps:$4 sm:$0xff]  }
  0xf3   :  { %1594 = vmatprep.subr.bf16.mxu0 %v5589_v48  ;;  %1758 = vmatprep.subr.bf16.mxu1 %v5592_v49  ;;  %v5682_v48 = vld [vmem:[#allocation5 + $0x24] ss:$8 sps:$4 sm:$0xff]   ;;  %v5680_v49 = vld [vmem:[#allocation5 + $0x20] ss:$8 sps:$4 sm:$0xff]  }
  0xf6   :  { %1595 = vmatpush1.bf16.msra.mxu0 %v5587_v50  ;;  %1759 = vmatpush1.bf16.msra.mxu1 %v5590_v51  ;;  %v5685_v50 = vld [vmem:[#allocation5 + $0x34] ss:$8 sps:$4 sm:$0xff]   ;;  %v5683_v51 = vld [vmem:[#allocation5 + $0x30] ss:$8 sps:$4 sm:$0xff]  }
  0xf7   :  { %1596 = vmatprep.subr.bf16.mxu0 %v5595_v52  ;;  %1760 = vmatprep.subr.bf16.mxu1 %v5598_v53  ;;  %v5688_v52 = vld [vmem:[#allocation5 + $0x44] ss:$8 sps:$4 sm:$0xff]   ;;  %v5686_v53 = vld [vmem:[#allocation5 + $0x40] ss:$8 sps:$4 sm:$0xff]  }
  0xfa   :  { %1597 = vmatpush1.bf16.msra.mxu0 %v5593_v54  ;;  %1761 = vmatpush1.bf16.msra.mxu1 %v5596_v55  ;;  %v5691_v54 = vld [vmem:[#allocation5 + $0x54] ss:$8 sps:$4 sm:$0xff]   ;;  %v5689_v55 = vld [vmem:[#allocation5 + $0x50] ss:$8 sps:$4 sm:$0xff]  }
  0xfb   :  { %1598 = vmatprep.subr.bf16.mxu0 %v5601_v56  ;;  %1762 = vmatprep.subr.bf16.mxu1 %v5604_v57  ;;  %v5694_v56 = vld [vmem:[#allocation5 + $0x64] ss:$8 sps:$4 sm:$0xff]   ;;  %v5692_v57 = vld [vmem:[#allocation5 + $0x60] ss:$8 sps:$4 sm:$0xff]  }
  0xfe   :  { %1599 = vmatpush1.bf16.msra.mxu0 %v5599_v58  ;;  %1763 = vmatpush1.bf16.msra.mxu1 %v5602_v59  ;;  %v5697_v58 = vld [vmem:[#allocation5 + $0x74] ss:$8 sps:$4 sm:$0xff]   ;;  %v5695_v59 = vld [vmem:[#allocation5 + $0x70] ss:$8 sps:$4 sm:$0xff]  }
  0xff   :  { %1600 = vmatprep.subr.bf16.mxu0 %v5607_v60  ;;  %1764 = vmatprep.subr.bf16.mxu1 %v5610_v61  ;;  %v5700_v60 = vld [vmem:[#allocation5 + $0x84] ss:$8 sps:$4 sm:$0xff]   ;;  %v5698_v61 = vld [vmem:[#allocation5 + $0x80] ss:$8 sps:$4 sm:$0xff]  }
 0x102   :  { %1601 = vmatpush1.bf16.msra.mxu0 %v5605_v62  ;;  %1765 = vmatpush1.bf16.msra.mxu1 %v5608_v63  ;;  %v5703_v62 = vld [vmem:[#allocation5 + $0x94] ss:$8 sps:$4 sm:$0xff]   ;;  %v5701_v63 = vld [vmem:[#allocation5 + $0x90] ss:$8 sps:$4 sm:$0xff]  }
 0x103   :  { %1602 = vmatprep.subr.bf16.mxu0 %v5613_v0  ;;  %1766 = vmatprep.subr.bf16.mxu1 %v5616_v1  ;;  %v5706_v0 = vld [vmem:[#allocation5 + $0xa4] ss:$8 sps:$4 sm:$0xff]   ;;  %v5704_v1 = vld [vmem:[#allocation5 + $0xa0] ss:$8 sps:$4 sm:$0xff]  }
 0x106   :  { %1603 = vmatpush1.bf16.msra.mxu0 %v5611_v2  ;;  %1767 = vmatpush1.bf16.msra.mxu1 %v5614_v3  ;;  %v5709_v2 = vld [vmem:[#allocation5 + $0xb4] ss:$8 sps:$4 sm:$0xff]   ;;  %v5707_v3 = vld [vmem:[#allocation5 + $0xb0] ss:$8 sps:$4 sm:$0xff]  }
 0x107   :  { %1604 = vmatprep.subr.bf16.mxu0 %v5619_v4  ;;  %1768 = vmatprep.subr.bf16.mxu1 %v5622_v5  ;;  %v5712_v4 = vld [vmem:[#allocation5 + $0xc4] ss:$8 sps:$4 sm:$0xff]   ;;  %v5710_v5 = vld [vmem:[#allocation5 + $0xc0] ss:$8 sps:$4 sm:$0xff]  }
 0x10a   :  { %1605 = vmatpush1.bf16.msra.mxu0 %v5617_v6  ;;  %1769 = vmatpush1.bf16.msra.mxu1 %v5620_v7  ;;  %v5715_v6 = vld [vmem:[#allocation5 + $0xd4] ss:$8 sps:$4 sm:$0xff]   ;;  %v5713_v7 = vld [vmem:[#allocation5 + $0xd0] ss:$8 sps:$4 sm:$0xff]  }
 0x10b   :  { %1615 = vmatprep.subr.bf16.mxu0 %v5626_v8  ;;  %1779 = vmatprep.subr.bf16.mxu1 %v5629_v9  ;;  %v5718_v8 = vld [vmem:[#allocation5 + $0xe4] ss:$8 sps:$4 sm:$0xff]   ;;  %v5716_v9 = vld [vmem:[#allocation5 + $0xe0] ss:$8 sps:$4 sm:$0xff]  }
 0x10d   :  { %1607 = vmatmul.mubr.bf16.vlgmr.msra.gmra.mrb[0].mxu0 %v4665_v13  ;;  %1771 = vmatmul.mubr.bf16.vlgmr.msra.gmra.mrb[0].mxu1 %v4665_v13  ;;  %v5724_v13 = vld [vmem:[#allocation5 + $0x104] ss:$8 sps:$4 sm:$0xff]  }
 0x10e   :  { %1616 = vmatpush1.bf16.msra.mxu0 %v5624_v10  ;;  %1780 = vmatpush1.bf16.msra.mxu1 %v5627_v12  ;;  %v5721_v10 = vld [vmem:[#allocation5 + $0xf4] ss:$8 sps:$4 sm:$0xff]   ;;  %v5719_v12 = vld [vmem:[#allocation5 + $0xf0] ss:$8 sps:$4 sm:$0xff]  }
 0x10f   :  { %1617 = vmatprep.subr.bf16.mxu0 %v5633_v14  ;;  %1781 = vmatprep.subr.bf16.mxu1 %v5636_v15  ;;  %v5770_v14 = vld [vmem:[#allocation7] ss:$16 sps:$4 sm:$0xff]   ;;  %v5772_v15 = vld [vmem:[#allocation7 + $0x4] ss:$16 sps:$4 sm:$0xff]  }
 0x110   :  { %1647 = vmatprep.mubr.bf16.mxu0 %v6360_v22  ;;  %1811 = vmatprep.mubr.bf16.mxu1 %v6360_v22 }
 0x112   :  { %1618 = vmatpush1.bf16.msra.mxu0 %v5631_v16  ;;  %1782 = vmatpush1.bf16.msra.mxu1 %v5634_v17  ;;  %v5775_v16 = vld [vmem:[#allocation7 + $0x24] ss:$16 sps:$4 sm:$0xff]   ;;  %v5773_v17 = vld [vmem:[#allocation7 + $0x20] ss:$16 sps:$4 sm:$0xff]  }
 0x113   :  { %1619 = vmatprep.subr.bf16.mxu0 %v5639_v18  ;;  %1783 = vmatprep.subr.bf16.mxu1 %v5642_v19  ;;  %v327_v18 = vlaneseq }
 0x115   :  { %v6516_v19 = vshrl.u32 %v327_v18, 7  ;;  %v5767_v18 = vld [vmem:[#allocation5 + $0x1f0] ss:$8 sps:$4 sm:$0xff]  }
 0x116   :  { %1620 = vmatpush1.bf16.msra.mxu0 %v5637_v20  ;;  %1784 = vmatpush1.bf16.msra.mxu1 %v5640_v21  ;;  %v6524_v21 = vld [vmem:[%s6754_s3] sm:$0xf] }
 0x117   :  { %1621 = vmatprep.subr.bf16.mxu0 %v5645_v11  ;;  %1785 = vmatprep.subr.bf16.mxu1 %v5648_v23  ;;  %v6519_v20 = vsub.s32 0, %v6516_v19  ;;  %v6527_v11 = vsub.s32 1, %v6516_v19  ;;  %v6530_v23 = vsub.s32 3, %v6516_v19 }
 0x11a   :  { %1622 = vmatpush1.bf16.msra.mxu0 %v5643_v24  ;;  %1786 = vmatpush1.bf16.msra.mxu1 %v5646_v25  ;;  %v330_v24 = vrot.slane %v6524_v21, %v6519_v20  ;;  %v334_v25 = vrot.slane %v6524_v21, %v6527_v11 }
 0x11b   :  { %1623 = vmatprep.subr.bf16.mxu0 %v5651_v26  ;;  %1787 = vmatprep.subr.bf16.mxu1 %v5654_v27  ;;  %v342_v26 = vrot.slane %v6524_v21, %v6530_v23 }
 0x11e   :  { %1624 = vmatpush1.bf16.msra.mxu0 %v5649_v28  ;;  %1788 = vmatpush1.bf16.msra.mxu1 %v5652_v29 }
 0x11f   :  { %1625 = vmatprep.subr.bf16.mxu0 %v5657_v30  ;;  %1789 = vmatprep.subr.bf16.mxu1 %v5660_v31 }
 0x122   :  { %1626 = vmatpush1.bf16.msra.mxu0 %v5655_v32  ;;  %1790 = vmatpush1.bf16.msra.mxu1 %v5658_v33 }
 0x123   :  { %1627 = vmatprep.subr.bf16.mxu0 %v5663_v34  ;;  %1791 = vmatprep.subr.bf16.mxu1 %v5666_v35 }
 0x126   :  { %1628 = vmatpush1.bf16.msra.mxu0 %v5661_v36  ;;  %1792 = vmatpush1.bf16.msra.mxu1 %v5664_v37 }
 0x127   :  { %1629 = vmatprep.subr.bf16.mxu0 %v5669_v38  ;;  %1793 = vmatprep.subr.bf16.mxu1 %v5672_v39 }
 0x12a   :  { %1630 = vmatpush1.bf16.msra.mxu0 %v5667_v40  ;;  %1794 = vmatpush1.bf16.msra.mxu1 %v5670_v41 }
 0x12b   :  { %2232 = vmatprep.subr.bf16.mxu0 %v5676_v43  ;;  %2535 = vmatprep.subr.bf16.mxu1 %v5772_v15  ;;  %v5764_v15 = vld [vmem:[#allocation5 + $0x1e0] ss:$8 sps:$4 sm:$0xff]  }
 0x12d   :  { %1648 = vmatmul.mubr.bf16.vlgmr.msra.gmra.mrb[0].mxu0 %v4667_v45  ;;  %1812 = vmatmul.mubr.bf16.vlgmr.msra.gmra.mrb[0].mxu1 %v4667_v45  ;;  %v5722_v45 = vld [vmem:[#allocation5 + $0x100] ss:$8 sps:$4 sm:$0xff]  }
 0x12e   :  { %2233 = vmatpush1.bf16.msra.mxu0 %v5674_v44  ;;  %2567 = vmatprep.mubr.bf16.mxu1 %v6360_v22 }
 0x12f   :  { %2234 = vmatprep.subr.bf16.mxu0 %v5679_v46  ;;  %2536 = vmatpush1.bf16.msra.mxu1 %v5770_v14 }
 0x130   :  { %2537 = vmatprep.subr.bf16.mxu1 %v5775_v16  ;;  %v5769_v16 = vld [vmem:[#allocation5 + $0x1f4] ss:$8 sps:$4 sm:$0xff]  }
 0x132   :  { %2235 = vmatpush1.bf16.msra.mxu0 %v5677_v47  ;;  %v5727_v47 = vld [vmem:[#allocation5 + $0x114] ss:$8 sps:$4 sm:$0xff]  }
 0x133   :  { %2236 = vmatprep.subr.bf16.mxu0 %v5682_v48  ;;  %2538 = vmatpush1.bf16.msra.mxu1 %v5773_v17 }
 0x136   :  { %2237 = vmatpush1.bf16.msra.mxu0 %v5680_v49  ;;  %v5725_v49 = vld [vmem:[#allocation5 + $0x110] ss:$8 sps:$4 sm:$0xff]  }
 0x137   :  { %2238 = vmatprep.subr.bf16.mxu0 %v5685_v50  ;;  %v5730_v50 = vld [vmem:[#allocation5 + $0x124] ss:$8 sps:$4 sm:$0xff]  }
 0x13a   :  { %2239 = vmatpush1.bf16.msra.mxu0 %v5683_v51  ;;  %v5728_v51 = vld [vmem:[#allocation5 + $0x120] ss:$8 sps:$4 sm:$0xff]  }
 0x13b   :  { %2240 = vmatprep.subr.bf16.mxu0 %v5688_v52  ;;  %v5733_v52 = vld [vmem:[#allocation5 + $0x134] ss:$8 sps:$4 sm:$0xff]  }
 0x13e   :  { %2241 = vmatpush1.bf16.msra.mxu0 %v5686_v53  ;;  %v5731_v53 = vld [vmem:[#allocation5 + $0x130] ss:$8 sps:$4 sm:$0xff]  }
 0x13f   :  { %2242 = vmatprep.subr.bf16.mxu0 %v5691_v54  ;;  %v5736_v54 = vld [vmem:[#allocation5 + $0x144] ss:$8 sps:$4 sm:$0xff]  }
 0x142   :  { %2243 = vmatpush1.bf16.msra.mxu0 %v5689_v55  ;;  %v5734_v55 = vld [vmem:[#allocation5 + $0x140] ss:$8 sps:$4 sm:$0xff]  }
 0x143   :  { %2244 = vmatprep.subr.bf16.mxu0 %v5694_v56  ;;  %v5739_v56 = vld [vmem:[#allocation5 + $0x154] ss:$8 sps:$4 sm:$0xff]  }
 0x146   :  { %2245 = vmatpush1.bf16.msra.mxu0 %v5692_v57  ;;  %v5737_v57 = vld [vmem:[#allocation5 + $0x150] ss:$8 sps:$4 sm:$0xff]  }
 0x147   :  { %2246 = vmatprep.subr.bf16.mxu0 %v5697_v58  ;;  %v5742_v58 = vld [vmem:[#allocation5 + $0x164] ss:$8 sps:$4 sm:$0xff]  }
 0x14a   :  { %2247 = vmatpush1.bf16.msra.mxu0 %v5695_v59  ;;  %v5740_v59 = vld [vmem:[#allocation5 + $0x160] ss:$8 sps:$4 sm:$0xff]  }
 0x14b   :  { %2248 = vmatprep.subr.bf16.mxu0 %v5700_v60  ;;  %v5745_v60 = vld [vmem:[#allocation5 + $0x174] ss:$8 sps:$4 sm:$0xff]  }
 0x14e   :  { %2249 = vmatpush1.bf16.msra.mxu0 %v5698_v61  ;;  %v5743_v61 = vld [vmem:[#allocation5 + $0x170] ss:$8 sps:$4 sm:$0xff]  }
 0x14f   :  { %2250 = vmatprep.subr.bf16.mxu0 %v5703_v62  ;;  %v5748_v62 = vld [vmem:[#allocation5 + $0x184] ss:$8 sps:$4 sm:$0xff]  }
 0x152   :  { %2251 = vmatpush1.bf16.msra.mxu0 %v5701_v63  ;;  %v5746_v63 = vld [vmem:[#allocation5 + $0x180] ss:$8 sps:$4 sm:$0xff]  }
 0x153   :  { %2252 = vmatprep.subr.bf16.mxu0 %v5706_v0  ;;  %v5751_v0 = vld [vmem:[#allocation5 + $0x194] ss:$8 sps:$4 sm:$0xff]  }
 0x156   :  { %2253 = vmatpush1.bf16.msra.mxu0 %v5704_v1  ;;  %v5749_v1 = vld [vmem:[#allocation5 + $0x190] ss:$8 sps:$4 sm:$0xff]  }
 0x157   :  { %2254 = vmatprep.subr.bf16.mxu0 %v5709_v2  ;;  %v5754_v2 = vld [vmem:[#allocation5 + $0x1a4] ss:$8 sps:$4 sm:$0xff]  }
 0x15a   :  { %2255 = vmatpush1.bf16.msra.mxu0 %v5707_v3  ;;  %v5752_v3 = vld [vmem:[#allocation5 + $0x1a0] ss:$8 sps:$4 sm:$0xff]  }
 0x15b   :  { %2256 = vmatprep.subr.bf16.mxu0 %v5712_v4  ;;  %v5757_v4 = vld [vmem:[#allocation5 + $0x1b4] ss:$8 sps:$4 sm:$0xff]  }
 0x15e   :  { %2257 = vmatpush1.bf16.msra.mxu0 %v5710_v5  ;;  %v5755_v5 = vld [vmem:[#allocation5 + $0x1b0] ss:$8 sps:$4 sm:$0xff]  }
 0x15f   :  { %2258 = vmatprep.subr.bf16.mxu0 %v5715_v6  ;;  %v5760_v6 = vld [vmem:[#allocation5 + $0x1c4] ss:$8 sps:$4 sm:$0xff]  }
 0x162   :  { %2259 = vmatpush1.bf16.msra.mxu0 %v5713_v7  ;;  %v6541_v7 = vsub.s32 2, %v6516_v19 }
 0x163   :  { %2260 = vmatprep.subr.bf16.mxu0 %v5718_v8  ;;  %v5758_v8 = vld [vmem:[#allocation5 + $0x1c0] ss:$8 sps:$4 sm:$0xff]  }
 0x166   :  { %2261 = vmatpush1.bf16.msra.mxu0 %v5716_v9  ;;  %v5763_v9 = vld [vmem:[#allocation5 + $0x1d4] ss:$8 sps:$4 sm:$0xff]  }
 0x167   :  { %2262 = vmatprep.subr.bf16.mxu0 %v5721_v10  ;;  %v338_v10 = vrot.slane %v6524_v21, %v6541_v7  ;;  %v5778_v21 = vld [vmem:[#allocation7 + $0x44] ss:$16 sps:$4 sm:$0xff]  }
 0x168   :  { %2539 = vmatprep.subr.bf16.mxu1 %v5778_v21 }
 0x16a   :  { %2263 = vmatpush1.bf16.msra.mxu0 %v5719_v12  ;;  %v5761_v12 = vld [vmem:[#allocation5 + $0x1d0] ss:$8 sps:$4 sm:$0xff]  }
 0x16b   :  { %2273 = vmatprep.subr.bf16.mxu0 %v5724_v13  ;;  %v5766_v13 = vld [vmem:[#allocation5 + $0x1e4] ss:$8 sps:$4 sm:$0xff]  }
 0x200   :  { %v1649_v27 = vpop.f32.mrb[0].mxu0  ;;  %v6538_v28 = vpop.f32.mrb[0].mxu1 }
 0x201   :  { %v5265_v29 = vadd.f32 %v1649_v27, %v330_v24  ;;  %v1651_v30 = vpop.f32.mrb[1].mxu0  ;;  %v1815_v31 = vpop.f32.mrb[1].mxu1  ;;  %v5267_v14 = vadd.f32 %v6538_v28, %v338_v10  ;;  %v5781_v27 = vld [vmem:[#allocation7 + $0x64] ss:$16 sps:$4 sm:$0xff]  }
 0x202   :  { %v5266_v32 = vadd.f32 %v1651_v30, %v334_v25  ;;  %v5268_v33 = vadd.f32 %v1815_v31, %v342_v26  ;;  %v1653_v34 = vpop.f32.mrb[2].mxu0  ;;  %v1817_v35 = vpop.f32.mrb[2].mxu1  ;;  %v5776_v26 = vld [vmem:[#allocation7 + $0x40] ss:$16 sps:$4 sm:$0xff]   ;;  %v5784_v28 = vld [vmem:[#allocation7 + $0x84] ss:$16 sps:$4 sm:$0xff]  }
 0x203   :  { %vm1820_vm0 = vcmp.ge.f32.partialorder %v5265_v29, 0.0  ;;  %v1824_v36 = vmul.f32 0.2, %v5265_v29  ;;  %v1654_v40 = vpop.f32.mrb[3].mxu0  ;;  %v1818_v41 = vpop.f32.mrb[3].mxu1  ;;  %vm1822_vm3 = vcmp.ge.f32.partialorder %v5267_v14, 0.0  ;;  %2540 = vmatpush1.bf16.msra.mxu1 %v5776_v26 }
 0x204   :  { %vm1821_vm1 = vcmp.ge.f32.partialorder %v5266_v32, 0.0  ;;  %v1825_v37 = vmul.f32 0.2, %v5266_v32  ;;  %vm1823_vm2 = vcmp.ge.f32.partialorder %v5268_v33, 0.0  ;;  %v1827_v38 = vmul.f32 0.2, %v5268_v33  ;;  %2541 = vmatprep.subr.bf16.mxu1 %v5781_v27 }
 0x205   :  { %v1828_v39 = vsel %vm1820_vm0, %v5265_v29, %v1824_v36  ;;  %v1826_v17 = vmul.f32 0.2, %v5267_v14  ;;  %v5779_v29 = vld [vmem:[#allocation7 + $0x60] ss:$16 sps:$4 sm:$0xff]   ;;  %v5787_v31 = vld [vmem:[#allocation7 + $0xa4] ss:$16 sps:$4 sm:$0xff]  }
 0x206   :  { %v1829_v42 = vsel %vm1821_vm1, %v5266_v32, %v1825_v37  ;;  %v1831_v43 = vsel %vm1823_vm2, %v5268_v33, %v1827_v38  ;;  %v1832_v46 = vpack.c.bf16 %v1828_v39, %v1828_v39  ;;  %v5782_v30 = vld [vmem:[#allocation7 + $0x80] ss:$16 sps:$4 sm:$0xff]   ;;  %v5790_v33 = vld [vmem:[#allocation7 + $0xc4] ss:$16 sps:$4 sm:$0xff]   ;;  %v5796_v37 = vld [vmem:[#allocation7 + $0xc] ss:$16 sps:$4 sm:$0xff]  }
 0x207   :  { %v1833_v44 = vpack.c.bf16 %v1829_v42, %v1829_v42  ;;  %v1835_v48 = vpack.c.bf16 %v1831_v43, %v1831_v43  ;;  %v1830_v24 = vsel %vm1822_vm3, %v5267_v14, %v1826_v17  ;;  %2542 = vmatpush1.bf16.msra.mxu1 %v5779_v29  ;;  %v5785_v32 = vld [vmem:[#allocation7 + $0xa0] ss:$16 sps:$4 sm:$0xff]   ;;  %v5793_v35 = vld [vmem:[#allocation7 + $0xe4] ss:$16 sps:$4 sm:$0xff]   ;;  %v5823_v39 = vld [vmem:[#allocation8 + $0xc] ss:$28 sps:$4 sm:$0xff]  }
 0x208   :  { %v1834_v25 = vpack.c.bf16 %v1830_v24, %v1830_v24  ;;  %2543 = vmatprep.subr.bf16.mxu1 %v5784_v28  ;;  %v5788_v34 = vld [vmem:[#allocation7 + $0xc0] ss:$16 sps:$4 sm:$0xff]   ;;  %v5821_v38 = vld [vmem:[#allocation8 + $0x8] ss:$28 sps:$4 sm:$0xff]   ;;  %v5835_v42 = vld [vmem:[#allocation8 + $0x7c] ss:$28 sps:$4 sm:$0xff]  }
 0x209   :  { %2264 = vmatprep.mubr.bf16.mxu0 %v1833_v44  ;;  %v5791_v36 = vld [vmem:[#allocation7 + $0xe0] ss:$16 sps:$4 sm:$0xff]   ;;  %v5833_v43 = vld [vmem:[#allocation8 + $0x78] ss:$28 sps:$4 sm:$0xff]  }
 0x20a   :  { %2265 = vmatmul.mubr.bf16.vlgmr.msra.gmra.mrb[4].mxu0 %v1832_v46  ;;  %v5829_v40 = vld [vmem:[#allocation8 + $0x44] ss:$28 sps:$4 sm:$0xff]   ;;  %v5841_v44 = vld [vmem:[#allocation8 + $0xb4] ss:$28 sps:$4 sm:$0xff]   ;;  %v5847_v46 = vld [vmem:[#allocation8 + $0xec] ss:$28 sps:$4 sm:$0xff]  }
 0x20b   :  { %2274 = vmatpush1.bf16.msra.mxu0 %v5722_v45  ;;  %2305 = vmatprep.mubr.bf16.mxu0 %v1835_v48  ;;  %v5827_v41 = vld [vmem:[#allocation8 + $0x40] ss:$28 sps:$4 sm:$0xff]   ;;  %v5839_v45 = vld [vmem:[#allocation8 + $0xb0] ss:$28 sps:$4 sm:$0xff]   ;;  %v5794_v29 = vld [vmem:[#allocation7 + $0x8] ss:$16 sps:$4 sm:$0xff]  }
 0x20c   :  { %2275 = vmatprep.subr.bf16.mxu0 %v5727_v47  ;;  %2544 = vmatpush1.bf16.msra.mxu1 %v5782_v30  ;;  %v5845_v47 = vld [vmem:[#allocation8 + $0xe8] ss:$28 sps:$4 sm:$0xff]   ;;  %v5799_v30 = vld [vmem:[#allocation7 + $0x2c] ss:$16 sps:$4 sm:$0xff]  }
 0x20d   :  { %2545 = vmatprep.subr.bf16.mxu1 %v5787_v31  ;;  %v5853_v48 = vld [vmem:[#allocation8 + $0x124] ss:$28 sps:$4 sm:$0xff]   ;;  %v5797_v31 = vld [vmem:[#allocation7 + $0x28] ss:$16 sps:$4 sm:$0xff]  }
 0x20f   :  { %2276 = vmatpush1.bf16.msra.mxu0 %v5725_v49  ;;  %v5851_v49 = vld [vmem:[#allocation8 + $0x120] ss:$28 sps:$4 sm:$0xff]  }
 0x210   :  { %2277 = vmatprep.subr.bf16.mxu0 %v5730_v50  ;;  %2546 = vmatpush1.bf16.msra.mxu1 %v5785_v32  ;;  %v5859_v50 = vld [vmem:[#allocation8 + $0x15c] ss:$28 sps:$4 sm:$0xff]  }
 0x211   :  { %2547 = vmatprep.subr.bf16.mxu1 %v5790_v33  ;;  %v5802_v32 = vld [vmem:[#allocation7 + $0x4c] ss:$16 sps:$4 sm:$0xff]   ;;  %v5800_v33 = vld [vmem:[#allocation7 + $0x48] ss:$16 sps:$4 sm:$0xff]  }
 0x213   :  { %2278 = vmatpush1.bf16.msra.mxu0 %v5728_v51  ;;  %v5857_v51 = vld [vmem:[#allocation8 + $0x158] ss:$28 sps:$4 sm:$0xff]  }
 0x214   :  { %2279 = vmatprep.subr.bf16.mxu0 %v5733_v52  ;;  %2548 = vmatpush1.bf16.msra.mxu1 %v5788_v34  ;;  %v5865_v52 = vld [vmem:[#allocation8 + $0x194] ss:$28 sps:$4 sm:$0xff]   ;;  %v5805_v34 = vld [vmem:[#allocation7 + $0x6c] ss:$16 sps:$4 sm:$0xff]  }
 0x215   :  { %2549 = vmatprep.subr.bf16.mxu1 %v5793_v35  ;;  %v5803_v35 = vld [vmem:[#allocation7 + $0x68] ss:$16 sps:$4 sm:$0xff]  }
 0x217   :  { %2280 = vmatpush1.bf16.msra.mxu0 %v5731_v53  ;;  %v5863_v53 = vld [vmem:[#allocation8 + $0x190] ss:$28 sps:$4 sm:$0xff]  }
 0x218   :  { %2281 = vmatprep.subr.bf16.mxu0 %v5736_v54  ;;  %2550 = vmatpush1.bf16.msra.mxu1 %v5791_v36  ;;  %v5871_v54 = vld [vmem:[#allocation8 + $0x1cc] ss:$28 sps:$4 sm:$0xff]  }
 0x219   :  { %2576 = vmatprep.subr.bf16.mxu1 %v5796_v37  ;;  %v5808_v36 = vld [vmem:[#allocation7 + $0x8c] ss:$16 sps:$4 sm:$0xff]   ;;  %v5806_v37 = vld [vmem:[#allocation7 + $0x88] ss:$16 sps:$4 sm:$0xff]  }
 0x21b   :  { %2282 = vmatpush1.bf16.msra.mxu0 %v5734_v55  ;;  %v5869_v55 = vld [vmem:[#allocation8 + $0x1c8] ss:$28 sps:$4 sm:$0xff]  }
 0x21c   :  { %2283 = vmatprep.subr.bf16.mxu0 %v5739_v56  ;;  %v5877_v56 = vld [vmem:[#allocation8 + $0x204] ss:$28 sps:$4 sm:$0xff]  }
 0x21f   :  { %2284 = vmatpush1.bf16.msra.mxu0 %v5737_v57  ;;  %v5875_v57 = vld [vmem:[#allocation8 + $0x200] ss:$28 sps:$4 sm:$0xff]  }
 0x220   :  { %2285 = vmatprep.subr.bf16.mxu0 %v5742_v58  ;;  %v5883_v58 = vld [vmem:[#allocation8 + $0x23c] ss:$28 sps:$4 sm:$0xff]  }
 0x223   :  { %2286 = vmatpush1.bf16.msra.mxu0 %v5740_v59  ;;  %v5881_v59 = vld [vmem:[#allocation8 + $0x238] ss:$28 sps:$4 sm:$0xff]  }
 0x224   :  { %2287 = vmatprep.subr.bf16.mxu0 %v5745_v60  ;;  %v5889_v60 = vld [vmem:[#allocation8 + $0x274] ss:$28 sps:$4 sm:$0xff]  }
 0x227   :  { %2288 = vmatpush1.bf16.msra.mxu0 %v5743_v61  ;;  %v5887_v61 = vld [vmem:[#allocation8 + $0x270] ss:$28 sps:$4 sm:$0xff]  }
 0x228   :  { %2289 = vmatprep.subr.bf16.mxu0 %v5748_v62  ;;  %v5895_v62 = vld [vmem:[#allocation8 + $0x2ac] ss:$28 sps:$4 sm:$0xff]  }
 0x22b   :  { %2290 = vmatpush1.bf16.msra.mxu0 %v5746_v63  ;;  %v5893_v63 = vld [vmem:[#allocation8 + $0x2a8] ss:$28 sps:$4 sm:$0xff]  }
 0x22c   :  { %2291 = vmatprep.subr.bf16.mxu0 %v5751_v0  ;;  %v5901_v0 = vld [vmem:[#allocation8 + $0x2e4] ss:$28 sps:$4 sm:$0xff]  }
 0x22f   :  { %2292 = vmatpush1.bf16.msra.mxu0 %v5749_v1  ;;  %v5899_v1 = vld [vmem:[#allocation8 + $0x2e0] ss:$28 sps:$4 sm:$0xff]  }
 0x230   :  { %2293 = vmatprep.subr.bf16.mxu0 %v5754_v2  ;;  %v1900_v2 = vld [vmem:[%s6756_s5] sm:$0x3] }
 0x233   :  { %2294 = vmatpush1.bf16.msra.mxu0 %v5752_v3  ;;  %v1905_v3 = vrot.slane %v1900_v2, %v6519_v20 }
 0x234   :  { %2295 = vmatprep.subr.bf16.mxu0 %v5757_v4  ;;  %v1909_v4 = vrot.slane %v1900_v2, %v6527_v11  ;;  %v5884_v2 = vld [vmem:[#allocation8 + $0x268] ss:$28 sps:$4 sm:$0xff]  }
 0x237   :  { %2296 = vmatpush1.bf16.msra.mxu0 %v5755_v5 }
 0x238   :  { %2297 = vmatprep.subr.bf16.mxu0 %v5760_v6 }
 0x23b   :  { %2298 = vmatpush1.bf16.msra.mxu0 %v5758_v8 }
 0x23c   :  { %2299 = vmatprep.subr.bf16.mxu0 %v5763_v9 }
 0x23f   :  { %2300 = vmatpush1.bf16.msra.mxu0 %v5761_v12 }
 0x240   :  { %2301 = vmatprep.subr.bf16.mxu0 %v5766_v13 }
 0x243   :  { %2302 = vmatpush1.bf16.msra.mxu0 %v5764_v15 }
 0x244   :  { %2303 = vmatprep.subr.bf16.mxu0 %v5769_v16 }
 0x247   :  { %2304 = vmatpush1.bf16.msra.mxu0 %v5767_v18  ;;  %v2317_v18 = vld [vmem:[%s6752_s1] sm:$0xff] }
 0x248   :  { %4152 = vmatprep.subr.bf16.mxu0 %v5823_v39  ;;  %v5809_v39 = vld [vmem:[#allocation7 + $0xa8] ss:$16 sps:$4 sm:$0xff]  }
 0x24a   :  { %2306 = vmatmul.mubr.bf16.vlgmr.msra.gmra.mrb[4].mxu0 %v1834_v25 }
 0x24b   :  { %4153 = vmatpush1.bf16.msra.mxu0 %v5821_v38  ;;  %v5811_v38 = vld [vmem:[#allocation7 + $0xac] ss:$16 sps:$4 sm:$0xff]  }
 0x24c   :  { %4154 = vmatprep.subr.bf16.mxu0 %v5829_v40  ;;  %v5814_v40 = vld [vmem:[#allocation7 + $0xcc] ss:$16 sps:$4 sm:$0xff]  }
 0x24f   :  { %4155 = vmatpush1.bf16.msra.mxu0 %v5827_v41  ;;  %v5817_v41 = vld [vmem:[#allocation7 + $0xec] ss:$16 sps:$4 sm:$0xff]  }
 0x250   :  { %4156 = vmatprep.subr.bf16.mxu0 %v5835_v42  ;;  %v5815_v42 = vld [vmem:[#allocation7 + $0xe8] ss:$16 sps:$4 sm:$0xff]  }
 0x253   :  { %4157 = vmatpush1.bf16.msra.mxu0 %v5833_v43  ;;  %v5820_v43 = vld [vmem:[#allocation8 + $0x4] ss:$28 sps:$4 sm:$0xff]  }
 0x254   :  { %4158 = vmatprep.subr.bf16.mxu0 %v5841_v44  ;;  %v5818_v44 = vld [vmem:[#allocation8] ss:$28 sps:$4 sm:$0xff]  }
 0x257   :  { %4159 = vmatpush1.bf16.msra.mxu0 %v5839_v45  ;;  %v5826_v45 = vld [vmem:[#allocation8 + $0x3c] ss:$28 sps:$4 sm:$0xff]  }
 0x258   :  { %4160 = vmatprep.subr.bf16.mxu0 %v5847_v46  ;;  %v5824_v46 = vld [vmem:[#allocation8 + $0x38] ss:$28 sps:$4 sm:$0xff]  }
 0x25b   :  { %4161 = vmatpush1.bf16.msra.mxu0 %v5845_v47  ;;  %v5832_v47 = vld [vmem:[#allocation8 + $0x74] ss:$28 sps:$4 sm:$0xff]  }
 0x25c   :  { %4162 = vmatprep.subr.bf16.mxu0 %v5853_v48  ;;  %v5830_v48 = vld [vmem:[#allocation8 + $0x70] ss:$28 sps:$4 sm:$0xff]  }
 0x25f   :  { %4163 = vmatpush1.bf16.msra.mxu0 %v5851_v49  ;;  %v5838_v49 = vld [vmem:[#allocation8 + $0xac] ss:$28 sps:$4 sm:$0xff]  }
 0x260   :  { %4164 = vmatprep.subr.bf16.mxu0 %v5859_v50  ;;  %v5836_v50 = vld [vmem:[#allocation8 + $0xa8] ss:$28 sps:$4 sm:$0xff]  }
 0x263   :  { %4165 = vmatpush1.bf16.msra.mxu0 %v5857_v51  ;;  %v5844_v51 = vld [vmem:[#allocation8 + $0xe4] ss:$28 sps:$4 sm:$0xff]  }
 0x264   :  { %4166 = vmatprep.subr.bf16.mxu0 %v5865_v52  ;;  %v5842_v52 = vld [vmem:[#allocation8 + $0xe0] ss:$28 sps:$4 sm:$0xff]  }
 0x267   :  { %4167 = vmatpush1.bf16.msra.mxu0 %v5863_v53  ;;  %v5850_v53 = vld [vmem:[#allocation8 + $0x11c] ss:$28 sps:$4 sm:$0xff]  }
 0x268   :  { %4168 = vmatprep.subr.bf16.mxu0 %v5871_v54  ;;  %v5848_v54 = vld [vmem:[#allocation8 + $0x118] ss:$28 sps:$4 sm:$0xff]  }
 0x26b   :  { %4169 = vmatpush1.bf16.msra.mxu0 %v5869_v55  ;;  %v5856_v55 = vld [vmem:[#allocation8 + $0x154] ss:$28 sps:$4 sm:$0xff]  }
 0x26c   :  { %4170 = vmatprep.subr.bf16.mxu0 %v5877_v56  ;;  %v5854_v56 = vld [vmem:[#allocation8 + $0x150] ss:$28 sps:$4 sm:$0xff]  }
 0x26f   :  { %4171 = vmatpush1.bf16.msra.mxu0 %v5875_v57  ;;  %v5862_v57 = vld [vmem:[#allocation8 + $0x18c] ss:$28 sps:$4 sm:$0xff]  }
 0x270   :  { %4172 = vmatprep.subr.bf16.mxu0 %v5883_v58  ;;  %v5860_v58 = vld [vmem:[#allocation8 + $0x188] ss:$28 sps:$4 sm:$0xff]  }
 0x273   :  { %4173 = vmatpush1.bf16.msra.mxu0 %v5881_v59  ;;  %v5868_v59 = vld [vmem:[#allocation8 + $0x1c4] ss:$28 sps:$4 sm:$0xff]  }
 0x274   :  { %4174 = vmatprep.subr.bf16.mxu0 %v5889_v60  ;;  %v5866_v60 = vld [vmem:[#allocation8 + $0x1c0] ss:$28 sps:$4 sm:$0xff]  }
 0x277   :  { %4175 = vmatpush1.bf16.msra.mxu0 %v5887_v61  ;;  %v5874_v61 = vld [vmem:[#allocation8 + $0x1fc] ss:$28 sps:$4 sm:$0xff]  }
 0x278   :  { %4176 = vmatprep.subr.bf16.mxu0 %v5895_v62  ;;  %v5872_v62 = vld [vmem:[#allocation8 + $0x1f8] ss:$28 sps:$4 sm:$0xff]  }
 0x27b   :  { %4177 = vmatpush1.bf16.msra.mxu0 %v5893_v63  ;;  %v5880_v63 = vld [vmem:[#allocation8 + $0x234] ss:$28 sps:$4 sm:$0xff]  }
 0x27c   :  { %4178 = vmatprep.subr.bf16.mxu0 %v5901_v0  ;;  %v5878_v0 = vld [vmem:[#allocation8 + $0x230] ss:$28 sps:$4 sm:$0xff]  }
 0x27f   :  { %4179 = vmatpush1.bf16.msra.mxu0 %v5899_v1  ;;  %v5886_v1 = vld [vmem:[#allocation8 + $0x26c] ss:$28 sps:$4 sm:$0xff]  }
 0x31d   :  { %v2307_v5 = vpop.f32.mrb[4].mxu0 }
 0x31e   :  { %v5269_v6 = vadd.f32 %v2307_v5, %v1905_v3  ;;  %v2309_v8 = vpop.f32.mrb[5].mxu0  ;;  %v5892_v3 = vld [vmem:[#allocation8 + $0x2a4] ss:$28 sps:$4 sm:$0xff]   ;;  %v5898_v5 = vld [vmem:[#allocation8 + $0x2dc] ss:$28 sps:$4 sm:$0xff]  }
 0x31f   :  { %v5270_v9 = vadd.f32 %v2309_v8, %v1909_v4  ;;  %v2311_v10 = vpop.f32.mrb[6].mxu0  ;;  %v5890_v4 = vld [vmem:[#allocation8 + $0x2a0] ss:$28 sps:$4 sm:$0xff]   ;;  %v5904_v8 = vld [vmem:[#allocation8 + $0x314] ss:$28 sps:$4 sm:$0xff]  }
 0x320   :  { %v4604_v12 = vmul.f32 %v5269_v6, %v5269_v6  ;;  %4493 = vst [vmem:[#allocation11] sm:$0xff] %v5269_v6  ;;  %v2312_v13 = vpop.f32.mrb[7].mxu0  ;;  %v5905_v10 = vld [vmem:[#allocation8 + $0x318] ss:$28 sps:$4 sm:$0xff]  }
 0x321   :  { %v2314_v14 = vmul.f32 0.5, %v5270_v9  ;;  %v4603_v15 = vadd.f32 1.0, %v5270_v9  ;;  %4494 = vst [vmem:[#allocation13] sm:$0xff] %v5270_v9  ;;  %v5907_v9 = vld [vmem:[#allocation8 + $0x31c] ss:$28 sps:$4 sm:$0xff]  }
 0x322   :  { %4180 = vmatprep.subr.bf16.mxu0 %v5907_v9  ;;  %v5910_v13 = vld [vmem:[#allocation8 + $0x34c] ss:$28 sps:$4 sm:$0xff]   ;;  %v5964_v9 = vld [vmem:[#allocation8 + $0x544] ss:$28 sps:$4 sm:$0xff]  }
 0x323   :  { %v2315_v16 = vmul.f32 1.442695, %v2314_v14  ;;  %v4605_v17 = vsub.f32 %v4603_v15, %v4604_v12  ;;  %v5902_v12 = vld [vmem:[#allocation8 + $0x310] ss:$28 sps:$4 sm:$0xff]   ;;  %4181 = vmatpush1.bf16.msra.mxu0 %v5905_v10 }
 0x324   :  { %v5913_v14 = vld [vmem:[#allocation8 + $0x354] ss:$28 sps:$4 sm:$0xff]   ;;  %v5967_v10 = vld [vmem:[#allocation8 + $0x54c] ss:$28 sps:$4 sm:$0xff]  }
 0x325   :  { %6138 = vpow2.f32 %v2315_v16  ;;  %v5911_v15 = vld [vmem:[#allocation8 + $0x350] ss:$28 sps:$4 sm:$0xff]   ;;  %4182 = vmatprep.subr.bf16.mxu0 %v5913_v14  ;;  %v5908_v16 = vld [vmem:[#allocation8 + $0x348] ss:$28 sps:$4 sm:$0xff]   ;;  %v5962_v14 = vld [vmem:[#allocation8 + $0x540] ss:$28 sps:$4 sm:$0xff]  }
 0x327   :  { %4183 = vmatpush1.bf16.msra.mxu0 %v5911_v15  ;;  %v5965_v15 = vld [vmem:[#allocation8 + $0x548] ss:$28 sps:$4 sm:$0xff]  }
 0x32f   :  { %v6139_v24 = vpop.eup %6138 }
 0x330   :  { %v2318_v25 = vmul.f32 %v6139_v24, %v2317_v18  ;;  %v4602_v21 = vmul.f32 %v6139_v24, %v6139_v24  ;;  %v5919_v18 = vld [vmem:[#allocation8 + $0x38c] ss:$28 sps:$4 sm:$0xff]   ;;  %v6560_v24 = vld [vmem:[%s6758_s7] sm:$0xf] }
 0x331   :  { %4193 = vmatprep.subr.bf16.mxu0 %v5919_v18  ;;  %v5968_v18 = vld [vmem:[#allocation8 + $0x578] ss:$28 sps:$4 sm:$0xff]  }
 0x332   :  { %v2319_v26 = vadd.f32 %v5269_v6, %v2318_v25  ;;  %v6554_v27 = vsub.f32 %v4605_v17, %v4602_v21  ;;  %v5896_v6 = vld [vmem:[#allocation8 + $0x2d8] ss:$28 sps:$4 sm:$0xff]   ;;  %v5916_v17 = vld [vmem:[#allocation8 + $0x384] ss:$28 sps:$4 sm:$0xff]   ;;  %v2358_v25 = vrot.slane %v6560_v24, %v6519_v20  ;;  %v2362_v21 = vrot.slane %v6560_v24, %v6527_v11 }
 0x334   :  { %v2320_v28 = vpack.c.bf16 %v2319_v26, %v2319_v26 }
 0x336   :  { %2568 = vmatmul.mubr.bf16.vlgmr.msra.gmra.mrb[4].mxu1 %v2320_v28 }
 0x337   :  { %2577 = vmatpush1.bf16.msra.mxu1 %v5794_v29  ;;  %2608 = vmatprep.mubr.bf16.mxu1 %v6360_v22  ;;  %v5812_v22 = vld [vmem:[#allocation7 + $0xc8] ss:$16 sps:$4 sm:$0xff]  }
 0x338   :  { %2578 = vmatprep.subr.bf16.mxu1 %v5799_v30 }
 0x33b   :  { %2579 = vmatpush1.bf16.msra.mxu1 %v5797_v31 }
 0x33c   :  { %2580 = vmatprep.subr.bf16.mxu1 %v5802_v32 }
 0x33f   :  { %2581 = vmatpush1.bf16.msra.mxu1 %v5800_v33 }
 0x340   :  { %2582 = vmatprep.subr.bf16.mxu1 %v5805_v34 }
 0x343   :  { %2583 = vmatpush1.bf16.msra.mxu1 %v5803_v35 }
 0x344   :  { %2584 = vmatprep.subr.bf16.mxu1 %v5808_v36  ;;  %v5914_v36 = vld [vmem:[#allocation8 + $0x380] ss:$28 sps:$4 sm:$0xff]  }
 0x347   :  { %2585 = vmatpush1.bf16.msra.mxu1 %v5806_v37  ;;  %v5917_v37 = vld [vmem:[#allocation8 + $0x388] ss:$28 sps:$4 sm:$0xff]  }
 0x348   :  { %2586 = vmatprep.subr.bf16.mxu1 %v5811_v38 }
 0x34b   :  { %2587 = vmatpush1.bf16.msra.mxu1 %v5809_v39  ;;  %v5922_v39 = vld [vmem:[#allocation8 + $0x3bc] ss:$28 sps:$4 sm:$0xff]  }
 0x34c   :  { %2588 = vmatprep.subr.bf16.mxu1 %v5814_v40  ;;  %v5925_v40 = vld [vmem:[#allocation8 + $0x3c4] ss:$28 sps:$4 sm:$0xff]  }
 0x34f   :  { %2589 = vmatpush1.bf16.msra.mxu1 %v5812_v22  ;;  %v5920_v22 = vld [vmem:[#allocation8 + $0x3b8] ss:$28 sps:$4 sm:$0xff]  }
 0x350   :  { %2590 = vmatprep.subr.bf16.mxu1 %v5817_v41  ;;  %v5923_v41 = vld [vmem:[#allocation8 + $0x3c0] ss:$28 sps:$4 sm:$0xff]  }
 0x353   :  { %2591 = vmatpush1.bf16.msra.mxu1 %v5815_v42  ;;  %v5928_v42 = vld [vmem:[#allocation8 + $0x3f4] ss:$28 sps:$4 sm:$0xff]  }
 0x354   :  { %4070 = vmatprep.subr.bf16.mxu1 %v5820_v43  ;;  %v5931_v43 = vld [vmem:[#allocation8 + $0x3fc] ss:$28 sps:$4 sm:$0xff]  }
 0x356   :  { %2609 = vmatmul.mubr.bf16.vlgmr.msra.gmra.mrb[8].mxu1 %v2320_v28 }
 0x357   :  { %4071 = vmatpush1.bf16.msra.mxu1 %v5818_v44  ;;  %v5926_v44 = vld [vmem:[#allocation8 + $0x3f0] ss:$28 sps:$4 sm:$0xff]  }
 0x358   :  { %4072 = vmatprep.subr.bf16.mxu1 %v5826_v45  ;;  %v5929_v45 = vld [vmem:[#allocation8 + $0x3f8] ss:$28 sps:$4 sm:$0xff]  }
 0x35b   :  { %4073 = vmatpush1.bf16.msra.mxu1 %v5824_v46  ;;  %v5934_v46 = vld [vmem:[#allocation8 + $0x42c] ss:$28 sps:$4 sm:$0xff]  }
 0x35c   :  { %4074 = vmatprep.subr.bf16.mxu1 %v5832_v47  ;;  %v5937_v47 = vld [vmem:[#allocation8 + $0x434] ss:$28 sps:$4 sm:$0xff]  }
 0x35f   :  { %4075 = vmatpush1.bf16.msra.mxu1 %v5830_v48  ;;  %v5932_v48 = vld [vmem:[#allocation8 + $0x428] ss:$28 sps:$4 sm:$0xff]  }
 0x360   :  { %4076 = vmatprep.subr.bf16.mxu1 %v5838_v49  ;;  %v5935_v49 = vld [vmem:[#allocation8 + $0x430] ss:$28 sps:$4 sm:$0xff]  }
 0x363   :  { %4077 = vmatpush1.bf16.msra.mxu1 %v5836_v50  ;;  %v5940_v50 = vld [vmem:[#allocation8 + $0x464] ss:$28 sps:$4 sm:$0xff]  }
 0x364   :  { %4078 = vmatprep.subr.bf16.mxu1 %v5844_v51  ;;  %v5943_v51 = vld [vmem:[#allocation8 + $0x46c] ss:$28 sps:$4 sm:$0xff]  }
 0x367   :  { %4079 = vmatpush1.bf16.msra.mxu1 %v5842_v52  ;;  %v5938_v52 = vld [vmem:[#allocation8 + $0x460] ss:$28 sps:$4 sm:$0xff]  }
 0x368   :  { %4080 = vmatprep.subr.bf16.mxu1 %v5850_v53  ;;  %v5941_v53 = vld [vmem:[#allocation8 + $0x468] ss:$28 sps:$4 sm:$0xff]  }
 0x36b   :  { %4081 = vmatpush1.bf16.msra.mxu1 %v5848_v54  ;;  %v5946_v54 = vld [vmem:[#allocation8 + $0x49c] ss:$28 sps:$4 sm:$0xff]  }
 0x36c   :  { %4082 = vmatprep.subr.bf16.mxu1 %v5856_v55  ;;  %v5949_v55 = vld [vmem:[#allocation8 + $0x4a4] ss:$28 sps:$4 sm:$0xff]  }
 0x36f   :  { %4083 = vmatpush1.bf16.msra.mxu1 %v5854_v56  ;;  %v5944_v56 = vld [vmem:[#allocation8 + $0x498] ss:$28 sps:$4 sm:$0xff]  }
 0x370   :  { %4084 = vmatprep.subr.bf16.mxu1 %v5862_v57  ;;  %v5947_v57 = vld [vmem:[#allocation8 + $0x4a0] ss:$28 sps:$4 sm:$0xff]  }
 0x373   :  { %4085 = vmatpush1.bf16.msra.mxu1 %v5860_v58  ;;  %v5952_v58 = vld [vmem:[#allocation8 + $0x4d4] ss:$28 sps:$4 sm:$0xff]  }
 0x374   :  { %4086 = vmatprep.subr.bf16.mxu1 %v5868_v59  ;;  %v5955_v59 = vld [vmem:[#allocation8 + $0x4dc] ss:$28 sps:$4 sm:$0xff]  }
 0x377   :  { %4087 = vmatpush1.bf16.msra.mxu1 %v5866_v60  ;;  %v2370_v60 = vrot.slane %v6560_v24, %v6530_v23 }
 0x378   :  { %4088 = vmatprep.subr.bf16.mxu1 %v5874_v61  ;;  %v5950_v61 = vld [vmem:[#allocation8 + $0x4d0] ss:$28 sps:$4 sm:$0xff]  }
 0x37b   :  { %4089 = vmatpush1.bf16.msra.mxu1 %v5872_v62  ;;  %v5953_v62 = vld [vmem:[#allocation8 + $0x4d8] ss:$28 sps:$4 sm:$0xff]  }
 0x37c   :  { %4090 = vmatprep.subr.bf16.mxu1 %v5880_v63  ;;  %v5958_v63 = vld [vmem:[#allocation8 + $0x50c] ss:$28 sps:$4 sm:$0xff]  }
 0x37f   :  { %4091 = vmatpush1.bf16.msra.mxu1 %v5878_v0  ;;  %v5961_v0 = vld [vmem:[#allocation8 + $0x514] ss:$28 sps:$4 sm:$0xff]  }
 0x380   :  { %4092 = vmatprep.subr.bf16.mxu1 %v5886_v1 }
 0x383   :  { %4093 = vmatpush1.bf16.msra.mxu1 %v5884_v2 }
 0x384   :  { %4094 = vmatprep.subr.bf16.mxu1 %v5892_v3 }
 0x387   :  { %4095 = vmatpush1.bf16.msra.mxu1 %v5890_v4 }
 0x388   :  { %4096 = vmatprep.subr.bf16.mxu1 %v5898_v5  ;;  %v5956_v5 = vld [vmem:[#allocation8 + $0x508] ss:$28 sps:$4 sm:$0xff]  }
 0x38b   :  { %4097 = vmatpush1.bf16.msra.mxu1 %v5896_v6  ;;  %v5959_v6 = vld [vmem:[#allocation8 + $0x510] ss:$28 sps:$4 sm:$0xff]  }
 0x38c   :  { %4098 = vmatprep.subr.bf16.mxu1 %v5904_v8 }
 0x38f   :  { %4099 = vmatpush1.bf16.msra.mxu1 %v5902_v12 }
 0x390   :  { %4100 = vmatprep.subr.bf16.mxu1 %v5910_v13 }
 0x393   :  { %4101 = vmatpush1.bf16.msra.mxu1 %v5908_v16  ;;  %v5970_v16 = vld [vmem:[#allocation8 + $0x57c] ss:$28 sps:$4 sm:$0xff]  }
 0x394   :  { %4111 = vmatprep.subr.bf16.mxu1 %v5916_v17  ;;  %v5973_v17 = vld [vmem:[#allocation8 + $0x584] ss:$28 sps:$4 sm:$0xff]  }
 0x409   :  { %v2569_v26 = vpop.f32.mrb[4].mxu1 }
 0x40a   :  { %v2570_v29 = vadd.f32 %v2569_v26, %v2358_v25  ;;  %v2571_v28 = vpop.f32.mrb[5].mxu1  ;;  %v5971_v25 = vld [vmem:[#allocation8 + $0x580] ss:$28 sps:$4 sm:$0xff]  }
 0x40b   :  { %v2572_v30 = vadd.f32 %v2571_v28, %v2362_v21  ;;  %v2573_v31 = vpop.f32.mrb[6].mxu1  ;;  %v5976_v21 = vld [vmem:[#allocation8 + $0x5b4] ss:$28 sps:$4 sm:$0xff]   ;;  %v5979_v26 = vld [vmem:[#allocation8 + $0x5bc] ss:$28 sps:$4 sm:$0xff]  }
 0x40c   :  { %v2617_v32 = vmax.f32 %v2570_v29, 0.0  ;;  %v2574_v33 = vpop.f32.mrb[7].mxu1  ;;  %v5974_v29 = vld [vmem:[#allocation8 + $0x5b0] ss:$28 sps:$4 sm:$0xff]   ;;  %v5977_v28 = vld [vmem:[#allocation8 + $0x5b8] ss:$28 sps:$4 sm:$0xff]  }
 0x40d   :  { %v2618_v34 = vmax.f32 %v2572_v30, 0.0  ;;  %v5982_v30 = vld [vmem:[#allocation8 + $0x5ec] ss:$28 sps:$4 sm:$0xff]   ;;  %v5985_v31 = vld [vmem:[#allocation8 + $0x5f4] ss:$28 sps:$4 sm:$0xff]  }
 0x40e   :  { %v6568_v38 = vpack.c.bf16 %v2617_v32, %v2617_v32  ;;  %v5980_v32 = vld [vmem:[#allocation8 + $0x5e8] ss:$28 sps:$4 sm:$0xff]   ;;  %v5983_v33 = vld [vmem:[#allocation8 + $0x5f0] ss:$28 sps:$4 sm:$0xff]  }
 0x40f   :  { %v6566_v35 = vpack.c.bf16 %v2618_v34, %v2618_v34  ;;  %v5988_v34 = vld [vmem:[#allocation8 + $0x624] ss:$28 sps:$4 sm:$0xff]  }
 0x411   :  { %4102 = vmatprep.mubr.bf16.mxu1 %v6566_v35  ;;  %4184 = vmatprep.mubr.bf16.mxu0 %v6566_v35 }
 0x412   :  { %4103 = vmatmul.mubr.bf16.vlgmr.msra.gmra.mrb[12].mxu1 %v6568_v38  ;;  %4185 = vmatmul.mubr.bf16.vlgmr.msra.gmra.mrb[8].mxu0 %v6568_v38 }
 0x413   :  { %4112 = vmatpush1.bf16.msra.mxu1 %v5914_v36  ;;  %4194 = vmatpush1.bf16.msra.mxu0 %v5917_v37  ;;  %v5991_v36 = vld [vmem:[#allocation8 + $0x62c] ss:$28 sps:$4 sm:$0xff]   ;;  %v5986_v37 = vld [vmem:[#allocation8 + $0x620] ss:$28 sps:$4 sm:$0xff]  }
 0x414   :  { %4113 = vmatprep.subr.bf16.mxu1 %v5922_v39  ;;  %4195 = vmatprep.subr.bf16.mxu0 %v5925_v40  ;;  %v5989_v39 = vld [vmem:[#allocation8 + $0x628] ss:$28 sps:$4 sm:$0xff]   ;;  %v5994_v40 = vld [vmem:[#allocation8 + $0x65c] ss:$28 sps:$4 sm:$0xff]  }
 0x417   :  { %4114 = vmatpush1.bf16.msra.mxu1 %v5920_v22  ;;  %4196 = vmatpush1.bf16.msra.mxu0 %v5923_v41  ;;  %v5997_v22 = vld [vmem:[#allocation8 + $0x664] ss:$28 sps:$4 sm:$0xff]   ;;  %v5992_v41 = vld [vmem:[#allocation8 + $0x658] ss:$28 sps:$4 sm:$0xff]  }
 0x418   :  { %4115 = vmatprep.subr.bf16.mxu1 %v5928_v42  ;;  %4197 = vmatprep.subr.bf16.mxu0 %v5931_v43  ;;  %v5995_v42 = vld [vmem:[#allocation8 + $0x660] ss:$28 sps:$4 sm:$0xff]   ;;  %v2366_v43 = vrot.slane %v6560_v24, %v6541_v7  ;;  %v6012_v24 = vld [vmem:[#allocation8 + $0x14] ss:$28 sps:$4 sm:$0xff]  }
 0x41b   :  { %4116 = vmatpush1.bf16.msra.mxu1 %v5926_v44  ;;  %4198 = vmatpush1.bf16.msra.mxu0 %v5929_v45  ;;  %v6000_v44 = vld [vmem:[#allocation8 + $0x694] ss:$28 sps:$4 sm:$0xff]   ;;  %v6003_v45 = vld [vmem:[#allocation8 + $0x69c] ss:$28 sps:$4 sm:$0xff]  }
 0x41c   :  { %4117 = vmatprep.subr.bf16.mxu1 %v5934_v46  ;;  %4199 = vmatprep.subr.bf16.mxu0 %v5937_v47  ;;  %v5998_v46 = vld [vmem:[#allocation8 + $0x690] ss:$28 sps:$4 sm:$0xff]   ;;  %v6001_v47 = vld [vmem:[#allocation8 + $0x698] ss:$28 sps:$4 sm:$0xff]  }
 0x41f   :  { %4118 = vmatpush1.bf16.msra.mxu1 %v5932_v48  ;;  %4200 = vmatpush1.bf16.msra.mxu0 %v5935_v49  ;;  %v6006_v49 = vld [vmem:[#allocation8 + $0x6cc] ss:$28 sps:$4 sm:$0xff]  }
 0x420   :  { %4119 = vmatprep.subr.bf16.mxu1 %v5940_v50  ;;  %4201 = vmatprep.subr.bf16.mxu0 %v5943_v51  ;;  %v6009_v50 = vld [vmem:[#allocation8 + $0x6d4] ss:$28 sps:$4 sm:$0xff]   ;;  %v6004_v51 = vld [vmem:[#allocation8 + $0x6c8] ss:$28 sps:$4 sm:$0xff]  }
 0x423   :  { %4120 = vmatpush1.bf16.msra.mxu1 %v5938_v52  ;;  %4202 = vmatpush1.bf16.msra.mxu0 %v5941_v53  ;;  %v6007_v52 = vld [vmem:[#allocation8 + $0x6d0] ss:$28 sps:$4 sm:$0xff]  }
 0x424   :  { %4121 = vmatprep.subr.bf16.mxu1 %v5946_v54  ;;  %4203 = vmatprep.subr.bf16.mxu0 %v5949_v55  ;;  %v6013_v54 = vld [vmem:[#allocation8 + $0x1d8] ss:$28 sps:$4 sm:$0xff]   ;;  %v6010_v55 = vld [vmem:[#allocation8 + $0x10] ss:$28 sps:$4 sm:$0xff]  }
 0x427   :  { %4122 = vmatpush1.bf16.msra.mxu1 %v5944_v56  ;;  %4204 = vmatpush1.bf16.msra.mxu0 %v5947_v57  ;;  %v6014_v57 = vld [vmem:[#allocation8 + $0x18] ss:$28 sps:$4 sm:$0xff]  }
 0x428   :  { %4123 = vmatprep.subr.bf16.mxu1 %v5952_v58  ;;  %4205 = vmatprep.subr.bf16.mxu0 %v5955_v59  ;;  %v6017_v58 = vld [vmem:[#allocation8 + $0x4c] ss:$28 sps:$4 sm:$0xff]  }
 0x429   :  { %v6576_v1 = vpop.f32.mrb[8].mxu1  ;;  %v6018_v59 = vld [vmem:[#allocation8 + $0x210] ss:$28 sps:$4 sm:$0xff]  }
 0x42a   :  { %v2612_v2 = vpop.f32.mrb[9].mxu1  ;;  %v2611_v48 = vadd.f32 %v6576_v1, %v2366_v43  ;;  %v6024_v1 = vld [vmem:[#allocation8 + $0x88] ss:$28 sps:$4 sm:$0xff]   ;;  %v6067_v43 = vld [vmem:[#allocation8 + $0x27c] ss:$28 sps:$4 sm:$0xff]  }
 0x42b   :  { %v2613_v3 = vadd.f32 %v2612_v2, %v2370_v60  ;;  %v2614_v4 = vpop.f32.mrb[10].mxu1  ;;  %4124 = vmatpush1.bf16.msra.mxu1 %v5950_v61  ;;  %4206 = vmatpush1.bf16.msra.mxu0 %v5953_v62  ;;  %v6015_v60 = vld [vmem:[#allocation8 + $0x48] ss:$28 sps:$4 sm:$0xff]   ;;  %v6019_v61 = vld [vmem:[#allocation8 + $0x50] ss:$28 sps:$4 sm:$0xff]  }
 0x42c   :  { %v2615_v8 = vpop.f32.mrb[11].mxu1  ;;  %4125 = vmatprep.subr.bf16.mxu1 %v5958_v63  ;;  %4207 = vmatprep.subr.bf16.mxu0 %v5961_v0  ;;  %v2619_v53 = vmax.f32 %v2611_v48, 0.0  ;;  %v6022_v62 = vld [vmem:[#allocation8 + $0x84] ss:$28 sps:$4 sm:$0xff]   ;;  %v6027_v2 = vld [vmem:[#allocation8 + $0xbc] ss:$28 sps:$4 sm:$0xff]  }
 0x42d   :  { %v2620_v12 = vmax.f32 %v2613_v3, 0.0  ;;  %v6023_v63 = vld [vmem:[#allocation8 + $0x248] ss:$28 sps:$4 sm:$0xff]   ;;  %v6020_v0 = vld [vmem:[#allocation8 + $0x80] ss:$28 sps:$4 sm:$0xff]  }
 0x42e   :  { %v6585_v56 = vpack.c.bf16 %v2619_v53, %v2619_v53  ;;  %v6028_v3 = vld [vmem:[#allocation8 + $0x280] ss:$28 sps:$4 sm:$0xff]   ;;  %v6025_v4 = vld [vmem:[#allocation8 + $0xb8] ss:$28 sps:$4 sm:$0xff]   ;;  %v6030_v8 = vld [vmem:[#allocation8 + $0xf0] ss:$28 sps:$4 sm:$0xff]  }
 0x42f   :  { %v6578_v13 = vpack.c.bf16 %v2620_v12, %v2620_v12  ;;  %4126 = vmatpush1.bf16.msra.mxu1 %v5956_v5  ;;  %4208 = vmatpush1.bf16.msra.mxu0 %v5959_v6  ;;  %v6029_v5 = vld [vmem:[#allocation8 + $0xc0] ss:$28 sps:$4 sm:$0xff]   ;;  %v6032_v6 = vld [vmem:[#allocation8 + $0xf4] ss:$28 sps:$4 sm:$0xff]   ;;  %v6075_v53 = vld [vmem:[#allocation8 + $0x2e8] ss:$28 sps:$4 sm:$0xff]  }
 0x430   :  { %4127 = vmatprep.subr.bf16.mxu1 %v5964_v9  ;;  %4209 = vmatprep.subr.bf16.mxu0 %v5967_v10  ;;  %v6034_v9 = vld [vmem:[#allocation8 + $0xf8] ss:$28 sps:$4 sm:$0xff]   ;;  %v6037_v10 = vld [vmem:[#allocation8 + $0x12c] ss:$28 sps:$4 sm:$0xff]  }
 0x431   :  { %4143 = vmatprep.mubr.bf16.mxu1 %v6578_v13  ;;  %4225 = vmatprep.mubr.bf16.mxu0 %v6578_v13  ;;  %v6038_v12 = vld [vmem:[#allocation8 + $0x2f0] ss:$28 sps:$4 sm:$0xff]   ;;  %v6073_v48 = vld [vmem:[#allocation8 + $0x638] ss:$28 sps:$4 sm:$0xff]  }
 0x433   :  { %4128 = vmatpush1.bf16.msra.mxu1 %v5962_v14  ;;  %4210 = vmatpush1.bf16.msra.mxu0 %v5965_v15  ;;  %v6035_v14 = vld [vmem:[#allocation8 + $0x128] ss:$28 sps:$4 sm:$0xff]   ;;  %v6039_v15 = vld [vmem:[#allocation8 + $0x130] ss:$28 sps:$4 sm:$0xff]  }
 0x434   :  { %4129 = vmatprep.subr.bf16.mxu1 %v5970_v16  ;;  %4211 = vmatprep.subr.bf16.mxu0 %v5973_v17  ;;  %v6042_v16 = vld [vmem:[#allocation8 + $0x164] ss:$28 sps:$4 sm:$0xff]  }
 0x435   :  { %v6043_v17 = vld [vmem:[#allocation8 + $0x328] ss:$28 sps:$4 sm:$0xff]  }
 0x437   :  { %4130 = vmatpush1.bf16.msra.mxu1 %v5968_v18  ;;  %4212 = vmatpush1.bf16.msra.mxu0 %v5971_v25  ;;  %v6040_v18 = vld [vmem:[#allocation8 + $0x160] ss:$28 sps:$4 sm:$0xff]   ;;  %v6044_v25 = vld [vmem:[#allocation8 + $0x168] ss:$28 sps:$4 sm:$0xff]  }
 0x438   :  { %4131 = vmatprep.subr.bf16.mxu1 %v5976_v21  ;;  %4213 = vmatprep.subr.bf16.mxu0 %v5979_v26  ;;  %v6047_v21 = vld [vmem:[#allocation8 + $0x19c] ss:$28 sps:$4 sm:$0xff]  }
 0x439   :  { %v6048_v26 = vld [vmem:[#allocation8 + $0x360] ss:$28 sps:$4 sm:$0xff]  }
 0x43b   :  { %4132 = vmatpush1.bf16.msra.mxu1 %v5974_v29  ;;  %4214 = vmatpush1.bf16.msra.mxu0 %v5977_v28  ;;  %v6045_v29 = vld [vmem:[#allocation8 + $0x198] ss:$28 sps:$4 sm:$0xff]   ;;  %v6049_v28 = vld [vmem:[#allocation8 + $0x1a0] ss:$28 sps:$4 sm:$0xff]  }
 0x43c   :  { %4133 = vmatprep.subr.bf16.mxu1 %v5982_v30  ;;  %4215 = vmatprep.subr.bf16.mxu0 %v5985_v31  ;;  %v6052_v30 = vld [vmem:[#allocation8 + $0x1d4] ss:$28 sps:$4 sm:$0xff]  }
 0x43d   :  { %v6053_v31 = vld [vmem:[#allocation8 + $0x558] ss:$28 sps:$4 sm:$0xff]  }
 0x43f   :  { %4134 = vmatpush1.bf16.msra.mxu1 %v5980_v32  ;;  %4216 = vmatpush1.bf16.msra.mxu0 %v5983_v33  ;;  %v6050_v32 = vld [vmem:[#allocation8 + $0x1d0] ss:$28 sps:$4 sm:$0xff]   ;;  %v6054_v33 = vld [vmem:[#allocation8 + $0x398] ss:$28 sps:$4 sm:$0xff]  }
 0x440   :  { %4135 = vmatprep.subr.bf16.mxu1 %v5988_v34  ;;  %4217 = vmatprep.subr.bf16.mxu0 %v5991_v36  ;;  %v6057_v34 = vld [vmem:[#allocation8 + $0x20c] ss:$28 sps:$4 sm:$0xff]  }
 0x441   :  { %v6058_v36 = vld [vmem:[#allocation8 + $0x590] ss:$28 sps:$4 sm:$0xff]  }
 0x443   :  { %4136 = vmatpush1.bf16.msra.mxu1 %v5986_v37  ;;  %4218 = vmatpush1.bf16.msra.mxu0 %v5989_v39  ;;  %v6055_v37 = vld [vmem:[#allocation8 + $0x208] ss:$28 sps:$4 sm:$0xff]   ;;  %v6059_v39 = vld [vmem:[#allocation8 + $0x3d0] ss:$28 sps:$4 sm:$0xff]  }
 0x444   :  { %4137 = vmatprep.subr.bf16.mxu1 %v5994_v40  ;;  %4219 = vmatprep.subr.bf16.mxu0 %v5997_v22  ;;  %v6062_v40 = vld [vmem:[#allocation8 + $0x244] ss:$28 sps:$4 sm:$0xff]  }
 0x445   :  { %v6063_v22 = vld [vmem:[#allocation8 + $0x5c8] ss:$28 sps:$4 sm:$0xff]  }
 0x447   :  { %4138 = vmatpush1.bf16.msra.mxu1 %v5992_v41  ;;  %4220 = vmatpush1.bf16.msra.mxu0 %v5995_v42  ;;  %v6060_v41 = vld [vmem:[#allocation8 + $0x240] ss:$28 sps:$4 sm:$0xff]   ;;  %v6064_v42 = vld [vmem:[#allocation8 + $0x408] ss:$28 sps:$4 sm:$0xff]  }
 0x448   :  { %4139 = vmatprep.subr.bf16.mxu1 %v6000_v44  ;;  %4221 = vmatprep.subr.bf16.mxu0 %v6003_v45  ;;  %v6068_v44 = vld [vmem:[#allocation8 + $0x600] ss:$28 sps:$4 sm:$0xff]   ;;  %v6065_v45 = vld [vmem:[#allocation8 + $0x278] ss:$28 sps:$4 sm:$0xff]  }
 0x44b   :  { %4140 = vmatpush1.bf16.msra.mxu1 %v5998_v46  ;;  %4222 = vmatpush1.bf16.msra.mxu0 %v6001_v47  ;;  %v6069_v46 = vld [vmem:[#allocation8 + $0x440] ss:$28 sps:$4 sm:$0xff]   ;;  %v6072_v47 = vld [vmem:[#allocation8 + $0x2b4] ss:$28 sps:$4 sm:$0xff]  }
 0x44c   :  { %4141 = vmatprep.subr.bf16.mxu1 %v6006_v49  ;;  %4223 = vmatprep.subr.bf16.mxu0 %v6009_v50  ;;  %v6070_v49 = vld [vmem:[#allocation8 + $0x2b0] ss:$28 sps:$4 sm:$0xff]   ;;  %v6074_v50 = vld [vmem:[#allocation8 + $0x478] ss:$28 sps:$4 sm:$0xff]  }
 0x44f   :  { %4142 = vmatpush1.bf16.msra.mxu1 %v6004_v51  ;;  %4224 = vmatpush1.bf16.msra.mxu0 %v6007_v52  ;;  %v6077_v51 = vld [vmem:[#allocation8 + $0x2ec] ss:$28 sps:$4 sm:$0xff]  }
 0x450   :  { %4234 = vmatprep.subr.bf16.mxu1 %v6012_v24  ;;  %5221 = vmatprep.subr.bf16.mxu0 %v6013_v54  ;;  %v6078_v52 = vld [vmem:[#allocation8 + $0x670] ss:$28 sps:$4 sm:$0xff]   ;;  %v6082_v54 = vld [vmem:[#allocation8 + $0x324] ss:$28 sps:$4 sm:$0xff]  }
 0x451   :  { %v6079_v24 = vld [vmem:[#allocation8 + $0x4b0] ss:$28 sps:$4 sm:$0xff]  }
 0x452   :  { %4144 = vmatmul.mubr.bf16.vlgmr.msra.gmra.mrb[12].mxu1 %v6585_v56  ;;  %4226 = vmatmul.mubr.bf16.vlgmr.msra.gmra.mrb[8].mxu0 %v6585_v56 }
 0x453   :  { %4235 = vmatpush1.bf16.msra.mxu1 %v6010_v55  ;;  %4266 = vmatprep.mubr.bf16.mxu1 %v6566_v35  ;;  %v6083_v55 = vld [vmem:[#allocation8 + $0x6a8] ss:$28 sps:$4 sm:$0xff]  }
 0x454   :  { %5222 = vmatpush3.bf16.msra.mxu0 %v6014_v57  ;;  %4348 = vmatprep.mubr.bf16.mxu0 %v6566_v35  ;;  %v6033_v35 = vld [vmem:[#allocation8 + $0x2b8] ss:$28 sps:$4 sm:$0xff]   ;;  %v6080_v57 = vld [vmem:[#allocation8 + $0x320] ss:$28 sps:$4 sm:$0xff]  }
 0x455   :  { %4236 = vmatprep.subr.bf16.mxu1 %v6017_v58  ;;  %5223 = vmatprep.subr.bf16.mxu0 %v6018_v59  ;;  %v6084_v58 = vld [vmem:[#allocation8 + $0x4e8] ss:$28 sps:$4 sm:$0xff]   ;;  %v6087_v59 = vld [vmem:[#allocation8 + $0x35c] ss:$28 sps:$4 sm:$0xff]  }
 0x457   :  { %4237 = vmatpush1.bf16.msra.mxu1 %v6015_v60  ;;  %v6088_v60 = vld [vmem:[#allocation8 + $0x6e0] ss:$28 sps:$4 sm:$0xff]  }
 0x458   :  { %5224 = vmatpush3.bf16.msra.mxu0 %v6019_v61  ;;  %4238 = vmatprep.subr.bf16.mxu1 %v6022_v62  ;;  %v6085_v61 = vld [vmem:[#allocation8 + $0x358] ss:$28 sps:$4 sm:$0xff]   ;;  %v6089_v62 = vld [vmem:[#allocation8 + $0x520] ss:$28 sps:$4 sm:$0xff]  }
 0x459   :  { %5225 = vmatprep.subr.bf16.mxu0 %v6023_v63  ;;  %v6092_v63 = vld [vmem:[#allocation8 + $0x394] ss:$28 sps:$4 sm:$0xff]  }
 0x45b   :  { %4239 = vmatpush1.bf16.msra.mxu1 %v6020_v0  ;;  %v6090_v0 = vld [vmem:[#allocation8 + $0x390] ss:$28 sps:$4 sm:$0xff]  }
 0x45c   :  { %5226 = vmatpush3.bf16.msra.mxu0 %v6024_v1  ;;  %4240 = vmatprep.subr.bf16.mxu1 %v6027_v2  ;;  %v6095_v1 = vld [vmem:[#allocation8 + $0x3cc] ss:$28 sps:$4 sm:$0xff]  }
 0x45d   :  { %5227 = vmatprep.subr.bf16.mxu0 %v6028_v3  ;;  %v6093_v2 = vld [vmem:[#allocation8 + $0x3c8] ss:$28 sps:$4 sm:$0xff]  }
 0x45e   :  { %v6098_v3 = vld [vmem:[#allocation8 + $0x404] ss:$28 sps:$4 sm:$0xff]  }
 0x45f   :  { %4241 = vmatpush1.bf16.msra.mxu1 %v6025_v4  ;;  %v6096_v4 = vld [vmem:[#allocation8 + $0x400] ss:$28 sps:$4 sm:$0xff]  }
 0x460   :  { %5228 = vmatpush3.bf16.msra.mxu0 %v6029_v5  ;;  %4242 = vmatprep.subr.bf16.mxu1 %v6032_v6  ;;  %v6101_v5 = vld [vmem:[#allocation8 + $0x43c] ss:$28 sps:$4 sm:$0xff]  }
 0x461   :  { %5229 = vmatprep.subr.bf16.mxu0 %v6033_v35  ;;  %v6099_v6 = vld [vmem:[#allocation8 + $0x438] ss:$28 sps:$4 sm:$0xff]  }
 0x462   :  { %v6104_v35 = vld [vmem:[#allocation8 + $0x474] ss:$28 sps:$4 sm:$0xff]  }
 0x463   :  { %4243 = vmatpush1.bf16.msra.mxu1 %v6030_v8  ;;  %v6102_v8 = vld [vmem:[#allocation8 + $0x470] ss:$28 sps:$4 sm:$0xff]  }
 0x464   :  { %5230 = vmatpush3.bf16.msra.mxu0 %v6034_v9  ;;  %4244 = vmatprep.subr.bf16.mxu1 %v6037_v10  ;;  %v6105_v9 = vld [vmem:[#allocation8 + $0x4a8] ss:$28 sps:$4 sm:$0xff]  }
 0x465   :  { %5231 = vmatprep.subr.bf16.mxu0 %v6038_v12  ;;  %v6110_v10 = vld [vmem:[#allocation8 + $0x4e4] ss:$28 sps:$4 sm:$0xff]   ;;  %v6113_v12 = vld [vmem:[#allocation8 + $0x51c] ss:$28 sps:$4 sm:$0xff]  }
 0x467   :  { %4245 = vmatpush1.bf16.msra.mxu1 %v6035_v14  ;;  %v6111_v14 = vld [vmem:[#allocation8 + $0x518] ss:$28 sps:$4 sm:$0xff]  }
 0x468   :  { %5232 = vmatpush3.bf16.msra.mxu0 %v6039_v15  ;;  %4246 = vmatprep.subr.bf16.mxu1 %v6042_v16  ;;  %v6116_v15 = vld [vmem:[#allocation8 + $0x554] ss:$28 sps:$4 sm:$0xff]  }
 0x469   :  { %5233 = vmatprep.subr.bf16.mxu0 %v6043_v17  ;;  %v6114_v16 = vld [vmem:[#allocation8 + $0x550] ss:$28 sps:$4 sm:$0xff]  }
 0x46a   :  { %v6119_v17 = vld [vmem:[#allocation8 + $0x58c] ss:$28 sps:$4 sm:$0xff]  }
 0x46b   :  { %4247 = vmatpush1.bf16.msra.mxu1 %v6040_v18  ;;  %v6117_v18 = vld [vmem:[#allocation8 + $0x588] ss:$28 sps:$4 sm:$0xff]  }
 0x46c   :  { %5234 = vmatpush3.bf16.msra.mxu0 %v6044_v25  ;;  %4248 = vmatprep.subr.bf16.mxu1 %v6047_v21  ;;  %v6122_v25 = vld [vmem:[#allocation8 + $0x5c4] ss:$28 sps:$4 sm:$0xff]  }
 0x46d   :  { %5235 = vmatprep.subr.bf16.mxu0 %v6048_v26  ;;  %v6120_v21 = vld [vmem:[#allocation8 + $0x5c0] ss:$28 sps:$4 sm:$0xff]  }
 0x46e   :  { %v6125_v26 = vld [vmem:[#allocation8 + $0x5fc] ss:$28 sps:$4 sm:$0xff]  }
 0x46f   :  { %4249 = vmatpush1.bf16.msra.mxu1 %v6045_v29  ;;  %v6123_v29 = vld [vmem:[#allocation8 + $0x5f8] ss:$28 sps:$4 sm:$0xff]  }
 0x470   :  { %5236 = vmatpush3.bf16.msra.mxu0 %v6049_v28  ;;  %4250 = vmatprep.subr.bf16.mxu1 %v6052_v30  ;;  %v6128_v28 = vld [vmem:[#allocation8 + $0x634] ss:$28 sps:$4 sm:$0xff]  }
 0x471   :  { %5243 = vmatprep.subr.bf16.mxu0 %v6053_v31  ;;  %v6126_v30 = vld [vmem:[#allocation8 + $0x630] ss:$28 sps:$4 sm:$0xff]  }
 0x472   :  { %v6131_v31 = vld [vmem:[#allocation8 + $0x66c] ss:$28 sps:$4 sm:$0xff]  }
 0x473   :  { %4349 = vmatmul.mubr.bf16.vlgmr.msra.gmra.mrb[12].mxu0 %v6568_v38  ;;  %4251 = vmatpush1.bf16.msra.mxu1 %v6050_v32  ;;  %v6129_v32 = vld [vmem:[#allocation8 + $0x668] ss:$28 sps:$4 sm:$0xff]  }
 0x474   :  { %5244 = vmatpush3.bf16.msra.mxu0 %v6054_v33  ;;  %4388 = vmatprep.mubr.bf16.mxu0 %v6578_v13  ;;  %v6134_v33 = vld [vmem:[#allocation8 + $0x6a4] ss:$28 sps:$4 sm:$0xff]  }
 0x475   :  { %4252 = vmatprep.subr.bf16.mxu1 %v6057_v34  ;;  %5245 = vmatprep.subr.bf16.mxu0 %v6058_v36  ;;  %v6132_v34 = vld [vmem:[#allocation8 + $0x6a0] ss:$28 sps:$4 sm:$0xff]  }
 0x476   :  { %v6137_v36 = vld [vmem:[#allocation8 + $0x6dc] ss:$28 sps:$4 sm:$0xff]  }
 0x477   :  { %4253 = vmatpush1.bf16.msra.mxu1 %v6055_v37  ;;  %v6135_v37 = vld [vmem:[#allocation8 + $0x6d8] ss:$28 sps:$4 sm:$0xff]  }
 0x478   :  { %5246 = vmatpush3.bf16.msra.mxu0 %v6059_v39  ;;  %4254 = vmatprep.subr.bf16.mxu1 %v6062_v40  ;;  %v6600_v39 = vld [vmem:[%s6760_s9] sm:$0xff] }
 0x479   :  { %5247 = vmatprep.subr.bf16.mxu0 %v6063_v22  ;;  %v2886_v40 = vrot.slane %v6600_v39, %v6519_v20  ;;  %v2894_v22 = vrot.slane %v6600_v39, %v6541_v7 }
 0x47b   :  { %4255 = vmatpush1.bf16.msra.mxu1 %v6060_v41  ;;  %v2890_v41 = vrot.slane %v6600_v39, %v6527_v11 }
 0x47c   :  { %5248 = vmatpush3.bf16.msra.mxu0 %v6064_v42  ;;  %4256 = vmatprep.subr.bf16.mxu1 %v6067_v43  ;;  %v6182_v42 = vld [vmem:[%s6751_s0] sm:$0xff] }
 0x47d   :  { %5249 = vmatprep.subr.bf16.mxu0 %v6068_v44  ;;  %v4495_v43 = vunpack.c.l.bf16 %v6182_v42  ;;  %v4496_v7 = vunpack.c.h.bf16 %v6182_v42 }
 0x47f   :  { %4257 = vmatpush1.bf16.msra.mxu1 %v6065_v45 }
 0x480   :  { %5250 = vmatpush3.bf16.msra.mxu0 %v6069_v46  ;;  %4258 = vmatprep.subr.bf16.mxu1 %v6072_v47 }
 0x481   :  { %5251 = vmatprep.subr.bf16.mxu0 %v6073_v48 }
 0x483   :  { %4259 = vmatpush1.bf16.msra.mxu1 %v6070_v49 }
 0x484   :  { %5252 = vmatpush3.bf16.msra.mxu0 %v6074_v50  ;;  %4260 = vmatprep.subr.bf16.mxu1 %v6077_v51 }
 0x485   :  { %5253 = vmatprep.subr.bf16.mxu0 %v6078_v52 }
 0x487   :  { %4261 = vmatpush1.bf16.msra.mxu1 %v6075_v53 }
 0x488   :  { %5254 = vmatpush3.bf16.msra.mxu0 %v6079_v24  ;;  %4262 = vmatprep.subr.bf16.mxu1 %v6082_v54 }
 0x489   :  { %5255 = vmatprep.subr.bf16.mxu0 %v6083_v55 }
 0x48b   :  { %4263 = vmatpush1.bf16.msra.mxu1 %v6080_v57 }
 0x48c   :  { %5256 = vmatpush3.bf16.msra.mxu0 %v6084_v58  ;;  %4264 = vmatprep.subr.bf16.mxu1 %v6087_v59 }
 0x48d   :  { %5257 = vmatprep.subr.bf16.mxu0 %v6088_v60 }
 0x48f   :  { %4265 = vmatpush1.bf16.msra.mxu1 %v6085_v61 }
 0x490   :  { %5258 = vmatpush3.bf16.msra.mxu0 %v6089_v62  ;;  %4275 = vmatprep.subr.bf16.mxu1 %v6092_v63 }
 0x492   :  { %4267 = vmatmul.mubr.bf16.vlgmr.msra.gmra.mrb[16].mxu1 %v6568_v38  ;;  %v6107_v38 = vld [vmem:[#allocation8 + $0x4ac] ss:$28 sps:$4 sm:$0xff]  }
 0x493   :  { %4389 = vmatmul.mubr.bf16.vlgmr.msra.gmra.mrb[16].mxu0 %v6585_v56  ;;  %4276 = vmatpush1.bf16.msra.mxu1 %v6090_v0 }
 0x494   :  { %4307 = vmatprep.mubr.bf16.mxu1 %v6578_v13  ;;  %4277 = vmatprep.subr.bf16.mxu1 %v6095_v1  ;;  %v6108_v13 = vld [vmem:[#allocation8 + $0x4e0] ss:$28 sps:$4 sm:$0xff]  }
 0x497   :  { %4278 = vmatpush1.bf16.msra.mxu1 %v6093_v2 }
 0x498   :  { %4279 = vmatprep.subr.bf16.mxu1 %v6098_v3 }
 0x49b   :  { %4280 = vmatpush1.bf16.msra.mxu1 %v6096_v4 }
 0x49c   :  { %4281 = vmatprep.subr.bf16.mxu1 %v6101_v5 }
 0x49f   :  { %4282 = vmatpush1.bf16.msra.mxu1 %v6099_v6 }
 0x4a0   :  { %4283 = vmatprep.subr.bf16.mxu1 %v6104_v35 }
 0x4a3   :  { %4284 = vmatpush1.bf16.msra.mxu1 %v6102_v8 }
 0x4a4   :  { %4285 = vmatprep.subr.bf16.mxu1 %v6107_v38 }
 0x4a7   :  { %4286 = vmatpush1.bf16.msra.mxu1 %v6105_v9 }
 0x4a8   :  { %4287 = vmatprep.subr.bf16.mxu1 %v6110_v10 }
 0x4ab   :  { %4288 = vmatpush1.bf16.msra.mxu1 %v6108_v13 }
 0x4ac   :  { %4289 = vmatprep.subr.bf16.mxu1 %v6113_v12 }
 0x4af   :  { %4290 = vmatpush1.bf16.msra.mxu1 %v6111_v14  ;;  %v6183_v14 = vld [vmem:[%s6751_s0 + $0x8] sm:$0xff] }
 0x4b0   :  { %4291 = vmatprep.subr.bf16.mxu1 %v6116_v15  ;;  %v4497_v15 = vunpack.c.l.bf16 %v6183_v14 }
 0x4b3   :  { %4292 = vmatpush1.bf16.msra.mxu1 %v6114_v16 }
 0x4b4   :  { %4293 = vmatprep.subr.bf16.mxu1 %v6119_v17 }
 0x4b7   :  { %4294 = vmatpush1.bf16.msra.mxu1 %v6117_v18 }
 0x4b8   :  { %4295 = vmatprep.subr.bf16.mxu1 %v6122_v25 }
 0x4bb   :  { %4296 = vmatpush1.bf16.msra.mxu1 %v6120_v21  ;;  %v4498_v21 = vunpack.c.h.bf16 %v6183_v14 }
 0x4bc   :  { %4297 = vmatprep.subr.bf16.mxu1 %v6125_v26 }
 0x4bf   :  { %4298 = vmatpush1.bf16.msra.mxu1 %v6123_v29 }
 0x4c0   :  { %4299 = vmatprep.subr.bf16.mxu1 %v6128_v28 }
 0x4c3   :  { %4300 = vmatpush1.bf16.msra.mxu1 %v6126_v30 }
 0x4c4   :  { %4301 = vmatprep.subr.bf16.mxu1 %v6131_v31 }
 0x4c7   :  { %4302 = vmatpush1.bf16.msra.mxu1 %v6129_v32 }
 0x4c8   :  { %4303 = vmatprep.subr.bf16.mxu1 %v6134_v33 }
 0x4cb   :  { %4304 = vmatpush1.bf16.msra.mxu1 %v6132_v34 }
 0x4cc   :  { %4305 = vmatprep.subr.bf16.mxu1 %v6137_v36 }
 0x4cf   :  { %4306 = vmatpush1.bf16.msra.mxu1 %v6135_v37 }
 0x4d2   :  { %4308 = vmatmul.mubr.bf16.vlgmr.msra.gmra.mrb[16].mxu1 %v6585_v56  ;;  %v2898_v56 = vrot.slane %v6600_v39, %v6530_v23 }
 0x525   :  { %v4145_v44 = vpop.f32.mrb[12].mxu1  ;;  %v4227_v45 = vpop.f32.mrb[8].mxu0 }
 0x526   :  { %v6613_v46 = vadd.f32 %v4145_v44, %v2886_v40  ;;  %v6615_v47 = vadd.f32 %v4227_v45, %v2894_v22  ;;  %v4147_v20 = vpop.f32.mrb[13].mxu1  ;;  %v4229_v48 = vpop.f32.mrb[9].mxu0 }
 0x527   :  { %v6617_v49 = vadd.f32 %v4147_v20, %v2890_v41  ;;  %v4149_v11 = vpop.f32.mrb[14].mxu1  ;;  %v4231_v50 = vpop.f32.mrb[10].mxu0  ;;  %v6622_v23 = vadd.f32 %v4229_v48, %v2898_v56 }
 0x528   :  { %v4396_v51 = vand.u32 2147483647, %v6613_v46  ;;  %v4502_v52 = vmax.f32 %v6613_v46, 0.0  ;;  %v4509_v53 = vmul.f32 %v6613_v46, %v4495_v43  ;;  %v4150_v24 = vpop.f32.mrb[15].mxu1  ;;  %v4232_v54 = vpop.f32.mrb[11].mxu0  ;;  %v4504_v17 = vmax.f32 %v6615_v47, 0.0 }
 0x529   :  { %v4398_v55 = vand.u32 2147483647, %v6615_v47  ;;  %v4397_v59 = vand.u32 2147483647, %v6617_v49  ;;  %v4503_v61 = vmax.f32 %v6617_v49, 0.0  ;;  %v4510_v62 = vmul.f32 %v6617_v49, %v4496_v7 }
 0x52a   :  { %v4403_v57 = vsub.f32 0.0, %v4396_v51  ;;  %v6625_v58 = vsub.f32 %v4502_v52, %v4509_v53  ;;  %v4399_v1 = vand.u32 2147483647, %v6622_v23  ;;  %v4511_v18 = vmul.f32 %v6615_v47, %v4497_v15 }
 0x52b   :  { %v4405_v60 = vsub.f32 0.0, %v4398_v55  ;;  %v4404_v0 = vsub.f32 0.0, %v4397_v59  ;;  %v6631_v3 = vsub.f32 %v4503_v61, %v4510_v62  ;;  %vm4438_vm4 = vcmp.ge.f32.partialorder %v6613_v46, 0.0 }
 0x52c   :  { %v4410_v63 = vmul.f32 1.442695, %v4403_v57  ;;  %v4406_v5 = vsub.f32 0.0, %v4399_v1  ;;  %vm4440_vm5 = vcmp.ge.f32.partialorder %v6615_v47, 0.0  ;;  %vm4439_vm6 = vcmp.ge.f32.partialorder %v6617_v49, 0.0 }
 0x52d   :  { %v4414_v2 = vmul.f32 1.442695, %v4405_v60  ;;  %v4412_v4 = vmul.f32 1.442695, %v4404_v0  ;;  %v4518_v32 = vsub.f32 %v4504_v17, %v4511_v18  ;;  %vm4441_vm7 = vcmp.ge.f32.partialorder %v6622_v23, 0.0 }
 0x52e   :  { %6140 = vpow2.f32 %v4410_v63  ;;  %v4416_v6 = vmul.f32 1.442695, %v4406_v5  ;;  %v4505_v22 = vmax.f32 %v6622_v23, 0.0  ;;  %v4512_v41 = vmul.f32 %v6622_v23, %v4498_v21 }
 0x52f   :  { %6142 = vpow2.f32 %v4414_v2  ;;  %v2901_v59 = vsub.s32 4, %v6516_v19 }
 0x530   :  { %6144 = vpow2.f32 %v4412_v4  ;;  %v4519_v17 = vsub.f32 %v4505_v22, %v4512_v41 }
 0x531   :  { %6146 = vpow2.f32 %v4416_v6 }
 0x538   :  { %v6141_v35 = vpop.eup %6140 }
 0x539   :  { %v6633_v8 = vpop.eup %6142  ;;  %v4424_v38 = vadd.f32 1.0, %v6141_v35  ;;  %v4526_v25 = vmul.f32 -0.5, %v6141_v35  ;;  %v4529_v26 = vand.u32 2147483647, %v6141_v35 }
 0x53a   :  { %v6635_v9 = vpop.eup %6144  ;;  %v4426_v10 = vadd.f32 1.0, %v6633_v8  ;;  %v4544_v28 = vmul.f32 -0.5, %v6633_v8  ;;  %v4547_v30 = vand.u32 2147483647, %v6633_v8 }
 0x53b   :  { %6148 = vrcp.f32 %v4424_v38  ;;  %v4425_v13 = vadd.f32 1.0, %v6635_v9  ;;  %v6639_v12 = vpop.eup %6146  ;;  %v4535_v29 = vmul.f32 -0.5, %v6635_v9  ;;  %v4527_v33 = vadd.f32 1.0, %v4526_v25 }
 0x53c   :  { %6150 = vrcp.f32 %v4426_v10  ;;  %v4427_v16 = vadd.f32 1.0, %v6639_v12  ;;  %v4538_v34 = vand.u32 2147483647, %v6635_v9  ;;  %v4553_v36 = vmul.f32 -0.5, %v6639_v12 }
 0x53d   :  { %6152 = vrcp.f32 %v4425_v13  ;;  %vm6659_vm8 = vcmp.lt.f32.partialorder %v4529_v26, 0.0004427343  ;;  %v4536_v20 = vadd.f32 1.0, %v4535_v29  ;;  %v4545_v48 = vadd.f32 1.0, %v4544_v28 }
 0x53e   :  { %6154 = vlog2.f32 %v4424_v38  ;;  %vm6666_vm9 = vcmp.lt.f32.partialorder %v4547_v30, 0.0004427343  ;;  %v4528_v57 = vmul.f32 %v6141_v35, %v4527_v33  ;;  %vm6670_vm10 = vcmp.lt.f32.partialorder %v4538_v34, 0.0004427343 }
 0x53f   :  { %6156 = vrcp.f32 %v4427_v16  ;;  %v4554_v60 = vadd.f32 1.0, %v4553_v36  ;;  %v4556_v0 = vand.u32 2147483647, %v6639_v12  ;;  %v4537_v5 = vmul.f32 %v6635_v9, %v4536_v20 }
 0x540   :  { %6158 = vlog2.f32 %v4425_v13  ;;  %v4546_v49 = vmul.f32 %v6633_v8, %v4545_v48  ;;  %v2909_v29 = vsub.s32 6, %v6516_v19 }
 0x541   :  { %6160 = vlog2.f32 %v4426_v10  ;;  %v4555_v15 = vmul.f32 %v6639_v12, %v4554_v60  ;;  %vm4557_vm11 = vcmp.lt.f32.partialorder %v4556_v0, 0.0004427343  ;;  %v2905_v60 = vsub.s32 5, %v6516_v19 }
 0x542   :  { %6162 = vlog2.f32 %v4427_v16 }
 0x545   :  { %v6149_v31 = vpop.eup %6148 }
 0x546   :  { %v6151_v37 = vpop.eup %6150  ;;  %v4445_v40 = vmul.f32 %v6149_v31, %v6141_v35  ;;  %v5237_v42 = vpop.f32.mrb[12].mxu0 }
 0x547   :  { %v6153_v43 = vpop.eup %6152  ;;  %v4447_v56 = vmul.f32 %v6151_v37, %v6633_v8  ;;  %v5238_v44 = vpop.f32.mrb[13].mxu0 }
 0x548   :  { %v6155_v7 = vpop.eup %6154  ;;  %v4452_v11 = vsel %vm4438_vm4, %v6149_v31, %v4445_v40  ;;  %v4446_v50 = vmul.f32 %v6153_v43, %v6635_v9  ;;  %v5239_v51 = vadd.f32 %v5238_v44, %v5237_v42  ;;  %v5240_v52 = vpop.f32.mrb[14].mxu0 }
 0x549   :  { %v6157_v24 = vpop.eup %6156  ;;  %v5241_v54 = vpop.f32.mrb[15].mxu0  ;;  %v4525_v55 = vmul.f32 0.6931472, %v6155_v7  ;;  %v4454_v46 = vsel %vm4440_vm5, %v6151_v37, %v4447_v56 }
 0x54a   :  { %v6159_v61 = vpop.eup %6158  ;;  %v4453_v62 = vsel %vm4439_vm6, %v6153_v43, %v4446_v50  ;;  %v4448_v63 = vmul.f32 %v6157_v24, %v6639_v12  ;;  %v2910_v12 = vrot.slane %v6600_v39, %v2909_v29  ;;  %v6184_v43 = vld [vmem:[%s6751_s0 + $0x18] sm:$0xf] }
 0x54b   :  { %v6161_v1 = vpop.eup %6160  ;;  %v4531_v2 = vsel %vm6659_vm8, %v4528_v57, %v4525_v55  ;;  %v4534_v4 = vmul.f32 0.6931472, %v6159_v61  ;;  %v5217_v6 = vpack.c.bf16 %v4453_v62, %v4452_v11  ;;  %v4501_v56 = vunpack.c.l.bf16 %v6184_v43 }
 0x54c   :  { %v6163_v35 = vpop.eup %6162  ;;  %v4455_v47 = vsel %vm4441_vm7, %v6157_v24, %v4448_v63  ;;  %v4543_v38 = vmul.f32 0.6931472, %v6161_v1  ;;  %v4586_v10 = vadd.f32 %v4531_v2, %v6625_v58  ;;  %v4351_v31 = vadd.f32 %v5239_v51, %v2910_v12 }
 0x54d   :  { %v4540_v13 = vsel %vm6670_vm10, %v4537_v5, %v4534_v4  ;;  %v4552_v14 = vmul.f32 0.6931472, %v6163_v35  ;;  %v5218_v16 = vpack.c.bf16 %v4455_v47, %v4454_v46  ;;  %4488 = vst [vmem:[#allocation10] sm:$0xff] %v5217_v6  ;;  %v2902_v61 = vrot.slane %v6600_v39, %v2901_v59 }
 0x54e   :  { %v4549_v9 = vsel %vm6666_vm9, %v4546_v49, %v4543_v38  ;;  %v4587_v23 = vadd.f32 %v4540_v13, %v6631_v3  ;;  %v2906_v46 = vrot.slane %v6600_v39, %v2905_v60  ;;  %v6185_v39 = vld [vmem:[%s6751_s0 + $0x10] sm:$0xff]  ;;  %s6361_s0 = smov [#allocation11]  }
 0x54f   :  { %v4558_v18 = vsel %vm4557_vm11, %v4555_v15, %v4552_v14  ;;  %v4588_v25 = vadd.f32 %v4549_v9, %v4518_v32  ;;  %4489 = vst [vmem:[#allocation10 + $0x8] sm:$0xff] %v5218_v16  ;;  %v4499_v15 = vunpack.c.l.bf16 %v6185_v39  ;;  %v4500_v9 = vunpack.c.h.bf16 %v6185_v39  ;;  %s4629_s8 = sshll.u32 %s6361_s0, 4  ;;  %s4630_s8 = int_to_ptr.vmem [resolvable:$true] %s4629_s8 }
 0x550   :  { %v4589_v8 = vadd.f32 %v4558_v18, %v4519_v17  ;;  %v4593_v58 = vadd.f32 %v4587_v23, %v4586_v10  ;;  %s6274_s28 = scalar_lea.vmem %s4630_s8, 128  ;;  %p6279_p5 = scmp.lt.s32.totalorder %s4630_s8, %s4630_s8 }
 0x551   :  { %p6275_p4 = scmp.ne.s32.totalorder %s4630_s8, %s6274_s28  ;;  %p6280_p6 = scmp.lt.s32.totalorder %s6274_s28, %s6274_s28 }
 0x552   :  { %v4594_v21 = vadd.f32 %v4593_v58, %v4588_v25 }
 0x553   :  { %p6281_p7 = por %p6280_p6, %p6279_p5 }
 0x554   :  { %v6693_v26 = vadd.f32 %v4594_v21, %v4589_v8 }
 0x555   :  { %p6282_p8 = pnand %p6281_p7, %p6275_p4 }
 0x566   :  { %v5259_v28 = vpop.f32.mrb[16].mxu0 }
 0x567   :  { %v5260_v30 = vpop.f32.mrb[17].mxu0 }
 0x568   :  { %v5261_v33 = vadd.f32 %v5260_v30, %v5259_v28  ;;  %v5262_v34 = vpop.f32.mrb[18].mxu0 }
 0x569   :  { %v5263_v36 = vpop.f32.mrb[19].mxu0 }
 0x56a   :  { %v4391_v37 = vadd.f32 %v5261_v33, %v4351_v31 }
 0x56c   :  { %v4402_v3 = vand.u32 2147483647, %v4391_v37  ;;  %v4508_v45 = vmax.f32 %v4391_v37, 0.0  ;;  %v4515_v20 = vmul.f32 %v4501_v56, %v4391_v37  ;;  %vm4444_vm12 = vcmp.ge.f32.partialorder %v4391_v37, 0.0 }
 0x56e   :  { %v4409_v40 = vsub.f32 0.0, %v4402_v3  ;;  %v4522_v53 = vsub.f32 %v4508_v45, %v4515_v20 }
 0x570   :  { %v4422_v32 = vmul.f32 1.442695, %v4409_v40 }
 0x572   :  { %6164 = vpow2.f32 %v4422_v32 }
 0x57c   :  { %v6165_v22 = vpop.eup %6164 }
 0x57d   :  { %v4430_v41 = vadd.f32 1.0, %v6165_v22  ;;  %v4580_v42 = vmul.f32 -0.5, %v6165_v22  ;;  %v4583_v48 = vand.u32 2147483647, %v6165_v22 }
 0x57f   :  { %6166 = vrcp.f32 %v4430_v41  ;;  %v4581_v44 = vadd.f32 1.0, %v4580_v42  ;;  %vm4584_vm13 = vcmp.lt.f32.partialorder %v4583_v48, 0.0004427343 }
 0x580   :  { %6168 = vlog2.f32 %v4430_v41 }
 0x581   :  { %v4582_v52 = vmul.f32 %v6165_v22, %v4581_v44 }
 0x589   :  { %v6167_v7 = vpop.eup %6166 }
 0x58a   :  { %v6169_v11 = vpop.eup %6168  ;;  %v4451_v50 = vmul.f32 %v6167_v7, %v6165_v22 }
 0x58b   :  { %v4579_v51 = vmul.f32 0.6931472, %v6169_v11 }
 0x58c   :  { %v4458_v24 = vsel %vm4444_vm12, %v6167_v7, %v4451_v50 }
 0x58d   :  { %v4585_v54 = vsel %vm4584_vm13, %v4582_v52, %v4579_v51  ;;  %v5220_v55 = vpack.c.bf16 %v4458_v24, %v4458_v24 }
 0x58e   :  { %v6700_v57 = vadd.f32 %v4585_v54, %v4522_v53 }
 0x58f   :  { %4492 = vst.msk [vmem:[#allocation10 + $0x18] sm:$0xf] %vm4491_vm14, %v5220_v55 }
 0x5a5   :  { %v4309_v62 = vpop.f32.mrb[16].mxu1 }
 0x5a6   :  { %v5275_v63 = vadd.f32 %v4309_v62, %v2902_v61  ;;  %v4311_v0 = vpop.f32.mrb[17].mxu1 }
 0x5a7   :  { %v5276_v1 = vadd.f32 %v4311_v0, %v2906_v46  ;;  %v4313_v2 = vpop.f32.mrb[18].mxu1 }
 0x5a8   :  { %v4400_v4 = vand.u32 2147483647, %v5275_v63  ;;  %v4314_v5 = vpop.f32.mrb[19].mxu1  ;;  %v4506_v23 = vmax.f32 %v5275_v63, 0.0  ;;  %v4513_v18 = vmul.f32 %v5275_v63, %v4499_v15  ;;  %vm4442_vm15 = vcmp.ge.f32.partialorder %v5275_v63, 0.0 }
 0x5a9   :  { %v4401_v6 = vand.u32 2147483647, %v5276_v1  ;;  %v4507_v28 = vmax.f32 %v5276_v1, 0.0  ;;  %v4514_v30 = vmul.f32 %v5276_v1, %v4500_v9  ;;  %vm4443_vm0 = vcmp.ge.f32.partialorder %v5276_v1, 0.0 }
 0x5aa   :  { %v4407_v35 = vsub.f32 0.0, %v4400_v4  ;;  %v4520_v3 = vsub.f32 %v4506_v23, %v4513_v18 }
 0x5ab   :  { %v4408_v47 = vsub.f32 0.0, %v4401_v6  ;;  %v4521_v43 = vsub.f32 %v4507_v28, %v4514_v30 }
 0x5ac   :  { %v4418_v38 = vmul.f32 1.442695, %v4407_v35 }
 0x5ad   :  { %v4420_v49 = vmul.f32 1.442695, %v4408_v47 }
 0x5ae   :  { %6170 = vpow2.f32 %v4418_v38 }
 0x5af   :  { %6172 = vpow2.f32 %v4420_v49 }
 0x5b8   :  { %v6171_v10 = vpop.eup %6170 }
 0x5b9   :  { %v6173_v19 = vpop.eup %6172  ;;  %v4428_v13 = vadd.f32 1.0, %v6171_v10  ;;  %v4562_v16 = vmul.f32 -0.5, %v6171_v10  ;;  %v4565_v58 = vand.u32 2147483647, %v6171_v10 }
 0x5ba   :  { %v4429_v14 = vadd.f32 1.0, %v6173_v19  ;;  %v4571_v17 = vmul.f32 -0.5, %v6173_v19  ;;  %v4574_v31 = vand.u32 2147483647, %v6173_v19 }
 0x5bb   :  { %6174 = vrcp.f32 %v4428_v13  ;;  %v4563_v25 = vadd.f32 1.0, %v4562_v16  ;;  %vm4566_vm1 = vcmp.lt.f32.partialorder %v4565_v58, 0.0004427343 }
 0x5bc   :  { %6176 = vrcp.f32 %v4429_v14  ;;  %v4572_v21 = vadd.f32 1.0, %v4571_v17  ;;  %vm4575_vm2 = vcmp.lt.f32.partialorder %v4574_v31, 0.0004427343 }
 0x5bd   :  { %6178 = vlog2.f32 %v4428_v13  ;;  %v4564_v32 = vmul.f32 %v6171_v10, %v4563_v25 }
 0x5be   :  { %6180 = vlog2.f32 %v4429_v14  ;;  %v4573_v42 = vmul.f32 %v6173_v19, %v4572_v21 }
 0x5c5   :  { %v6175_v8 = vpop.eup %6174 }
 0x5c6   :  { %v6177_v29 = vpop.eup %6176  ;;  %v4449_v12 = vmul.f32 %v6175_v8, %v6171_v10 }
 0x5c7   :  { %v6179_v33 = vpop.eup %6178  ;;  %v4450_v34 = vmul.f32 %v6177_v29, %v6173_v19 }
 0x5c8   :  { %v6181_v36 = vpop.eup %6180  ;;  %v4456_v37 = vsel %vm4442_vm15, %v6175_v8, %v4449_v12  ;;  %v4561_v40 = vmul.f32 0.6931472, %v6179_v33 }
 0x5c9   :  { %v4457_v22 = vsel %vm4443_vm0, %v6177_v29, %v4450_v34  ;;  %v4570_v41 = vmul.f32 0.6931472, %v6181_v36 }
 0x5ca   :  { %v4567_v56 = vsel %vm4566_vm1, %v4564_v32, %v4561_v40  ;;  %v5219_v44 = vpack.c.bf16 %v4457_v22, %v4456_v37 }
 0x5cb   :  { %v4576_v45 = vsel %vm4575_vm2, %v4573_v42, %v4570_v41  ;;  %v4590_v20 = vadd.f32 %v4567_v56, %v4520_v3 }
 0x5cc   :  { %v4591_v48 = vadd.f32 %v4576_v45, %v4521_v43  ;;  %4490 = vst [vmem:[#allocation10 + $0x10] sm:$0xff] %v5219_v44 }
 0x5cd   :  { %v4596_v7 = vadd.f32 %v6693_v26, %v4590_v20 }
 0x5cf   :  { %v4597_v11 = vadd.f32 %v4596_v7, %v4591_v48 }
 0x5d1   :  { %v4598_v50 = vadd.f32 %v4597_v11, %v6700_v57 }
 0x5d3   :  { %4599 = vadd.xlane.f32.xlu0 %v4598_v50 }
 0x5d7   :  { %4607 = vadd.xlane.f32.xlu0 %v6554_v27 }
 0x5d8   :  { %6285 = shalt.err (!%p6282_p8)
}
 0x5d9   :  { %s6286_s2 = scalar_lea.hbm %s6762_s11, 128 }
 0x5da   :  { %p6287_p9 = scmp.ne.s32.totalorder %s6762_s11, %s6286_s2  ;;  %p6290_p10 = scmp.lt.u32.totalorder %s6286_s2, %s6762_s11 }
 0x5dc   :  { %p6292_p11 = pnand %p6290_p10, %p6287_p9 }
 0x5de   :  { %6295 = shalt.err (!%p6292_p11)
}
 0x5df   :  { %4632 = dma.vmem_to_hbm [thread:$0]  %s4630_s8, 128, %s6762_s11, [#allocation12]  }
 0x5e0   :  { %s6296_s5 = scalar_lea.vmem %s4620_s27, 448  ;;  %p6301_p13 = scmp.lt.s32.totalorder %s4620_s27, %s4620_s27 }
 0x5e1   :  { %p6297_p12 = scmp.ne.s32.totalorder %s4620_s27, %s6296_s5  ;;  %p6302_p0 = scmp.lt.s32.totalorder %s6296_s5, %s6296_s5 }
 0x5e3   :  { %p6303_p1 = por %p6302_p0, %p6301_p13 }
 0x5e5   :  { %p6304_p2 = pnand %p6303_p1, %p6297_p12 }
 0x5e7   :  { %6307 = shalt.err (!%p6304_p2)
}
 0x5e8   :  { %s6308_s7 = scalar_lea.hbm %s6761_s10, 448 }
 0x5e9   :  { %p6309_p3 = scmp.ne.s32.totalorder %s6761_s10, %s6308_s7  ;;  %p6312_p4 = scmp.lt.u32.totalorder %s6308_s7, %s6761_s10 }
 0x5eb   :  { %p6314_p5 = pnand %p6312_p4, %p6309_p3 }
 0x5ed   :  { %6317 = shalt.err (!%p6314_p5)
}
 0x5ee   :  { %4622 = dma.vmem_to_hbm [thread:$0]  %s4620_s27, 448, %s6761_s10, [#allocation4]  }
 0x5ef   :  { %s6363_s6 = smov [#allocation13]  }
 0x5f0   :  { %s4639_s4 = sshll.u32 %s6363_s6, 4  ;;  %s4640_s4 = int_to_ptr.vmem [resolvable:$true] %s4639_s4 }
 0x5f1   :  { %s6318_s26 = scalar_lea.vmem %s4640_s4, 128  ;;  %p6323_p7 = scmp.lt.s32.totalorder %s4640_s4, %s4640_s4 }
 0x5f2   :  { %p6319_p6 = scmp.ne.s32.totalorder %s4640_s4, %s6318_s26  ;;  %p6324_p8 = scmp.lt.s32.totalorder %s6318_s26, %s6318_s26 }
 0x5f4   :  { %p6325_p9 = por %p6324_p8, %p6323_p7 }
 0x5f6   :  { %p6326_p10 = pnand %p6325_p9, %p6319_p6 }
 0x5f8   :  { %6329 = shalt.err (!%p6326_p10)
}
 0x5f9   :  { %s6330_s8 = scalar_lea.hbm %s6763_s12, 128 }
 0x5fa   :  { %p6331_p11 = scmp.ne.s32.totalorder %s6763_s12, %s6330_s8  ;;  %p6334_p12 = scmp.lt.u32.totalorder %s6330_s8, %s6763_s12 }
 0x5fc   :  { %p6336_p13 = pnand %p6334_p12, %p6331_p11 }
 0x5fe   :  { %6339 = shalt.err (!%p6336_p13)
}
 0x5ff   :  { %4642 = dma.vmem_to_hbm [thread:$0]  %s4640_s4, 128, %s6763_s12, [#allocation12]   ;;  %vm4611_vm3 = vcmask 7168  }
 0x660   :  { %v4600_v27 = vpop.xlane.xlu0 %4599 }
 0x661   :  { %v5216_v51 = vadd.f32 -77.632484, %v4600_v27 }
 0x664   :  { %v4608_v26 = vpop.xlane.xlu0 %4607 }
 0x665   :  { %v4609_v52 = vmul.f32 -0.5, %v4608_v26 }
 0x667   :  { %v4610_v53 = vadd.f32 %v5216_v51, %v4609_v52 }
 0x669   :  { %4612 = vst.msk [vmem:[%s6764_s13] sm:$0xff] %vm4611_vm3, %v4610_v53 }
 0x66a   :  { %6346 = dma.done.wait [#allocation4], 448  }
 0x66b   :  { %6347 = vsyncadd [#allocation4], 4294966848 }
 0x66c   :  { %6348 = dma.done.wait [#allocation12], 256  }
 0x66d   :  { %6349 = vsyncadd [#allocation12], 4294967040 }
 0x66e   :  { %4656 = vsyncpa [#allocation3], 1 }
 0x66f   :  { %4657 = vsyncpa [#allocation6], 1 }
 0x670   :  { %4658 = vsyncpa [#allocation9], 1 }
 0x671   :  { %4659 = vsyncpa [#allocation4], 1 }
 0x672   :  { %4660 = vsyncpa [#allocation12], 1 }

</bundles_post_ra>
